<compile_context>
chip_gen: v7x
topology: tpu7x:2x2x1
jax: 0.10.0
libtpu: 0.0.40
codegen_flags: <defaults>
</compile_context>

<pallas_src>
import functools

import jax
import jax.numpy as jnp
from jax import lax
from jax.experimental import pallas as pl
from jax.experimental.pallas import tpu as pltpu

EPS = 1e-5


def _bn_fold(h, gamma, beta, relu):
    """Training-mode BatchNorm over rows (per lane/channel), folded.

    Two-pass variance (mean first, then centred sum of squares) for numerical
    robustness; stats folded into one per-channel scale/bias so normalization
    is a single mul + add per element.  gamma/beta: (1, C) f32; h: (R, C) f32.
    """
    inv_r = 1.0 / h.shape[0]
    mean = jnp.sum(h, axis=0, keepdims=True) * inv_r
    d = h - mean
    var = jnp.sum(d * d, axis=0, keepdims=True) * inv_r   # biased (PyTorch train)
    scale = gamma * lax.rsqrt(var + EPS)
    bias = beta - mean * scale
    y = h * scale + bias
    return jnp.maximum(y, 0.0) if relu else y


def bottleneck_kernel(x_ref, w1_ref, w2_ref, w3_ref, bn_ref, out_ref, *,
                      conv2_im2col, tap_bf16):
    N, H, W, Cin = x_ref.shape
    width = w1_ref.shape[1]
    Cout = w3_ref.shape[1]
    R = N * H * W

    # All six BN vectors arrive packed in one (6, Cmax) f32 array -> one DMA.
    bn = bn_ref[...]
    g1, b1 = bn[0:1, :width], bn[1:2, :width]
    g2, b2 = bn[2:3, :width], bn[3:4, :width]
    g3, b3 = bn[4:5, :Cout], bn[5:6, :Cout]

    # Leading-dim collapse only (lane dim unchanged) -> layout preserving.
    x = x_ref[...].reshape(R, Cin)                        # f32 identity path

    # ---- conv1 (1x1) + bn1 + relu: one MXU matmul (bf16 operands, f32 acc) --
    h1 = _bn_fold(
        jnp.dot(x.astype(jnp.bfloat16), w1_ref[...],
                preferred_element_type=jnp.float32),
        g1, b1, relu=True)                                # (R, width)

    # ---- conv2 (3x3, pad=1, stride=1) ---------------------------------------
    # Shifted taps of the flattened activation via pltpu.roll (XLU slot,
    # overlaps MXU/VPU); roll wrap-around is always killed by the masks.
    # Masks are hoisted out of the tap loop: 4 compares total, the centre tap
    # needs no select.  Flat sublane iota is kept (known-good lowering);
    # power-of-two H,W use shift/and instead of div/mod.
    r_idx = lax.broadcasted_iota(jnp.int32, (R, 1), 0)
    if (H & (H - 1)) == 0 and (W & (W - 1)) == 0:
        ww = r_idx & (W - 1)
        hh = (r_idx >> (W.bit_length() - 1)) & (H - 1)
    else:
        ww = r_idx % W
        hh = (r_idx // W) % H
    row_ok = {-1: hh >= 1, 0: None, 1: hh <= H - 2}
    col_ok = {-1: ww >= 1, 0: None, 1: ww <= W - 2}

    def tap(di, dj):
        """bf16 (R, width) activation shifted by (di, dj), zero outside image."""
        d = di * W + dj
        shifted = h1 if d == 0 else pltpu.roll(h1, shift=(-d) % R, axis=0)
        mr, mc = row_ok[di], col_ok[dj]
        valid = mr if mc is None else (mc if mr is None else mr & mc)
        if tap_bf16:
            # v6e/v7x: select in bf16 -> halves the footprint of the largest
            # intermediate and the concat/relayout traffic.
            t = shifted.astype(jnp.bfloat16)
            if valid is None:
                return t
            return jnp.where(valid, t, jnp.zeros((), jnp.bfloat16))
        # v5e: no bf16 VALU -> select in f32, cast the tap afterwards (the
        # 9x-duplicated buffer is still built in bf16).
        t = shifted if valid is None else jnp.where(valid, shifted, 0.0)
        return t.astype(jnp.bfloat16)

    taps = [(di, dj) for di in (-1, 0, 1) for dj in (-1, 0, 1)]
    w2 = w2_ref[...]                                       # (9*width, width) bf16
    if conv2_im2col:
        # One deep matmul (K = 9*width): best MXU fill for narrow widths / v5e.
        col = jnp.concatenate([tap(di, dj) for di, dj in taps], axis=1)
        h2 = jnp.dot(col, w2, preferred_element_type=jnp.float32)
    else:
        # v7x / wide channels: 9 per-tap matmuls accumulated in f32 (MRB
        # accumulates in place); avoids the 9x VMEM duplication and the
        # lane-concat relayout.
        h2 = jnp.zeros((R, width), jnp.float32)
        for t_idx, (di, dj) in enumerate(taps):
            h2 = h2 + jnp.dot(tap(di, dj),
                              w2[t_idx * width:(t_idx + 1) * width, :],
                              preferred_element_type=jnp.float32)
    h2 = _bn_fold(h2, g2, b2, relu=True)

    # ---- conv3 (1x1) + bn3 ---------------------------------------------------
    h3 = _bn_fold(
        jnp.dot(h2.astype(jnp.bfloat16), w3_ref[...],
                preferred_element_type=jnp.float32),
        g3, b3, relu=False)                               # (R, Cout)

    # ---- residual add (identity shortcut) + final relu ------------------------
    out = jnp.maximum(h3 + x, 0.0)                        # (R, Cout) f32
    # TODO(synk): emit bf16 here (and alias input->output) once the consumer
    # layer takes bf16; kept f32 for exact validation against the reference.

    # ---- lane-dense store ------------------------------------------------------
    # Cout alone (<128) would make every store a quarter-masked vst.msk;
    # relayout the result to rows of W*Cout (>=128) lanes via a leading-dim
    # split + lane-axis concat (both cheap, well-supported relayouts).  The
    # wrapper-side reshape back to NHWC is a free metadata reshape.
    out3 = out.reshape(N * H, W, Cout)
    dense = jnp.concatenate([out3[:, w, :] for w in range(W)], axis=1)
    out_ref[...] = dense.reshape(N, H, W * Cout)


def _vmem_limit_bytes(n, h, w, cin, width, cout):
    """Footprint-derived VMEM request, capped below physical capacity.

    Never requests the entire per-core VMEM (64 MiB == all of v7x); leaves
    headroom for Mosaic internal scratch and pipeline buffers.
    """
    r = n * h * w
    cmax = max(width, cout)
    est = (r * cin * 4                        # x / identity path (f32)
           + 3 * r * width * 4                # conv1/conv2 activations + BN temps
           + r * 9 * width * 2                # bf16 im2col buffer (worst-case path)
           + 3 * r * cout * 4                 # conv3 out, residual, dense copy
           + (cin + 10 * width) * cmax * 2    # bf16 weights
           + 6 * cmax * 4)                    # packed BN params
    est = 4 * est + (1 << 20)                 # 4x slack for compiler temporaries
    try:
        cap = pltpu.get_tpu_info().vmem_capacity_bytes
    except Exception:
        cap = 64 * 1024 * 1024                # assume the smallest (v7x per-core)
    return int(max(min(est, (3 * cap) // 4), 16 * 1024 * 1024))


def bottleneck_forward(x_nhwc, params, *, conv2_im2col=None, tap_bf16=None):
    """x_nhwc: (N, H, W, Cin) f32 -> (N, H, W, Cout) f32 (Cin must equal Cout)."""
    w1, w2, w3, bn = params
    N, H, W, Cin = x_nhwc.shape
    width = w1.shape[1]
    Cout = w3.shape[1]
    if Cin != Cout:
        raise ValueError("identity shortcut requires inplanes == planes*expansion")

    kind = jax.devices()[0].device_kind.lower()
    is_v5 = "v5" in kind
    is_v7 = "v7" in kind
    if tap_bf16 is None:
        tap_bf16 = not is_v5                       # v5e has no bf16 VALU
    if conv2_im2col is None:
        # im2col on v5e / narrow widths; per-tap accumulation on v7x at
        # production widths (>=64), where VMEM is 64 MiB and MRB accumulates.
        conv2_im2col = not (is_v7 and width >= 64)

    kernel = functools.partial(bottleneck_kernel,
                               conv2_im2col=conv2_im2col, tap_bf16=tap_bf16)
    out = pl.pallas_call(
        kernel,
        out_shape=jax.ShapeDtypeStruct((N, H, W * Cout), jnp.float32),
        compiler_params=pltpu.CompilerParams(
            vmem_limit_bytes=_vmem_limit_bytes(N, H, W, Cin, width, Cout)),
    )(x_nhwc, w1, w2, w3, bn)
    # Free metadata reshape: (N, H, W*Cout) and (N, H, W, Cout) are bit-identical.
    return out.reshape(N, H, W, Cout)


def torch_to_kernel_params(w1_t, g1, b1, w2_t, g2, b2, w3_t, g3, b3):
    """OIHW torch-layout weights -> kernel layout.

    Conv weights become bf16 matmul operands; the six BN gamma/beta vectors
    are packed (zero-padded) into ONE (6, max(width, cout)) f32 array so the
    kernel pays a single DMA / VMEM tile for all of them.
    """
    w1_k = jnp.transpose(w1_t[:, :, 0, 0]).astype(jnp.bfloat16)          # (Cin, width)
    # im2col weight: taps stacked along K in the same (kh, kw) order the
    # kernel enumerates its shifted activations.
    w2_k = jnp.concatenate(
        [jnp.transpose(w2_t[:, :, i, j]) for i in range(3) for j in range(3)],
        axis=0).astype(jnp.bfloat16)                                     # (9*width, width)
    w3_k = jnp.transpose(w3_t[:, :, 0, 0]).astype(jnp.bfloat16)          # (width, Cout)
    cmax = max(w1_k.shape[1], w3_k.shape[1])
    pad = lambda v: jnp.pad(v.astype(jnp.float32), (0, cmax - v.shape[0]))
    bn = jnp.stack([pad(g1), pad(b1), pad(g2), pad(b2), pad(g3), pad(b3)])
    return (w1_k, w2_k, w3_k, bn)


# ---------------------------------------------------------------------------
# Pure-JAX reference (NCHW, f32, lax.conv) used only to validate the kernel.
# ---------------------------------------------------------------------------
def _ref_conv(x, w, padding):
    return lax.conv_general_dilated(
        x, w, window_strides=(1, 1),
        padding=[(padding, padding), (padding, padding)],
        dimension_numbers=("NCHW", "OIHW", "NCHW"))


def _ref_bn(x, gamma, beta, relu):
    mean = x.mean(axis=(0, 2, 3), keepdims=True)
    var = ((x - mean) ** 2).mean(axis=(0, 2, 3), keepdims=True)
    y = (x - mean) * lax.rsqrt(var + EPS)
    y = y * gamma.reshape(1, -1, 1, 1) + beta.reshape(1, -1, 1, 1)
    return jnp.maximum(y, 0.0) if relu else y


def reference_forward(x, tparams):
    w1, g1, b1, w2, g2, b2, w3, g3, b3 = tparams
    out = _ref_bn(_ref_conv(x, w1, 0), g1, b1, relu=True)
    out = _ref_bn(_ref_conv(out, w2, 1), g2, b2, relu=True)
    out = _ref_bn(_ref_conv(out, w3, 0), g3, b3, relu=False)
    return jnp.maximum(out + x, 0.0)


if __name__ == "__main__":
    # Bottleneck(inplanes=32, planes=8): width=8, out channels = planes*4 = 32
    # (inplanes == planes*expansion -> identity shortcut, no downsample).
    N, inplanes, H, W = 2, 32, 8, 8
    planes = 8
    width = planes            # groups=1, base_width=64
    cout = planes * 4         # expansion = 4

    key = jax.random.PRNGKey(0)
    ks = jax.random.split(key, 8)

    x_nhwc = jax.random.normal(ks[0], (N, H, W, inplanes), jnp.float32)

    # PyTorch-layout weights (OIHW), deterministic init.
    w1_t = jax.random.normal(ks[1], (width, inplanes, 1, 1), jnp.float32) * 0.1
    w2_t = jax.random.normal(ks[2], (width, width, 3, 3), jnp.float32) * 0.1
    w3_t = jax.random.normal(ks[3], (cout, width, 1, 1), jnp.float32) * 0.1
    g1 = 1.0 + 0.1 * jax.random.normal(ks[4], (width,), jnp.float32)
    b1 = 0.1 * jax.random.normal(ks[5], (width,), jnp.float32)
    g2 = 1.0 + 0.1 * jax.random.normal(ks[6], (width,), jnp.float32)
    b2 = 0.1 * jax.random.normal(ks[7], (width,), jnp.float32)
    g3 = jnp.ones((cout,), jnp.float32)
    b3 = jnp.zeros((cout,), jnp.float32)

    kparams = torch_to_kernel_params(w1_t, g1, b1, w2_t, g2, b2, w3_t, g3, b3)

    # Reference in NCHW / f32 (transposes exist only in this validation path).
    x_nchw = jnp.transpose(x_nhwc, (0, 3, 1, 2))
    ref_nchw = reference_forward(x_nchw, (w1_t, g1, b1, w2_t, g2, b2, w3_t, g3, b3))
    ref_nhwc = jnp.transpose(ref_nchw, (0, 2, 3, 1))

    # Validate the auto-selected (chip-dependent) path plus every
    # (conv2 strategy, tap dtype) combination so both code paths are known-good.
    configs = [dict(),
               dict(conv2_im2col=True, tap_bf16=True),
               dict(conv2_im2col=True, tap_bf16=False),
               dict(conv2_im2col=False, tap_bf16=True),
               dict(conv2_im2col=False, tap_bf16=False)]
    for cfg in configs:
        out_nhwc = jax.block_until_ready(bottleneck_forward(x_nhwc, kparams, **cfg))
        assert out_nhwc.shape == (N, H, W, cout)
        # bf16 MXU operands (f32 accumulation / BN stats) -> relaxed tolerance.
        err = jnp.max(jnp.abs(out_nhwc - ref_nhwc))
        assert jnp.allclose(out_nhwc, ref_nhwc, rtol=5e-2, atol=5e-2), \
            f"cfg={cfg} max abs err {err}"

    print("KERNEL_OK")
</pallas_src>

<mosaic_0001>
module attributes {stable_mosaic.version = 11 : i64} {
  func.func @bottleneck_kernel(%arg0: memref<2x8x8x32xf32, #tpu.memory_space<vmem>>, %arg1: memref<32x8xbf16, #tpu.memory_space<vmem>>, %arg2: memref<72x8xbf16, #tpu.memory_space<vmem>>, %arg3: memref<8x32xbf16, #tpu.memory_space<vmem>>, %arg4: memref<6x32xf32, #tpu.memory_space<vmem>>, %arg5: memref<2x8x256xf32, #tpu.memory_space<vmem>>) attributes {dimension_semantics = [], scalar_prefetch = 0 : i64, scratch_operands = 0 : i64, tpu.core_type = #tpu.core_type<tc>} {
    %c0 = arith.constant 0 : index
    %c0_0 = arith.constant 0 : index
    %0 = vector.load %arg4[%c0, %c0_0] : memref<6x32xf32, #tpu.memory_space<vmem>>, vector<6x32xf32>
    %1 = vector.extract_strided_slice %0 {offsets = [0, 0], sizes = [1, 8], strides = [1, 1]} : vector<6x32xf32> to vector<1x8xf32>
    %2 = vector.extract_strided_slice %0 {offsets = [1, 0], sizes = [1, 8], strides = [1, 1]} : vector<6x32xf32> to vector<1x8xf32>
    %3 = vector.extract_strided_slice %0 {offsets = [2, 0], sizes = [1, 8], strides = [1, 1]} : vector<6x32xf32> to vector<1x8xf32>
    %4 = vector.extract_strided_slice %0 {offsets = [3, 0], sizes = [1, 8], strides = [1, 1]} : vector<6x32xf32> to vector<1x8xf32>
    %5 = vector.extract_strided_slice %0 {offsets = [4, 0], sizes = [1, 32], strides = [1, 1]} : vector<6x32xf32> to vector<1x32xf32>
    %6 = vector.extract_strided_slice %0 {offsets = [5, 0], sizes = [1, 32], strides = [1, 1]} : vector<6x32xf32> to vector<1x32xf32>
    %c0_1 = arith.constant 0 : index
    %c0_2 = arith.constant 0 : index
    %c0_3 = arith.constant 0 : index
    %c0_4 = arith.constant 0 : index
    %7 = vector.load %arg0[%c0_1, %c0_2, %c0_3, %c0_4] : memref<2x8x8x32xf32, #tpu.memory_space<vmem>>, vector<2x8x8x32xf32>
    %8 = vector.shape_cast %7 : vector<2x8x8x32xf32> to vector<128x32xf32>
    %9 = arith.truncf %8 : vector<128x32xf32> to vector<128x32xbf16>
    %c0_5 = arith.constant 0 : index
    %c0_6 = arith.constant 0 : index
    %10 = vector.load %arg1[%c0_5, %c0_6] : memref<32x8xbf16, #tpu.memory_space<vmem>>, vector<32x8xbf16>
    %cst = arith.constant dense<0.000000e+00> : vector<128x8xf32>
    %11 = tpu.matmul %9, %10, %cst {dimension_numbers = #tpu.dot_dimension_numbers<[1], [0], [0], [1], [0, 0, 1, 1], [], []>} : vector<128x32xbf16>, vector<32x8xbf16>, vector<128x8xf32> -> vector<128x8xf32>
    %cst_7 = arith.constant dense<0.000000e+00> : vector<8xf32>
    %12 = vector.multi_reduction <add>, %11, %cst_7 [0] : vector<128x8xf32> to vector<8xf32>
    %13 = vector.shape_cast %12 : vector<8xf32> to vector<1x8xf32>
    %cst_8 = arith.constant 7.812500e-03 : f32
    %14 = vector.broadcast %cst_8 : f32 to vector<1x8xf32>
    %15 = arith.mulf %13, %14 : vector<1x8xf32>
    %16 = vector.broadcast %15 : vector<1x8xf32> to vector<128x8xf32>
    %17 = arith.subf %11, %16 : vector<128x8xf32>
    %18 = arith.mulf %17, %17 : vector<128x8xf32>
    %cst_9 = arith.constant dense<0.000000e+00> : vector<8xf32>
    %19 = vector.multi_reduction <add>, %18, %cst_9 [0] : vector<128x8xf32> to vector<8xf32>
    %20 = vector.shape_cast %19 : vector<8xf32> to vector<1x8xf32>
    %cst_10 = arith.constant 7.812500e-03 : f32
    %21 = vector.broadcast %cst_10 : f32 to vector<1x8xf32>
    %22 = arith.mulf %20, %21 : vector<1x8xf32>
    %cst_11 = arith.constant 9.99999974E-6 : f32
    %23 = vector.broadcast %cst_11 : f32 to vector<1x8xf32>
    %24 = arith.addf %22, %23 : vector<1x8xf32>
    %25 = math.rsqrt %24 : vector<1x8xf32>
    %26 = arith.mulf %1, %25 : vector<1x8xf32>
    %27 = arith.mulf %15, %26 : vector<1x8xf32>
    %28 = arith.subf %2, %27 : vector<1x8xf32>
    %29 = vector.broadcast %26 : vector<1x8xf32> to vector<128x8xf32>
    %30 = arith.mulf %11, %29 : vector<128x8xf32>
    %31 = vector.broadcast %28 : vector<1x8xf32> to vector<128x8xf32>
    %32 = arith.addf %30, %31 : vector<128x8xf32>
    %cst_12 = arith.constant 0.000000e+00 : f32
    %33 = vector.broadcast %cst_12 : f32 to vector<128x8xf32>
    %34 = arith.maximumf %32, %33 : vector<128x8xf32>
    %35 = tpu.iota {dimensions = array<i32: 0>} : vector<128x1xi32>
    %c7_i32 = arith.constant 7 : i32
    %36 = vector.broadcast %c7_i32 : i32 to vector<128x1xi32>
    %37 = arith.andi %35, %36 : vector<128x1xi32>
    %c3_i32 = arith.constant 3 : i32
    %38 = vector.broadcast %c3_i32 : i32 to vector<128x1xi32>
    %39 = arith.shrsi %35, %38 : vector<128x1xi32>
    %c7_i32_13 = arith.constant 7 : i32
    %40 = vector.broadcast %c7_i32_13 : i32 to vector<128x1xi32>
    %41 = arith.andi %39, %40 : vector<128x1xi32>
    %c1_i32 = arith.constant 1 : i32
    %42 = vector.broadcast %c1_i32 : i32 to vector<128x1xi32>
    %43 = arith.cmpi sge, %41, %42 : vector<128x1xi32>
    %c6_i32 = arith.constant 6 : i32
    %44 = vector.broadcast %c6_i32 : i32 to vector<128x1xi32>
    %45 = arith.cmpi sle, %41, %44 : vector<128x1xi32>
    %c1_i32_14 = arith.constant 1 : i32
    %46 = vector.broadcast %c1_i32_14 : i32 to vector<128x1xi32>
    %47 = arith.cmpi sge, %37, %46 : vector<128x1xi32>
    %c6_i32_15 = arith.constant 6 : i32
    %48 = vector.broadcast %c6_i32_15 : i32 to vector<128x1xi32>
    %49 = arith.cmpi sle, %37, %48 : vector<128x1xi32>
    %c0_16 = arith.constant 0 : index
    %c0_17 = arith.constant 0 : index
    %50 = vector.load %arg2[%c0_16, %c0_17] : memref<72x8xbf16, #tpu.memory_space<vmem>>, vector<72x8xbf16>
    %c9_i32 = arith.constant 9 : i32
    %51 = tpu.dynamic_rotate %34 by %c9_i32 dim 0 : vector<128x8xf32>, i32 -> vector<128x8xf32>
    %52 = arith.andi %43, %47 : vector<128x1xi1>
    %53 = arith.truncf %51 : vector<128x8xf32> to vector<128x8xbf16>
    %cst_18 = arith.constant 0.000000e+00 : bf16
    %54 = vector.shape_cast %52 : vector<128x1xi1> to vector<128x1xi1>
    %55 = vector.broadcast %54 : vector<128x1xi1> to vector<128x8xi1>
    %56 = vector.broadcast %cst_18 : bf16 to vector<128x8xbf16>
    %57 = arith.select %55, %53, %56 : vector<128x8xi1>, vector<128x8xbf16>
    %c8_i32 = arith.constant 8 : i32
    %58 = tpu.dynamic_rotate %34 by %c8_i32 dim 0 : vector<128x8xf32>, i32 -> vector<128x8xf32>
    %59 = arith.truncf %58 : vector<128x8xf32> to vector<128x8xbf16>
    %cst_19 = arith.constant 0.000000e+00 : bf16
    %60 = vector.shape_cast %43 : vector<128x1xi1> to vector<128x1xi1>
    %61 = vector.broadcast %60 : vector<128x1xi1> to vector<128x8xi1>
    %62 = vector.broadcast %cst_19 : bf16 to vector<128x8xbf16>
    %63 = arith.select %61, %59, %62 : vector<128x8xi1>, vector<128x8xbf16>
    %c7_i32_20 = arith.constant 7 : i32
    %64 = tpu.dynamic_rotate %34 by %c7_i32_20 dim 0 : vector<128x8xf32>, i32 -> vector<128x8xf32>
    %65 = arith.andi %43, %49 : vector<128x1xi1>
    %66 = arith.truncf %64 : vector<128x8xf32> to vector<128x8xbf16>
    %cst_21 = arith.constant 0.000000e+00 : bf16
    %67 = vector.shape_cast %65 : vector<128x1xi1> to vector<128x1xi1>
    %68 = vector.broadcast %67 : vector<128x1xi1> to vector<128x8xi1>
    %69 = vector.broadcast %cst_21 : bf16 to vector<128x8xbf16>
    %70 = arith.select %68, %66, %69 : vector<128x8xi1>, vector<128x8xbf16>
    %c1_i32_22 = arith.constant 1 : i32
    %71 = tpu.dynamic_rotate %34 by %c1_i32_22 dim 0 : vector<128x8xf32>, i32 -> vector<128x8xf32>
    %72 = arith.truncf %71 : vector<128x8xf32> to vector<128x8xbf16>
    %cst_23 = arith.constant 0.000000e+00 : bf16
    %73 = vector.shape_cast %47 : vector<128x1xi1> to vector<128x1xi1>
    %74 = vector.broadcast %73 : vector<128x1xi1> to vector<128x8xi1>
    %75 = vector.broadcast %cst_23 : bf16 to vector<128x8xbf16>
    %76 = arith.select %74, %72, %75 : vector<128x8xi1>, vector<128x8xbf16>
    %77 = arith.truncf %34 : vector<128x8xf32> to vector<128x8xbf16>
    %c127_i32 = arith.constant 127 : i32
    %78 = tpu.dynamic_rotate %34 by %c127_i32 dim 0 : vector<128x8xf32>, i32 -> vector<128x8xf32>
    %79 = arith.truncf %78 : vector<128x8xf32> to vector<128x8xbf16>
    %cst_24 = arith.constant 0.000000e+00 : bf16
    %80 = vector.shape_cast %49 : vector<128x1xi1> to vector<128x1xi1>
    %81 = vector.broadcast %80 : vector<128x1xi1> to vector<128x8xi1>
    %82 = vector.broadcast %cst_24 : bf16 to vector<128x8xbf16>
    %83 = arith.select %81, %79, %82 : vector<128x8xi1>, vector<128x8xbf16>
    %c121_i32 = arith.constant 121 : i32
    %84 = tpu.dynamic_rotate %34 by %c121_i32 dim 0 : vector<128x8xf32>, i32 -> vector<128x8xf32>
    %85 = arith.andi %45, %47 : vector<128x1xi1>
    %86 = arith.truncf %84 : vector<128x8xf32> to vector<128x8xbf16>
    %cst_25 = arith.constant 0.000000e+00 : bf16
    %87 = vector.shape_cast %85 : vector<128x1xi1> to vector<128x1xi1>
    %88 = vector.broadcast %87 : vector<128x1xi1> to vector<128x8xi1>
    %89 = vector.broadcast %cst_25 : bf16 to vector<128x8xbf16>
    %90 = arith.select %88, %86, %89 : vector<128x8xi1>, vector<128x8xbf16>
    %c120_i32 = arith.constant 120 : i32
    %91 = tpu.dynamic_rotate %34 by %c120_i32 dim 0 : vector<128x8xf32>, i32 -> vector<128x8xf32>
    %92 = arith.truncf %91 : vector<128x8xf32> to vector<128x8xbf16>
    %cst_26 = arith.constant 0.000000e+00 : bf16
    %93 = vector.shape_cast %45 : vector<128x1xi1> to vector<128x1xi1>
    %94 = vector.broadcast %93 : vector<128x1xi1> to vector<128x8xi1>
    %95 = vector.broadcast %cst_26 : bf16 to vector<128x8xbf16>
    %96 = arith.select %94, %92, %95 : vector<128x8xi1>, vector<128x8xbf16>
    %c119_i32 = arith.constant 119 : i32
    %97 = tpu.dynamic_rotate %34 by %c119_i32 dim 0 : vector<128x8xf32>, i32 -> vector<128x8xf32>
    %98 = arith.andi %45, %49 : vector<128x1xi1>
    %99 = arith.truncf %97 : vector<128x8xf32> to vector<128x8xbf16>
    %cst_27 = arith.constant 0.000000e+00 : bf16
    %100 = vector.shape_cast %98 : vector<128x1xi1> to vector<128x1xi1>
    %101 = vector.broadcast %100 : vector<128x1xi1> to vector<128x8xi1>
    %102 = vector.broadcast %cst_27 : bf16 to vector<128x8xbf16>
    %103 = arith.select %101, %99, %102 : vector<128x8xi1>, vector<128x8xbf16>
    %104 = tpu.concatenate %57, %63, %70, %76, %77, %83, %90, %96, %103 in 1 : vector<128x8xbf16>, vector<128x8xbf16>, vector<128x8xbf16>, vector<128x8xbf16>, vector<128x8xbf16>, vector<128x8xbf16>, vector<128x8xbf16>, vector<128x8xbf16>, vector<128x8xbf16> -> vector<128x72xbf16>
    %cst_28 = arith.constant dense<0.000000e+00> : vector<128x8xf32>
    %105 = tpu.matmul %104, %50, %cst_28 {dimension_numbers = #tpu.dot_dimension_numbers<[1], [0], [0], [1], [0, 0, 1, 1], [], []>} : vector<128x72xbf16>, vector<72x8xbf16>, vector<128x8xf32> -> vector<128x8xf32>
    %cst_29 = arith.constant dense<0.000000e+00> : vector<8xf32>
    %106 = vector.multi_reduction <add>, %105, %cst_29 [0] : vector<128x8xf32> to vector<8xf32>
    %107 = vector.shape_cast %106 : vector<8xf32> to vector<1x8xf32>
    %cst_30 = arith.constant 7.812500e-03 : f32
    %108 = vector.broadcast %cst_30 : f32 to vector<1x8xf32>
    %109 = arith.mulf %107, %108 : vector<1x8xf32>
    %110 = vector.broadcast %109 : vector<1x8xf32> to vector<128x8xf32>
    %111 = arith.subf %105, %110 : vector<128x8xf32>
    %112 = arith.mulf %111, %111 : vector<128x8xf32>
    %cst_31 = arith.constant dense<0.000000e+00> : vector<8xf32>
    %113 = vector.multi_reduction <add>, %112, %cst_31 [0] : vector<128x8xf32> to vector<8xf32>
    %114 = vector.shape_cast %113 : vector<8xf32> to vector<1x8xf32>
    %cst_32 = arith.constant 7.812500e-03 : f32
    %115 = vector.broadcast %cst_32 : f32 to vector<1x8xf32>
    %116 = arith.mulf %114, %115 : vector<1x8xf32>
    %cst_33 = arith.constant 9.99999974E-6 : f32
    %117 = vector.broadcast %cst_33 : f32 to vector<1x8xf32>
    %118 = arith.addf %116, %117 : vector<1x8xf32>
    %119 = math.rsqrt %118 : vector<1x8xf32>
    %120 = arith.mulf %3, %119 : vector<1x8xf32>
    %121 = arith.mulf %109, %120 : vector<1x8xf32>
    %122 = arith.subf %4, %121 : vector<1x8xf32>
    %123 = vector.broadcast %120 : vector<1x8xf32> to vector<128x8xf32>
    %124 = arith.mulf %105, %123 : vector<128x8xf32>
    %125 = vector.broadcast %122 : vector<1x8xf32> to vector<128x8xf32>
    %126 = arith.addf %124, %125 : vector<128x8xf32>
    %cst_34 = arith.constant 0.000000e+00 : f32
    %127 = vector.broadcast %cst_34 : f32 to vector<128x8xf32>
    %128 = arith.maximumf %126, %127 : vector<128x8xf32>
    %129 = arith.truncf %128 : vector<128x8xf32> to vector<128x8xbf16>
    %c0_35 = arith.constant 0 : index
    %c0_36 = arith.constant 0 : index
    %130 = vector.load %arg3[%c0_35, %c0_36] : memref<8x32xbf16, #tpu.memory_space<vmem>>, vector<8x32xbf16>
    %cst_37 = arith.constant dense<0.000000e+00> : vector<128x32xf32>
    %131 = tpu.matmul %129, %130, %cst_37 {dimension_numbers = #tpu.dot_dimension_numbers<[1], [0], [0], [1], [0, 0, 1, 1], [], []>} : vector<128x8xbf16>, vector<8x32xbf16>, vector<128x32xf32> -> vector<128x32xf32>
    %cst_38 = arith.constant dense<0.000000e+00> : vector<32xf32>
    %132 = vector.multi_reduction <add>, %131, %cst_38 [0] : vector<128x32xf32> to vector<32xf32>
    %133 = vector.shape_cast %132 : vector<32xf32> to vector<1x32xf32>
    %cst_39 = arith.constant 7.812500e-03 : f32
    %134 = vector.broadcast %cst_39 : f32 to vector<1x32xf32>
    %135 = arith.mulf %133, %134 : vector<1x32xf32>
    %136 = vector.broadcast %135 : vector<1x32xf32> to vector<128x32xf32>
    %137 = arith.subf %131, %136 : vector<128x32xf32>
    %138 = arith.mulf %137, %137 : vector<128x32xf32>
    %cst_40 = arith.constant dense<0.000000e+00> : vector<32xf32>
    %139 = vector.multi_reduction <add>, %138, %cst_40 [0] : vector<128x32xf32> to vector<32xf32>
    %140 = vector.shape_cast %139 : vector<32xf32> to vector<1x32xf32>
    %cst_41 = arith.constant 7.812500e-03 : f32
    %141 = vector.broadcast %cst_41 : f32 to vector<1x32xf32>
    %142 = arith.mulf %140, %141 : vector<1x32xf32>
    %cst_42 = arith.constant 9.99999974E-6 : f32
    %143 = vector.broadcast %cst_42 : f32 to vector<1x32xf32>
    %144 = arith.addf %142, %143 : vector<1x32xf32>
    %145 = math.rsqrt %144 : vector<1x32xf32>
    %146 = arith.mulf %5, %145 : vector<1x32xf32>
    %147 = arith.mulf %135, %146 : vector<1x32xf32>
    %148 = arith.subf %6, %147 : vector<1x32xf32>
    %149 = vector.broadcast %146 : vector<1x32xf32> to vector<128x32xf32>
    %150 = arith.mulf %131, %149 : vector<128x32xf32>
    %151 = vector.broadcast %148 : vector<1x32xf32> to vector<128x32xf32>
    %152 = arith.addf %150, %151 : vector<128x32xf32>
    %153 = arith.addf %152, %8 : vector<128x32xf32>
    %cst_43 = arith.constant 0.000000e+00 : f32
    %154 = vector.broadcast %cst_43 : f32 to vector<128x32xf32>
    %155 = arith.maximumf %153, %154 : vector<128x32xf32>
    %156 = vector.shape_cast %155 : vector<128x32xf32> to vector<16x8x32xf32>
    %157 = vector.extract_strided_slice %156 {offsets = [0, 0, 0], sizes = [16, 1, 32], strides = [1, 1, 1]} : vector<16x8x32xf32> to vector<16x1x32xf32>
    %158 = vector.shape_cast %157 : vector<16x1x32xf32> to vector<16x32xf32>
    %159 = vector.extract_strided_slice %156 {offsets = [0, 1, 0], sizes = [16, 1, 32], strides = [1, 1, 1]} : vector<16x8x32xf32> to vector<16x1x32xf32>
    %160 = vector.shape_cast %159 : vector<16x1x32xf32> to vector<16x32xf32>
    %161 = vector.extract_strided_slice %156 {offsets = [0, 2, 0], sizes = [16, 1, 32], strides = [1, 1, 1]} : vector<16x8x32xf32> to vector<16x1x32xf32>
    %162 = vector.shape_cast %161 : vector<16x1x32xf32> to vector<16x32xf32>
    %163 = vector.extract_strided_slice %156 {offsets = [0, 3, 0], sizes = [16, 1, 32], strides = [1, 1, 1]} : vector<16x8x32xf32> to vector<16x1x32xf32>
    %164 = vector.shape_cast %163 : vector<16x1x32xf32> to vector<16x32xf32>
    %165 = vector.extract_strided_slice %156 {offsets = [0, 4, 0], sizes = [16, 1, 32], strides = [1, 1, 1]} : vector<16x8x32xf32> to vector<16x1x32xf32>
    %166 = vector.shape_cast %165 : vector<16x1x32xf32> to vector<16x32xf32>
    %167 = vector.extract_strided_slice %156 {offsets = [0, 5, 0], sizes = [16, 1, 32], strides = [1, 1, 1]} : vector<16x8x32xf32> to vector<16x1x32xf32>
    %168 = vector.shape_cast %167 : vector<16x1x32xf32> to vector<16x32xf32>
    %169 = vector.extract_strided_slice %156 {offsets = [0, 6, 0], sizes = [16, 1, 32], strides = [1, 1, 1]} : vector<16x8x32xf32> to vector<16x1x32xf32>
    %170 = vector.shape_cast %169 : vector<16x1x32xf32> to vector<16x32xf32>
    %171 = vector.extract_strided_slice %156 {offsets = [0, 7, 0], sizes = [16, 1, 32], strides = [1, 1, 1]} : vector<16x8x32xf32> to vector<16x1x32xf32>
    %172 = vector.shape_cast %171 : vector<16x1x32xf32> to vector<16x32xf32>
    %173 = tpu.concatenate %158, %160, %162, %164, %166, %168, %170, %172 in 1 : vector<16x32xf32>, vector<16x32xf32>, vector<16x32xf32>, vector<16x32xf32>, vector<16x32xf32>, vector<16x32xf32>, vector<16x32xf32>, vector<16x32xf32> -> vector<16x256xf32>
    %174 = vector.shape_cast %173 : vector<16x256xf32> to vector<2x8x256xf32>
    %c0_44 = arith.constant 0 : index
    %c0_45 = arith.constant 0 : index
    %c0_46 = arith.constant 0 : index
    %175 = vector.load %arg5[%c0_44, %c0_45, %c0_46] : memref<2x8x256xf32, #tpu.memory_space<vmem>>, vector<2x8x256xf32>
    tpu.vector_store %arg5[%c0_44, %c0_45, %c0_46], %174 {strides = array<i32>} : memref<2x8x256xf32, #tpu.memory_space<vmem>>, vector<2x8x256xf32>,
    return
  }
}

</mosaic_0001>

<bundles_post_ra>
// kernel: tpu_custom_call.1
= control target key start
LH: loop header
LB: loop body
LE: loop exit
PB: predicated region body
PF: predicated region fallthrough
CT: control target
= control target key end

     0   :  { %10 = vsyncpa [#allocation3], 0  ;;  %s6872_s0 = inlined_call_operand.hbm [shape: f32[2,8,8,32], index: 0, kind: input, shape index: {}]   ;;  %s6873_s1 = inlined_call_operand.vmem [shape: bf16[32,8], index: 1, kind: input, shape index: {}]   ;;  %s6874_s2 = inlined_call_operand.vmem [shape: bf16[72,8], index: 2, kind: input, shape index: {}]   ;;  %s6875_s3 = inlined_call_operand.vmem [shape: bf16[8,32], index: 3, kind: input, shape index: {}]   ;;  %s6876_s4 = inlined_call_operand.vmem [shape: f32[6,32], index: 4, kind: input, shape index: {}]   ;;  %s6877_s5 = inlined_call_operand.hbm [shape: f32[2,8,256], index: 5, kind: output, shape index: {}]  }
   0x1   :  { %11 = vsyncpa [#allocation4], 0  ;;  %s3104_s18 = smov [#allocation2]   ;;  %s3056_s22 = scalar_lea.hbm %s6872_s0, 2048 }
   0x2   :  { %s17_s19 = sshll.u32 %s3104_s18, 4  ;;  %p3057_p0 = scmp.ne.s32.totalorder %s6872_s0, %s3056_s22  ;;  %s18_s19 = int_to_ptr.vmem [resolvable:$true] %s17_s19 }
   0x3   :  { %p3060_p1 = scmp.lt.u32.totalorder %s3056_s22, %s6872_s0 }
   0x5   :  { %p3062_p2 = pnand %p3060_p1, %p3057_p0 }
   0x7   :  { %3065 = shalt.err (!%p3062_p2)
}
   0x8   :  { %s3066_s27 = scalar_lea.vmem %s18_s19, 2048  ;;  %p3071_p4 = scmp.lt.s32.totalorder %s18_s19, %s18_s19 }
   0x9   :  { %p3067_p3 = scmp.ne.s32.totalorder %s18_s19, %s3066_s27  ;;  %p3072_p5 = scmp.lt.s32.totalorder %s3066_s27, %s3066_s27 }
   0xb   :  { %p3073_p6 = por %p3072_p5, %p3071_p4 }
   0xd   :  { %p3074_p7 = pnand %p3073_p6, %p3067_p3 }
   0xf   :  { %3077 = shalt.err (!%p3074_p7)
}
  0x10   :  { %s3105_s28 = smov 128   ;;  %s3106_s29 = smov 8  }
  0x11   :  { %23 = dma.hbm_to_vmem [thread:$0]  %s6872_s0, 2048, %s18_s19, [#allocation3], %s3105_s28, %s3105_s28, %s3106_s29  }
  0x12   :  { %3100 = dma.done.wait [#allocation3], 2048  }
  0x13   :  { %3101 = vsyncadd [#allocation3], 4294965248  ;;  %v3026_v0 = vld [vmem:[%s6873_s1] sm:$0xff]   ;;  %v3027_v1 = vld [vmem:[%s6873_s1 + $0x8] sm:$0xff]   ;;  %vm6878_vm0 = vcmask 261120   ;;  %vm6879_vm1 = vcmask 64512  }
  0x14   :  { %2942 = vmatprep.subr.bf16.mxu0 %v3026_v0  ;;  %3006 = vmatprep.subr.bf16.mxu1 %v3026_v0  ;;  %v39_v2 = vld [vmem:[#allocation2] sm:$0xff]  ;;  %v40_v3 = vld [vmem:[#allocation2 + $0x8] sm:$0xff]  ;;  %v41_v4 = vld [vmem:[#allocation2 + $0x10] sm:$0xff]  ;;  %s3108_s11 = smov 32   ;;  %s3109_s12 = smov 56  }
  0x15   :  { %2943 = vmatpush3.bf16.msra.mxu0 %v3026_v0  ;;  %3008 = vmatpush3.bf16.msra.mxu1 %v3026_v0  ;;  %v55_v5 = vpack.c.bf16 %v40_v3, %v39_v2  ;;  %v42_v6 = vld [vmem:[#allocation2 + $0x18] sm:$0xff]  ;;  %v43_v7 = vld [vmem:[#allocation2 + $0x20] sm:$0xff]  ;;  %v44_v8 = vld [vmem:[#allocation2 + $0x28] sm:$0xff]  ;;  %s3110_s15 = smov 24   ;;  %s3111_s16 = smov 40  }
  0x16   :  { %2944 = vmatprep.subr.bf16.mxu0 %v3027_v1  ;;  %3007 = vmatprep.subr.bf16.mxu1 %v3027_v1  ;;  %v57_v9 = vpack.c.bf16 %v44_v8, %v43_v7  ;;  %v45_v10 = vld [vmem:[#allocation2 + $0x30] sm:$0xff]  ;;  %v46_v11 = vld [vmem:[#allocation2 + $0x38] sm:$0xff]  ;;  %v47_v12 = vld [vmem:[#allocation2 + $0x40] sm:$0xff]  ;;  %v56_v14 = vpack.c.bf16 %v42_v6, %v41_v4  ;;  %s3112_s21 = smov 48   ;;  %s3113_s24 = smov 64  }
  0x17   :  { %2946 = vmatprep.mubr.msk.bf16.mxu0 %vm6878_vm0, %v55_v5  ;;  %v48_v13 = vld [vmem:[#allocation2 + $0x48] sm:$0xff]  ;;  %v58_v15 = vpack.c.bf16 %v46_v11, %v45_v10  ;;  %v49_v17 = vld [vmem:[#allocation2 + $0x50] sm:$0xff]  ;;  %v50_v18 = vld [vmem:[#allocation2 + $0x58] sm:$0xff]  ;;  %s3114_s25 = smov 16   ;;  %s3116_s30 = smov [#allocation5]  }
  0x18   :  { %2950 = vmatprep.mubr.msk.bf16.mxu1 %vm6878_vm0, %v57_v9  ;;  %v59_v16 = vpack.c.bf16 %v48_v13, %v47_v12  ;;  %v51_v19 = vld [vmem:[#allocation2 + $0x60] sm:$0xff]  ;;  %v52_v20 = vld [vmem:[#allocation2 + $0x68] sm:$0xff]  ;;  %v60_v21 = vpack.c.bf16 %v50_v18, %v49_v17  ;;  %v53_v23 = vld [vmem:[#allocation2 + $0x70] sm:$0xff]  ;;  %s2803_s6 = sshll.u32 %s3116_s30, 4  ;;  %s2804_s6 = int_to_ptr.vmem [resolvable:$true] %s2803_s6 }
  0x19   :  { %2945 = vmatpush3.bf16.msra.mxu0 %v3027_v1  ;;  %3009 = vmatpush3.bf16.msra.mxu1 %v3027_v1  ;;  %v61_v22 = vpack.c.bf16 %v52_v20, %v51_v19  ;;  %v54_v24 = vld [vmem:[#allocation2 + $0x78] sm:$0xff]  ;;  %s3078_s7 = scalar_lea.vmem %s2804_s6, 512  ;;  %p3083_p9 = scmp.lt.s32.totalorder %s2804_s6, %s2804_s6 }
  0x1a   :  { %v62_v25 = vpack.c.bf16 %v54_v24, %v53_v23  ;;  %p3079_p8 = scmp.ne.s32.totalorder %s2804_s6, %s3078_s7  ;;  %p3084_p10 = scmp.lt.s32.totalorder %s3078_s7, %s3078_s7 }
  0x1c   :  { %2947 = vmatmul.mubr.msk.bf16.vlgmr.msra.gmra.mrb[0].mxu0 %vm6878_vm0, %v56_v14  ;;  %2951 = vmatmul.mubr.msk.bf16.vlgmr.msra.gmra.mrb[0].mxu1 %vm6878_vm0, %v58_v15  ;;  %p3085_p11 = por %p3084_p10, %p3083_p9 }
  0x1d   :  { %2954 = vmatprep.mubr.msk.bf16.mxu1 %vm6878_vm0, %v59_v16 }
  0x1e   :  { %p3086_p12 = pnand %p3085_p11, %p3079_p8 }
  0x24   :  { %2955 = vmatmul.mubr.msk.bf16.gmra.mrb[4].mxu1 %vm6878_vm0, %v60_v21 }
  0x25   :  { %2958 = vmatprep.mubr.msk.bf16.mxu1 %vm6878_vm0, %v61_v22 }
  0x2c   :  { %2959 = vmatmul.mubr.msk.bf16.gmra.mrb[8].mxu1 %vm6878_vm0, %v62_v25 }
  0xef   :  { %v3175_v26 = vpop.f32.mrb[0].mxu0  ;;  %v3177_v27 = vpop.f32.mrb[0].mxu1 }
  0xf0   :  { %v3179_v28 = vpop.f32.mrb[1].mxu0  ;;  %v3181_v29 = vpop.f32.mrb[1].mxu1  ;;  %v205_v37 = vsel %vm6879_vm1, %v3175_v26, 0.0  ;;  %v213_v49 = vsel %vm6879_vm1, %v3177_v27, 0.0 }
  0xf1   :  { %v3183_v30 = vpop.f32.mrb[2].mxu0  ;;  %v3185_v31 = vpop.f32.mrb[2].mxu1  ;;  %v202_v34 = vsel %vm6879_vm1, %v3179_v28, 0.0  ;;  %v209_v40 = vsel %vm6879_vm1, %v3181_v29, 0.0 }
  0xf2   :  { %v3187_v32 = vpop.f32.mrb[3].mxu0  ;;  %v3189_v33 = vpop.f32.mrb[3].mxu1  ;;  %v207_v39 = vsel %vm6879_vm1, %v3183_v30, 0.0  ;;  %v215_v51 = vsel %vm6879_vm1, %v3185_v31, 0.0 }
  0xf3   :  { %v203_v35 = vsel %vm6879_vm1, %v3187_v32, 0.0  ;;  %v211_v47 = vsel %vm6879_vm1, %v3189_v33, 0.0 }
  0xf4   :  { %v204_v36 = vadd.f32 %v203_v35, %v202_v34 }
  0xf6   :  { %v206_v38 = vadd.f32 %v205_v37, %v204_v36 }
  0xf7   :  { %v3201_v41 = vpop.f32.mrb[4].mxu1 }
  0xf8   :  { %v208_v42 = vadd.f32 %v207_v39, %v206_v38  ;;  %v3203_v43 = vpop.f32.mrb[5].mxu1  ;;  %v221_v61 = vsel %vm6879_vm1, %v3201_v41, 0.0 }
  0xf9   :  { %v3205_v44 = vpop.f32.mrb[6].mxu1  ;;  %v217_v52 = vsel %vm6879_vm1, %v3203_v43, 0.0 }
  0xfa   :  { %v210_v45 = vadd.f32 %v209_v40, %v208_v42  ;;  %v3207_v46 = vpop.f32.mrb[7].mxu1  ;;  %v223_v63 = vsel %vm6879_vm1, %v3205_v44, 0.0 }
  0xfb   :  { %v219_v59 = vsel %vm6879_vm1, %v3207_v46, 0.0 }
  0xfc   :  { %v212_v48 = vadd.f32 %v211_v47, %v210_v45 }
  0xfe   :  { %v214_v50 = vadd.f32 %v213_v49, %v212_v48 }
  0xff   :  { %v3217_v53 = vpop.f32.mrb[8].mxu1 }
 0x100   :  { %v216_v54 = vadd.f32 %v215_v51, %v214_v50  ;;  %v3219_v55 = vpop.f32.mrb[9].mxu1  ;;  %v229_v5 = vsel %vm6879_vm1, %v3217_v53, 0.0 }
 0x101   :  { %v3221_v56 = vpop.f32.mrb[10].mxu1  ;;  %v225_v0 = vsel %vm6879_vm1, %v3219_v55, 0.0 }
 0x102   :  { %v218_v57 = vadd.f32 %v217_v52, %v216_v54  ;;  %v3223_v58 = vpop.f32.mrb[11].mxu1  ;;  %v231_v7 = vsel %vm6879_vm1, %v3221_v56, 0.0 }
 0x103   :  { %v227_v3 = vsel %vm6879_vm1, %v3223_v58, 0.0 }
 0x104   :  { %v220_v60 = vadd.f32 %v219_v59, %v218_v57 }
 0x106   :  { %v222_v62 = vadd.f32 %v221_v61, %v220_v60 }
 0x108   :  { %v224_v1 = vadd.f32 %v223_v63, %v222_v62 }
 0x10a   :  { %v226_v2 = vadd.f32 %v225_v0, %v224_v1 }
 0x10c   :  { %v228_v4 = vadd.f32 %v227_v3, %v226_v2 }
 0x10e   :  { %v230_v6 = vadd.f32 %v229_v5, %v228_v4 }
 0x110   :  { %v232_v8 = vadd.f32 %v231_v7, %v230_v6 }
 0x112   :  { %v233_v9 = vrot.slane %v232_v8, 4 }
 0x114   :  { %v234_v10 = vadd.f32 %v233_v9, %v232_v8  ;;  %v318_v9 = vlaneseq }
 0x116   :  { %v235_v11 = vrot.slane %v234_v10, 2 }
 0x118   :  { %v236_v12 = vadd.f32 %v235_v11, %v234_v10 }
 0x11a   :  { %v237_v13 = vrot.slane %v236_v12, 1 }
 0x11c   :  { %v238_v14 = vadd.f32 %v237_v13, %v236_v12 }
 0x11e   :  { %v3239_v15 = vmul.f32 0.0078125, %v238_v14 }
 0x120   :  { %v240_v16 = vsub.f32 %v3179_v28, %v3239_v15  ;;  %v241_v17 = vsub.f32 %v3187_v32, %v3239_v15  ;;  %v242_v18 = vsub.f32 %v3175_v26, %v3239_v15  ;;  %v243_v19 = vsub.f32 %v3183_v30, %v3239_v15 }
 0x121   :  { %v244_v20 = vsub.f32 %v3181_v29, %v3239_v15  ;;  %v245_v21 = vsub.f32 %v3189_v33, %v3239_v15  ;;  %v246_v22 = vsub.f32 %v3177_v27, %v3239_v15  ;;  %v247_v23 = vsub.f32 %v3185_v31, %v3239_v15 }
 0x122   :  { %v248_v24 = vsub.f32 %v3203_v43, %v3239_v15  ;;  %v249_v25 = vsub.f32 %v3207_v46, %v3239_v15  ;;  %v250_v34 = vsub.f32 %v3201_v41, %v3239_v15  ;;  %v251_v35 = vsub.f32 %v3205_v44, %v3239_v15 }
 0x123   :  { %v252_v36 = vsub.f32 %v3219_v55, %v3239_v15  ;;  %v253_v37 = vsub.f32 %v3223_v58, %v3239_v15  ;;  %v254_v38 = vsub.f32 %v3217_v53, %v3239_v15  ;;  %v255_v39 = vsub.f32 %v3221_v56, %v3239_v15 }
 0x124   :  { %v256_v40 = vmul.f32 %v240_v16, %v240_v16  ;;  %v257_v42 = vmul.f32 %v241_v17, %v241_v17  ;;  %v258_v45 = vmul.f32 %v242_v18, %v242_v18  ;;  %v259_v47 = vmul.f32 %v243_v19, %v243_v19 }
 0x125   :  { %v260_v51 = vmul.f32 %v244_v20, %v244_v20  ;;  %v261_v57 = vmul.f32 %v245_v21, %v245_v21  ;;  %v262_v61 = vmul.f32 %v246_v22, %v246_v22  ;;  %v263_v0 = vmul.f32 %v247_v23, %v247_v23 }
 0x126   :  { %v272_v48 = vsel %vm6879_vm1, %v256_v40, 0.0  ;;  %v273_v49 = vsel %vm6879_vm1, %v257_v42, 0.0  ;;  %v275_v52 = vsel %vm6879_vm1, %v258_v45, 0.0  ;;  %v277_v59 = vsel %vm6879_vm1, %v259_v47, 0.0 }
 0x127   :  { %v274_v50 = vadd.f32 %v273_v49, %v272_v48  ;;  %v279_v62 = vsel %vm6879_vm1, %v260_v51, 0.0  ;;  %v281_v1 = vsel %vm6879_vm1, %v261_v57, 0.0  ;;  %v264_v3 = vmul.f32 %v248_v24, %v248_v24 }
 0x128   :  { %v283_v4 = vsel %vm6879_vm1, %v262_v61, 0.0  ;;  %v265_v6 = vmul.f32 %v249_v25, %v249_v25  ;;  %v285_v7 = vsel %vm6879_vm1, %v263_v0, 0.0  ;;  %v266_v10 = vmul.f32 %v250_v34, %v250_v34 }
 0x129   :  { %v276_v54 = vadd.f32 %v275_v52, %v274_v50  ;;  %v287_v11 = vsel %vm6879_vm1, %v264_v3, 0.0  ;;  %v267_v13 = vmul.f32 %v251_v35, %v251_v35  ;;  %v3283_v17 = vshrl.u32 %v318_v9, 7 }
 0x12a   :  { %v289_v14 = vsel %vm6879_vm1, %v265_v6, 0.0  ;;  %v268_v18 = vmul.f32 %v252_v36, %v252_v36  ;;  %v291_v19 = vsel %vm6879_vm1, %v266_v10, 0.0  ;;  %v269_v23 = vmul.f32 %v253_v37, %v253_v37 }
 0x12b   :  { %v278_v60 = vadd.f32 %v277_v59, %v276_v54  ;;  %7121 = vst [vmem:[#allocation8_spill] sm:$0xff] %v3283_v17  ;;  %v3287_v21 = vadd.s32 16, %v3283_v17  ;;  %v3290_v22 = vadd.s32 24, %v3283_v17  ;;  %v293_v24 = vsel %vm6879_vm1, %v267_v13, 0.0 }
 0x12c   :  { %v3294_v25 = vadd.s32 8, %v3283_v17  ;;  %v3297_v35 = vadd.s32 32, %v3283_v17  ;;  %v270_v36 = vmul.f32 %v254_v38, %v254_v38  ;;  %v295_v40 = vsel %vm6879_vm1, %v268_v18, 0.0 }
 0x12d   :  { %v280_v63 = vadd.f32 %v279_v62, %v278_v60  ;;  %v3301_v42 = vadd.s32 40, %v3283_v17  ;;  %v3304_v45 = vadd.s32 48, %v3283_v17  ;;  %v409_v37 = vshra.s32 %v3287_v21, 3 }
 0x12e   :  { %v410_v48 = vshra.s32 %v3290_v22, 3  ;;  %v3309_v49 = vadd.s32 56, %v3283_v17  ;;  %v271_v50 = vmul.f32 %v255_v39, %v255_v39  ;;  %v297_v51 = vsel %vm6879_vm1, %v269_v23, 0.0 }
 0x12f   :  { %v282_v2 = vadd.f32 %v281_v1, %v280_v63  ;;  %7122 = vst [vmem:[#allocation9_spill] sm:$0xff] %v3304_v45  ;;  %v407_v38 = vshra.s32 %v3283_v17, 3  ;;  %v408_v52 = vshra.s32 %v3294_v25, 3  ;;  %v299_v57 = vsel %vm6879_vm1, %v270_v36, 0.0 }
 0x130   :  { %7123 = vst [vmem:[#allocation10_spill] sm:$0xff] %v3309_v49  ;;  %v411_v59 = vshra.s32 %v3297_v35, 3  ;;  %v412_v60 = vshra.s32 %v3301_v42, 3  ;;  %v3317_v62 = vand.u32 7, %v409_v37  ;;  %v3319_v63 = vand.u32 7, %v410_v48 }
 0x131   :  { %v284_v5 = vadd.f32 %v283_v4, %v282_v2  ;;  %v413_v39 = vshra.s32 %v3304_v45, 3  ;;  %v301_v0 = vsel %vm6879_vm1, %v271_v50, 0.0  ;;  %v3323_v1 = vand.u32 7, %v407_v38 }
 0x132   :  { %7124 = vst [vmem:[#allocation11_spill] sm:$0xff] %v3317_v62  ;;  %7125 = vst [vmem:[#allocation12_spill] sm:$0xff] %v3319_v63  ;;  %v3325_v2 = vand.u32 7, %v408_v52  ;;  %v414_v3 = vshra.s32 %v3309_v49, 3  ;;  %v3331_v6 = vand.u32 7, %v411_v59  ;;  %vm6881_vm2 = vcmp.le.s32.totalorder %v3317_v62, 6 }
 0x133   :  { %v286_v8 = vadd.f32 %v285_v7, %v284_v5  ;;  %7126 = vst [vmem:[#allocation13_spill] sm:$0xff] %v3323_v1  ;;  %v3329_v5 = vadd.s32 64, %v3283_v17  ;;  %v3333_v7 = vand.u32 7, %v412_v60  ;;  %v3336_v9 = vand.u32 7, %v413_v39  ;;  %vm3360_vm10 = vmpackc.low %vm6881_vm2, %vm6881_vm2 }
 0x134   :  { %7127 = vst [vmem:[#allocation14_spill] sm:$0xff] %v3325_v2  ;;  %7129 = vst [vmem:[#allocation16_spill] sm:$0xff] %v3331_v6  ;;  %v3339_v10 = vadd.s32 72, %v3283_v17  ;;  %vm6880_vm3 = vcmp.le.s32.totalorder %v3319_v63, 6  ;;  %vm6884_vm4 = vcmp.ge.s32.totalorder %v3323_v1, 1  ;;  %vm6882_vm5 = vcmp.ge.s32.totalorder %v3325_v2, 1 }
 0x135   :  { %v288_v12 = vadd.f32 %v287_v11, %v286_v8  ;;  %7128 = vst [vmem:[#allocation15_spill] sm:$0xff] %v3329_v5  ;;  %7130 = vst [vmem:[#allocation17_spill] sm:$0xff] %v3333_v7  ;;  %v3344_v11 = vand.u32 7, %v414_v3  ;;  %vm6886_vm6 = vcmp.ge.s32.totalorder %v3317_v62, 1  ;;  %v415_v13 = vshra.s32 %v3329_v5, 3 }
 0x136   :  { %7131 = vst [vmem:[#allocation18_spill] sm:$0xff] %v3336_v9  ;;  %7132 = vst [vmem:[#allocation19_spill] sm:$0xff] %v3339_v10  ;;  %vm6883_vm7 = vcmp.ge.s32.totalorder %v3331_v6, 1  ;;  %vm6885_vm8 = vcmp.ge.s32.totalorder %v3333_v7, 1  ;;  %vm6887_vm9 = vcmp.ge.s32.totalorder %v3319_v63, 1  ;;  %vm6888_vm12 = vcmp.ge.s32.totalorder %v3336_v9, 1 }
 0x137   :  { %v290_v16 = vadd.f32 %v289_v14, %v288_v12  ;;  %7133 = vst [vmem:[#allocation20_spill] sm:$0xff] %v3344_v11  ;;  %v3349_v14 = vadd.s32 80, %v3283_v17  ;;  %vm3367_vm11 = vmpackc.low %vm6880_vm3, %vm6880_vm3  ;;  %vm6890_vm13 = vcmp.le.s32.totalorder %v3323_v1, 6  ;;  %v416_v23 = vshra.s32 %v3339_v10, 3 }
 0x138   :  { %vm3377_vm14 = vmpackc.low %vm6884_vm4, %vm6884_vm4  ;;  %vm6889_vm15 = vcmp.ge.s32.totalorder %v3344_v11, 1  ;;  %vm6891_vm0 = vcmp.le.s32.totalorder %v3325_v2, 6  ;;  %v3401_v37 = vand.u32 7, %v415_v13  ;;  %v3405_v50 = vadd.s32 104, %v3283_v17 }
 0x139   :  { %v292_v20 = vadd.f32 %v291_v19, %v290_v16  ;;  %7134 = vst [vmem:[#allocation21_spill] sm:$0xff] %v3349_v14  ;;  %v3355_v16 = vadd.s32 88, %v3283_v17  ;;  %vm3390_vm3 = vmpackc.low %vm6882_vm5, %vm6882_vm5  ;;  %v417_v48 = vshra.s32 %v3349_v14, 3  ;;  %v7157_v60 = vmov 0 }
 0x13a   :  { %vm3397_vm2 = vmpackc.low %vm6883_vm7, %vm6883_vm7  ;;  %7147 = vst [vmem:[#allocation24_spill] sm:$0xff] %v3401_v37  ;;  %v3452_v39 = vand.u32 7, %v416_v23  ;;  %v7165_v3 = vmov 0  ;;  %vm7167_vm1 = vcmp.le.s32.totalorder %v3344_v11, 6  ;;  %v6918_v45 = vmov 0  }
 0x13b   :  { %v294_v34 = vadd.f32 %v293_v24, %v292_v20  ;;  %7135 = vst [vmem:[#allocation22_spill] sm:$0xff] %v3355_v16  ;;  %7148 = vst [vmem:[#allocation25_spill] sm:$0xff] %v3405_v50  ;;  %v3478_v13 = vand.u32 7, %v417_v48  ;;  %v7176_v48 = vmov 0  ;;  %v3542_v19 = vsel %vm3377_vm14, 65537, %v6918_v45 }
 0x13c   :  { %vm3410_vm5 = vmpackc.low %vm6885_vm8, %vm6885_vm8  ;;  %7161 = vst [vmem:[#allocation26_spill] sm:$0xff] %v3452_v39  ;;  %v3561_v24 = vsel %vm3397_vm2, 65537, %v6918_v45  ;;  %v7225_v14 = vmov 0  }
 0x13d   :  { %v296_v47 = vadd.f32 %v295_v40, %v294_v34  ;;  %v3385_v34 = vadd.s32 96, %v3283_v17  ;;  %vm3417_vm7 = vmpackc.low %vm6886_vm6, %vm6886_vm6  ;;  %7170 = vst [vmem:[#allocation27_spill] sm:$0xff] %v3478_v13  ;;  %vm7191_vm14 = vcmp.ge.s32.totalorder %v3478_v13, 1  ;;  %v3575_v40 = vsel %vm3410_vm5, 65537, %v6918_v45 }
 0x13e   :  { %vm3424_vm4 = vmpackc.low %vm6887_vm9, %vm6887_vm9 }
 0x13f   :  { %v298_v54 = vadd.f32 %v297_v51, %v296_v47  ;;  %7142 = vst [vmem:[#allocation23_spill] sm:$0xff] %v3385_v34  ;;  %vm3433_vm8 = vmpackc.low %vm6888_vm12, %vm6888_vm12  ;;  %v3580_v47 = vsel %vm3417_vm7, 65537, %v6918_v45 }
 0x140   :  { %vm3440_vm6 = vmpackc.low %vm6889_vm15, %vm6889_vm15  ;;  %vm7164_vm15 = vcmp.le.s32.totalorder %v3336_v9, 6  ;;  %v3598_v51 = vsel %vm3433_vm8, 65537, %v6918_v45 }
 0x141   :  { %v300_v61 = vadd.f32 %v299_v57, %v298_v54  ;;  %v418_v54 = vshra.s32 %v3355_v16, 3  ;;  %v7158_v60 = vsel %vm3440_vm6, 4294967295, %v7157_v60  ;;  %vm3447_vm9 = vmpackc.low %vm6890_vm13, %vm6890_vm13  ;;  %v38_v16 = vld [vmem:[%s6876_s4] sm:$0x3f] }
 0x142   :  { %vm3457_vm12 = vmpackc.low %vm6891_vm0, %vm6891_vm0  ;;  %vm7196_vm5 = vnez %v7158_v60 }
 0x143   :  { %v302_v4 = vadd.f32 %v301_v0, %v300_v61  ;;  %v7159_v61 = vmov 0  ;;  %v7162_v0 = vmov 0  ;;  %vm3464_vm6 = vmpackc.low %vm7164_vm15, %vm7164_vm15  ;;  %vm7171_vm15 = vcmp.le.s32.totalorder %v3331_v6, 6 }
 0x144   :  { %v7160_v61 = vsel %vm3447_vm9, 4294967295, %v7159_v61  ;;  %v7163_v0 = vsel %vm3457_vm12, 4294967295, %v7162_v0  ;;  %v7166_v3 = vsel %vm3464_vm6, 4294967295, %v7165_v3  ;;  %vm3473_vm9 = vmpackc.low %vm7167_vm1, %vm7167_vm1  ;;  %vm7175_vm1 = vcmp.le.s32.totalorder %v3333_v7, 6 }
 0x145   :  { %v303_v8 = vrot.slane %v302_v4, 4  ;;  %vm3484_vm13 = vmpackc.low %vm7171_vm15, %vm7171_vm15  ;;  %vm7178_vm12 = vcmp.ge.s32.totalorder %v3401_v37, 1  ;;  %vm6904_vm6 = vcmp.le.s32.totalorder %v3452_v39, 6  ;;  %v3603_v38 = vsel %vm7196_vm5, 65537, %v6918_v45 }
 0x146   :  { %vm3494_vm0 = vmpackc.low %vm7175_vm1, %vm7175_vm1  ;;  %vm7182_vm1 = vcmp.le.s32.totalorder %v3401_v37, 6  ;;  %vm7200_vm8 = vnez %v7163_v0  ;;  %vm7202_vm5 = vnez %v7166_v3  ;;  %v7208_v0 = vand.u32 7, %v3283_v17 }
 0x147   :  { %v304_v12 = vadd.f32 %v303_v8, %v302_v4  ;;  %v419_v4 = vshra.s32 %v3385_v34, 3  ;;  %v7177_v48 = vsel %vm3494_vm0, 4294967295, %v7176_v48  ;;  %vm3502_vm15 = vmpackc.low %vm7178_vm12, %vm7178_vm12  ;;  %vm7186_vm12 = vcmp.ge.s32.totalorder %v3452_v39, 1 }
 0x148   :  { %vm3513_vm0 = vmpackc.low %vm7182_vm1, %vm7182_vm1  ;;  %v3585_v39 = vsel %vm3424_vm4, 65537, %v6918_v45  ;;  %vm7197_vm4 = vnez %v7160_v61  ;;  %v3621_v59 = vsel %vm7200_vm8, 65537, %v6918_v45  ;;  %v3626_v60 = vsel %vm7202_vm5, 65537, %v6918_v45 }
 0x149   :  { %v305_v18 = vrot.slane %v304_v12, 2  ;;  %vm3534_vm1 = vmpackc.low %vm7186_vm12, %vm7186_vm12  ;;  %v3608_v52 = vsel %vm7197_vm4, 65537, %v6918_v45  ;;  %7201 = vst [vmem:[#allocation31_spill] sm:$0xff] %v3621_v59  ;;  %vm3642_vm8 = vcmp.ge.s32.totalorder %v7208_v0, 1  ;;  %vm7213_vm5 = vnez %v7177_v48 }
 0x14a   :  { %vm3566_vm12 = vmpackc.low %vm7191_vm14, %vm7191_vm14  ;;  %7203 = vst [vmem:[#allocation32_spill] sm:$0xff] %v3626_v60  ;;  %v3656_v7 = vsel %vm7213_vm5, 65537, %v6918_v45  ;;  %v7217_v34 = vand.u32 7, %v3294_v25  ;;  %v7218_v3 = vmov 0  ;;  %v3683_v6 = vadd.s32 112, %v3283_v17 }
 0x14b   :  { %v306_v36 = vadd.f32 %v305_v18, %v304_v12  ;;  %v7168_v12 = vmov 0  ;;  %v420_v18 = vshra.s32 %v3405_v50, 3  ;;  %v7209_v50 = vmov 0  ;;  %7214 = vst [vmem:[#allocation36_spill] sm:$0xff] %v3656_v7  ;;  %vm986_vm5 = vmpackc.low %vm3642_vm8, %vm3642_vm8 }
 0x14c   :  { %v7169_v12 = vsel %vm3473_vm9, 4294967295, %v7168_v12  ;;  %v7210_v50 = vsel %vm3642_vm8, 4294967295, %v7209_v50  ;;  %7223 = vst [vmem:[#allocation38_spill] sm:$0xff] %v3683_v6  ;;  %v3707_v23 = vsel %vm3502_vm15, 65537, %v7225_v14  ;;  %v3717_v48 = vsel %vm3513_vm0, 65537, %v7225_v14 }
 0x14d   :  { %v307_v57 = vrot.slane %v306_v36, 1  ;;  %v3518_v5 = vand.u32 7, %v420_v18  ;;  %vm7204_vm4 = vnez %v7169_v12  ;;  %7211 = vst [vmem:[#allocation34_spill] sm:$0xff] %v7210_v50  ;;  %v3651_v12 = vsel %vm3484_vm13, 65537, %v6918_v45 }
 0x14e   :  { %v3631_v61 = vsel %vm7204_vm4, 65537, %v6918_v45  ;;  %7212 = vst [vmem:[#allocation35_spill] sm:$0xff] %v3651_v12  ;;  %v3730_v11 = vsel %vm3566_vm12, 65537, %v7225_v14  ;;  %v421_v18 = vshra.s32 %v3683_v6, 3  ;;  %v7236_v59 = vand.u32 7, %v3283_v17 }
 0x14f   :  { %v308_v8 = vadd.f32 %v307_v57, %v306_v36  ;;  %v3489_v36 = vand.u32 7, %v418_v54  ;;  %v3507_v54 = vand.u32 7, %v419_v4  ;;  %7185 = vst [vmem:[#allocation30_spill] sm:$0xff] %v3518_v5  ;;  %v3524_v4 = vsel %vm3360_vm10, 65537, %v6918_v45  ;;  %vm3547_vm10 = vmpackc.low %vm6904_vm6, %vm6904_vm6 }
 0x150   :  { %7205 = vst [vmem:[#allocation33_spill] sm:$0xff] %v3631_v61  ;;  %v3725_v10 = vsel %vm3547_vm10, 65537, %v7225_v14  ;;  %v7233_v61 = vsub.s32 0, %v3283_v17  ;;  %vm3796_vm15 = vcmp.le.s32.totalorder %v7236_v59, 6 }
 0x151   :  { %7174 = vst [vmem:[#allocation28_spill] sm:$0xff] %v3489_v36  ;;  %v309_v57 = vmul.f32 0.0078125, %v308_v8  ;;  %7181 = vst [vmem:[#allocation29_spill] sm:$0xff] %v3507_v54  ;;  %vm6909_vm9 = vcmp.ge.s32.totalorder %v3489_v36, 1  ;;  %vm6917_vm6 = vcmp.le.s32.totalorder %v3507_v54, 6  ;;  %vm6959_vm7 = vcmp.le.s32.totalorder %v3489_v36, 6 }
 0x152   :  { %vm3590_vm2 = vmpackc.low %vm6909_vm9, %vm6909_vm9  ;;  %v3712_v36 = vsel %vm3534_vm1, 65537, %v7225_v14  ;;  %7226 = vst [vmem:[#allocation40_spill] sm:$0xff] %v3725_v10  ;;  %vm6954_vm0 = vcmp.ge.s32.totalorder %v3507_v54, 1  ;;  %v3787_v10 = vand.u32 7, %v421_v18 }
 0x153   :  { %v310_v8 = vadd.f32 1e-05, %v309_v57  ;;  %v3529_v57 = vsel %vm3367_vm11, 65537, %v6918_v45  ;;  %vm6960_vm11 = vcmp.le.s32.totalorder %v3478_v13, 6  ;;  %vm3636_vm9 = vmpackc.low %vm6917_vm6, %vm6917_vm6  ;;  %vm3667_vm6 = vcmp.ge.s32.totalorder %v7217_v34, 1 }
 0x154   :  { %vm3614_vm14 = vmpackc.low %vm6960_vm11, %vm6960_vm11  ;;  %v7219_v3 = vsel %vm3667_vm6, 4294967295, %v7218_v3  ;;  %v3686_v34 = vadd.s32 120, %v3283_v17  ;;  %v3735_v9 = vsel %vm3590_vm2, 65537, %v7225_v14  ;;  %v3745_v20 = vsel %vm3636_vm9, 65537, %v7225_v14  ;;  %7234 = vst [vmem:[#allocation47_spill] sm:$0xff] %v3787_v10 }
 0x155   :  { %3033 = vrsqrt.f32 %v310_v8  ;;  %v3556_v8 = vsel %vm3390_vm3, 65537, %v6918_v45  ;;  %vm6930_vm3 = vcmp.le.s32.totalorder %v3518_v5, 6  ;;  %7220 = vst [vmem:[#allocation37_spill] sm:$0xff] %v7219_v3  ;;  %vm3678_vm13 = vmpackc.low %vm6959_vm7, %vm6959_vm7  ;;  %v3740_v63 = vsel %vm3614_vm14, 65537, %v7225_v14 }
 0x156   :  { %vm3661_vm4 = vmpackc.low %vm6930_vm3, %vm6930_vm3  ;;  %7224 = vst [vmem:[#allocation39_spill] sm:$0xff] %v3686_v34  ;;  %v422_v7 = vshra.s32 %v3686_v34, 3  ;;  %v3757_v37 = vsel %vm3678_vm13, 65537, %v7225_v14  ;;  %v3765_v13 = vsel %vm986_vm5, 65537, %v7225_v14  ;;  %vm6953_vm9 = vcmp.ge.s32.totalorder %v3518_v5, 1 }
 0x157   :  { %vm987_vm3 = vmpackc.low %vm3667_vm6, %vm3667_vm6  ;;  %7227 = vst [vmem:[#allocation41_spill] sm:$0xff] %v3735_v9  ;;  %v3750_v49 = vsel %vm3661_vm4, 65537, %v7225_v14  ;;  %vm6956_vm2 = vcmp.ge.s32.totalorder %v3787_v10, 1  ;;  %vm6977_vm14 = vcmp.lt.s32.totalorder %v3283_v17, 1  ;;  %vm7244_vm5 = vcmp.le.s32.totalorder %v3323_v1, 6 }
 0x158   :  { %7228 = vst [vmem:[#allocation42_spill] sm:$0xff] %v3740_v63  ;;  %7229 = vst [vmem:[#allocation43_spill] sm:$0xff] %v3750_v49  ;;  %v3768_v0 = vsel %vm987_vm3, 65537, %v7225_v14  ;;  %v3789_v45 = vand.u32 7, %v422_v7  ;;  %v7311_v49 = vld [vmem:[#allocation32_spill] sm:$0xff] }
 0x159   :  { %7230 = vst [vmem:[#allocation44_spill] sm:$0xff] %v3757_v37  ;;  %7231 = vst [vmem:[#allocation45_spill] sm:$0xff] %v3765_v13 }
 0x15a   :  { %7232 = vst [vmem:[#allocation46_spill] sm:$0xff] %v3768_v0  ;;  %7235 = vst [vmem:[#allocation48_spill] sm:$0xff] %v3789_v45  ;;  %vm6955_vm3 = vcmp.ge.s32.totalorder %v3789_v45, 1  ;;  %vm6969_vm7 = vcmp.le.s32.totalorder %v3789_v45, 6 }
 0x15b   :  { %vm725_vm1 = vmpackc.low %vm6954_vm0, %vm6954_vm0 }
 0x15c   :  { %vm726_vm12 = vmpackc.low %vm6953_vm9, %vm6953_vm9 }
 0x15d   :  { %vm1106_vm4 = vmpackc.low %vm3796_vm15, %vm3796_vm15 }
 0x15e   :  { %vm3906_vm9 = vmpackc.low %vm6956_vm2, %vm6956_vm2 }
 0x15f   :  { %v3034_v62 = vpop.eup %3033  ;;  %vm728_vm0 = vmpackc.low %vm6955_vm3, %vm6955_vm3  ;;  %vm7254_vm3 = vcmp.le.s32.totalorder %v3325_v2, 6  ;;  %v3978_v3 = vsel %vm3906_vm9, 65537, %v7225_v14 }
 0x160   :  { %v312_v12 = vmul.f32 %v3034_v62, %v38_v16  ;;  %v3831_v62 = vsel %vm726_vm12, 65537, %v7225_v14  ;;  %vm3952_vm2 = vmand %vm7254_vm3, %vm3667_vm6  ;;  %vm6966_vm3 = vcmp.le.s32.totalorder %v3787_v10, 6  ;;  %7261 = vst [vmem:[#allocation53_spill] sm:$0xff] %v3978_v3  ;;  %v3981_v50 = vsel %vm728_vm0, 65537, %v7225_v14  ;;  %v7370_v10 = vld [vmem:[#allocation43_spill] sm:$0xff] }
 0x161   :  { %7262 = vst [vmem:[#allocation54_spill] sm:$0xff] %v3981_v50  ;;  %vm1227_vm0 = vmpackc.low %vm3952_vm2, %vm3952_vm2  ;;  %vm7280_vm2 = vcmp.le.s32.totalorder %v3323_v1, 6 }
 0x162   :  { %v313_v6 = vmul.f32 %v312_v12, %v3239_v15  ;;  %v321_v60 = vrot.slane %v312_v12, %v7233_v61  ;;  %vm4019_vm9 = vmpackc.low %vm6966_vm3, %vm6966_vm3 }
 0x163   :  { %vm4037_vm3 = vmpackc.low %vm6969_vm7, %vm6969_vm7 }
 0x164   :  { %v315_v9 = vrot.slane %v313_v6, 7  ;;  %v335_v15 = vmul.f32 %v321_v60, %v3223_v58  ;;  %v324_v61 = vmul.f32 %v3175_v26, %v321_v60  ;;  %v325_v12 = vmul.f32 %v3183_v30, %v321_v60 }
 0x165   :  { %v322_v34 = vmul.f32 %v321_v60, %v3179_v28  ;;  %v323_v18 = vmul.f32 %v321_v60, %v3187_v32  ;;  %v328_v7 = vmul.f32 %v3177_v27, %v321_v60  ;;  %v329_v6 = vmul.f32 %v3185_v31, %v321_v60 }
 0x166   :  { %v7239_v26 = vand.u32 7, %v3294_v25  ;;  %v317_v58 = vsub.f32 %v38_v16, %v315_v9  ;;  %v326_v59 = vmul.f32 %v321_v60, %v3181_v29  ;;  %v327_v28 = vmul.f32 %v321_v60, %v3189_v33 }
 0x167   :  { %v332_v32 = vmul.f32 %v3201_v41, %v321_v60  ;;  %v333_v27 = vmul.f32 %v3205_v44, %v321_v60  ;;  %v330_v31 = vmul.f32 %v321_v60, %v3203_v43  ;;  %v331_v25 = vmul.f32 %v321_v60, %v3207_v46  ;;  %v7319_v43 = vld [vmem:[#allocation36_spill] sm:$0xff] }
 0x168   :  { %vm3809_vm10 = vcmp.le.s32.totalorder %v7239_v26, 6  ;;  %v336_v26 = vmul.f32 %v3217_v53, %v321_v60  ;;  %v7242_v16 = vsub.s32 1, %v3283_v17  ;;  %v337_v29 = vmul.f32 %v3221_v56, %v321_v60 }
 0x169   :  { %v334_v33 = vmul.f32 %v321_v60, %v3219_v55  ;;  %v3828_v41 = vsel %vm725_vm1, 65537, %v7225_v14  ;;  %vm1107_vm13 = vmpackc.low %vm3809_vm10, %vm3809_vm10 }
 0x16a   :  { %v341_v9 = vrot.slane %v317_v58, %v7242_v16  ;;  %vm3881_vm1 = vmand %vm7244_vm5, %vm3642_vm8 }
 0x16c   :  { %v355_v44 = vadd.f32 %v341_v9, %v335_v15  ;;  %v344_v46 = vadd.f32 %v341_v9, %v324_v61  ;;  %v345_v53 = vadd.f32 %v341_v9, %v325_v12  ;;  %v342_v58 = vadd.f32 %v341_v9, %v322_v34 }
 0x16d   :  { %v343_v16 = vadd.f32 %v341_v9, %v323_v18  ;;  %v348_v56 = vadd.f32 %v341_v9, %v328_v7  ;;  %v349_v5 = vadd.f32 %v341_v9, %v329_v6  ;;  %v346_v55 = vadd.f32 %v341_v9, %v326_v59 }
 0x16e   :  { %v3836_v60 = vmax.f32 %v355_v44, 0.0  ;;  %v3838_v54 = vmax.f32 %v344_v46, 0.0  ;;  %v3840_v0 = vmax.f32 %v345_v53, 0.0  ;;  %v3842_v13 = vmax.f32 %v342_v58, 0.0 }
 0x16f   :  { %v3844_v37 = vmax.f32 %v343_v16, 0.0  ;;  %v3846_v63 = vmax.f32 %v348_v56, 0.0  ;;  %v3848_v15 = vmax.f32 %v349_v5, 0.0  ;;  %v347_v61 = vadd.f32 %v341_v9, %v327_v28 }
 0x170   :  { %7243 = vst [vmem:[#allocation49_spill] sm:$0xff] %v3836_v60  ;;  %v1059_v34 = vpack.c.bf16 %v3840_v0, %v3838_v54  ;;  %v3852_v12 = vmax.f32 %v346_v55, 0.0  ;;  %v352_v18 = vadd.f32 %v341_v9, %v332_v32  ;;  %v353_v7 = vadd.f32 %v341_v9, %v333_v27 }
 0x171   :  { %v1058_v6 = vpack.c.bf16 %v3844_v37, %v3842_v13  ;;  %v1061_v59 = vpack.c.bf16 %v3848_v15, %v3846_v63  ;;  %v3858_v44 = vmax.f32 %v347_v61, 0.0  ;;  %v350_v46 = vadd.f32 %v341_v9, %v330_v31 }
 0x172   :  { %1604 = vrot.lane.b32.xlu1 %v1059_v34, %s3108_s11  ;;  %v3865_v5 = vmax.f32 %v352_v18, 0.0  ;;  %v3867_v28 = vmax.f32 %v353_v7, 0.0  ;;  %v351_v32 = vadd.f32 %v341_v9, %v331_v25  ;;  %v356_v27 = vadd.f32 %v341_v9, %v336_v26 }
 0x173   :  { %1602 = vrot.lane.b32.xlu0 %v1058_v6, %s3108_s11  ;;  %v1060_v31 = vpack.c.bf16 %v3858_v44, %v3852_v12  ;;  %v3875_v53 = vmax.f32 %v350_v46, 0.0  ;;  %v357_v58 = vadd.f32 %v341_v9, %v337_v29  ;;  %v354_v16 = vadd.f32 %v341_v9, %v334_v33  ;;  %v7346_v29 = vld [vmem:[#allocation11_spill] sm:$0xff] }
 0x174   :  { %v1063_v26 = vpack.c.bf16 %v3867_v28, %v3865_v5  ;;  %v3887_v56 = vmax.f32 %v351_v32, 0.0  ;;  %v3889_v55 = vmax.f32 %v356_v27, 0.0  ;;  %v3893_v61 = vpack.c.bf16 %v3852_v12, %v3840_v0 }
 0x175   :  { %v7248_v9 = vcombine.low %v3524_v4, %v3529_v57  ;;  %v3910_v34 = vmax.f32 %v357_v58, 0.0  ;;  %v3912_v18 = vmax.f32 %v354_v16, 0.0  ;;  %v3916_v4 = vpack.c.bf16 %v3838_v54, %v3844_v37 }
 0x176   :  { %7247 = vst [vmem:[#allocation50_spill] sm:$0xff] %v3889_v55  ;;  %v3920_v57 = vpack.c.bf16 %v3846_v63, %v3858_v44  ;;  %1608 = vrot.lane.b32.xlu1 %v1061_v59, %s3108_s11  ;;  %v1062_v7 = vpack.c.bf16 %v3887_v56, %v3875_v53  ;;  %v3930_v6 = vpack.c.bf16 %v3875_v53, %v3848_v15  ;;  %v3938_v46 = vsel %vm1106_vm4, 65537, %v7225_v14 }
 0x177   :  { %vm3898_vm12 = vcmp.ne.s16.totalorder %v7248_v9, 0  ;;  %7253 = vst [vmem:[#allocation51_spill] sm:$0xff] %v3910_v34  ;;  %v3946_v59 = vsel %vm1107_vm13, 65537, %v7225_v14  ;;  %1606 = vrot.lane.b32.xlu0 %v1060_v31, %s3108_s11  ;;  %v1065_v27 = vpack.c.bf16 %v3910_v34, %v3889_v55  ;;  %v1064_v58 = vpack.c.bf16 %v3836_v60, %v3912_v18  ;;  %vm1226_vm13 = vmpackc.low %vm3881_vm1, %vm3881_vm1 }
 0x178   :  { %v3963_v16 = vpack.c.bf16 %v3842_v13, %v3910_v34  ;;  %v7258_v9 = vcombine.low %v3542_v19, %v3556_v8  ;;  %v7263_v19 = vcombine.low %v3561_v24, %v3575_v40  ;;  %v3996_v33 = vpack.c.bf16 %v3865_v5, %v3887_v56  ;;  %vm4088_vm1 = vmand %vm7280_vm2, %vm3796_vm15 }
 0x179   :  { %v4011_v40 = vpack.c.bf16 %v3912_v18, %v3867_v28  ;;  %v787_v45 = vrot.slane %v3838_v54, 1  ;;  %v4082_v32 = vsel %vm4019_vm9, 65537, %v7225_v14  ;;  %v514_v31 = vrot.slane %v3838_v54, 7 }
 0x17a   :  { %7257 = vst [vmem:[#allocation52_spill] sm:$0xff] %v3963_v16  ;;  %vm3968_vm4 = vcmp.ne.s16.totalorder %v7258_v9, 0  ;;  %vm3990_vm11 = vcmp.ne.s16.totalorder %v7263_v19, 0  ;;  %v4000_v9 = vpack.c.bf16 %v3889_v55, %v3836_v60  ;;  %1612 = vrot.lane.b32.xlu1 %v1063_v26, %s3108_s11  ;;  %v512_v19 = vrot.slane %v3842_v13, 7 }
 0x17b   :  { %7267 = vst [vmem:[#allocation56_spill] sm:$0xff] %v4011_v40  ;;  %v513_v55 = vrot.slane %v3844_v37, 7  ;;  %1610 = vrot.lane.b32.xlu0 %v1062_v7, %s3108_s11  ;;  %v7270_v26 = vcombine.low %v3580_v47, %v3585_v39  ;;  %v785_v40 = vrot.slane %v3842_v13, 1  ;;  %v7275_v13 = vrot.slane %v3910_v34, 7 }
 0x17c   :  { %7266 = vst [vmem:[#allocation55_spill] sm:$0xff] %v4000_v9  ;;  %v4059_v60 = vsel %vm1226_vm13, 65537, %v7225_v14  ;;  %v4067_v39 = vsel %vm1227_vm0, 65537, %v7225_v14  ;;  %v7277_v7 = vand.u32 7, %v3287_v21  ;;  %v788_v50 = vrot.slane %v3840_v0, 1 }
 0x17d   :  { %vm4027_vm5 = vcmp.ne.s16.totalorder %v7270_v26, 0  ;;  %v4045_v47 = vsel %vm6977_vm14, %v512_v19, %v513_v55  ;;  %v4051_v26 = vsel %vm6977_vm14, %v7275_v13, %v512_v19  ;;  %v7278_v19 = vmov 0 }
 0x17e   :  { %7276 = vst [vmem:[#allocation57_spill] sm:$0xff] %v4051_v26  ;;  %vm4071_vm7 = vcmp.le.s32.totalorder %v7277_v7, 6  ;;  %v786_v13 = vrot.slane %v3844_v37, 1  ;;  %1616 = vrot.lane.b32.xlu1 %v1065_v27, %s3108_s11  ;;  %v7283_v37 = vcombine.low %v3598_v51, %v3603_v38  ;;  %v4104_v26 = vsel %vm4037_vm3, 65537, %v7225_v14  ;;  %v7289_v51 = vld [vmem:[#allocation31_spill] sm:$0xff] }
 0x17f   :  { %v7279_v19 = vsel %vm4071_vm7, 4294967295, %v7278_v19  ;;  %v6979_v3 = vrot.slane %v3910_v34, 1  ;;  %v7286_v27 = vand.u32 7, %v3290_v22  ;;  %v7287_v9 = vmov 0  ;;  %1614 = vrot.lane.b32.xlu0 %v1064_v58, %s3108_s11 }
 0x180   :  { %vm4096_vm13 = vcmp.ne.s16.totalorder %v7283_v37, 0  ;;  %v1395_v54 = vsel %vm3898_vm12, %v3893_v61, 0  ;;  %v7290_v38 = vcombine.low %v3608_v52, %v7289_v51  ;;  %vm7293_vm9 = vcmp.lt.s32.totalorder %v3283_v17, 7 }
 0x181   :  { %vm4110_vm0 = vcmp.le.s32.totalorder %v7286_v27, 6  ;;  %v4127_v37 = vsel %vm7293_vm9, %v786_v13, %v787_v45  ;;  %vm7295_vm2 = vmmov %vm7293_vm9  ;;  %vm7297_vm14 = vcmp.le.s32.totalorder %v3325_v2, 6  ;;  %v789_v52 = vrot.slane %v3852_v12, 1 }
 0x182   :  { %v7288_v9 = vsel %vm4110_vm0, 4294967295, %v7287_v9  ;;  %vm4121_vm3 = vcmp.ne.s16.totalorder %v7290_v38, 0  ;;  %7294 = vst [vmem:[#allocation31_spill] sm:$0xff] %v4127_v37  ;;  %v4131_v27 = vsel %vm7295_vm2, %v785_v40, %v786_v13  ;;  %vm4137_vm12 = vmand %vm7297_vm14, %vm3809_vm10  ;;  %vm7300_vm9 = vcmp.lt.s32.totalorder %v3283_v17, 1  ;;  %1676 = vrot.lane.b32.xlu1 %v1395_v54, %s3109_s12  ;;  %v7318_v54 = vld [vmem:[#allocation35_spill] sm:$0xff] }
 0x183   :  { %7296 = vst [vmem:[#allocation58_spill] sm:$0xff] %v4131_v27  ;;  %v4146_v51 = vsel %vm7300_vm9, %v513_v55, %v514_v31  ;;  %v4150_v13 = vsel %vm7295_vm2, %v787_v45, %v788_v50  ;;  %vm1450_vm14 = vmpackc.low %vm4088_vm1, %vm4088_vm1  ;;  %vm7307_vm9 = vcmp.ge.s32.totalorder %v3323_v1, 1  ;;  %v7325_v7 = vand.u32 7, %v3297_v35 }
 0x184   :  { %7301 = vst [vmem:[#allocation59_spill] sm:$0xff] %v4146_v51  ;;  %7302 = vst [vmem:[#allocation60_spill] sm:$0xff] %v4150_v13  ;;  %v4163_v58 = vpack.c.bf16 %v4146_v51, %v4045_v47  ;;  %v4167_v55 = vpack.c.bf16 %v4150_v13, %v4127_v37  ;;  %v778_v30 = vsel %vm4027_vm5, %v3916_v4, 0  ;;  %v1394_v25 = vsel %vm4121_vm3, %v3916_v4, 0  ;;  %v7407_v37 = vld [vmem:[#allocation45_spill] sm:$0xff]  ;;  %v7459_v13 = vld [vmem:[#allocation28_spill] sm:$0xff] }
 0x185   :  { %vm7303_vm6 = vmmov %vm7295_vm2  ;;  %vm4238_vm1 = vcmp.le.s32.totalorder %v7325_v7, 6  ;;  %v7396_v34 = vmov 0  ;;  %v7432_v7 = vcombine.low %v3828_v41, %v3831_v62  ;;  %v7438_v62 = vcombine.low %v3938_v46, %v3946_v59  ;;  %v7447_v46 = vld [vmem:[#allocation27_spill] sm:$0xff] }
 0x186   :  { %v4159_v38 = vsel %vm7303_vm6, %v6979_v3, %v785_v40  ;;  %7305 = vst [vmem:[#allocation62_spill] sm:$0xff] %v4163_v58  ;;  %7306 = vst [vmem:[#allocation63_spill] sm:$0xff] %v4167_v55  ;;  %v790_v3 = vrot.slane %v3858_v44, 1  ;;  %v777_v55 = vsel %vm3968_vm4, %v3963_v16, 0  ;;  %v7312_v58 = vld [vmem:[#allocation33_spill] sm:$0xff]  ;;  %v7320_v16 = vcombine.low %v7318_v54, %v7319_v43 }
 0x187   :  { %7304 = vst [vmem:[#allocation61_spill] sm:$0xff] %v4159_v38  ;;  %vm4173_vm2 = vmand %vm7307_vm9, %vm3796_vm15  ;;  %v4179_v40 = vpack.c.bf16 %v4131_v27, %v4159_v38  ;;  %v7313_v1 = vcombine.low %v7311_v49, %v7312_v58  ;;  %vm7316_vm15 = vcmp.lt.s32.totalorder %v3283_v17, 7  ;;  %v516_v27 = vrot.slane %v3852_v12, 7  ;;  %1530 = vrot.lane.b32.xlu0 %v777_v55, %s3106_s29 }
 0x188   :  { %v4195_v38 = vsel %vm7316_vm15, %v788_v50, %v789_v52  ;;  %vm4203_vm4 = vcmp.ne.s16.totalorder %v7320_v16, 0  ;;  %v4224_v12 = vsel %vm7316_vm15, %v789_v52, %v790_v3  ;;  %v779_v16 = vsel %vm3990_vm11, %v3893_v61, 0 }
 0x189   :  { %7310 = vst [vmem:[#allocation64_spill] sm:$0xff] %v4179_v40  ;;  %vm4189_vm6 = vcmp.ne.s16.totalorder %v7313_v1, 0  ;;  %7317 = vst [vmem:[#allocation32_spill] sm:$0xff] %v4195_v38  ;;  %v515_v40 = vrot.slane %v3840_v0, 7  ;;  %v4220_v0 = vsel %vm1450_vm14, 65537, %v7225_v14  ;;  %v4234_v58 = vpack.c.bf16 %v4224_v12, %v4195_v38  ;;  %1534 = vrot.lane.b32.xlu1 %v779_v16, %s3106_s29  ;;  %v7353_v1 = vld [vmem:[#allocation22_spill] sm:$0xff] }
 0x18a   :  { %7323 = vst [vmem:[#allocation33_spill] sm:$0xff] %v4224_v12  ;;  %v7326_v55 = vmov 0  ;;  %vm7328_vm14 = vcmp.lt.s32.totalorder %v3283_v17, 1  ;;  %v517_v61 = vrot.slane %v3858_v44, 7  ;;  %vm7330_vm11 = vcmp.ge.s32.totalorder %v3325_v2, 1  ;;  %v7358_v2 = vld [vmem:[#allocation41_spill] sm:$0xff] }
 0x18b   :  { %7324 = vst [vmem:[#allocation35_spill] sm:$0xff] %v4234_v58  ;;  %v7327_v55 = vsel %vm4238_vm1, 4294967295, %v7326_v55  ;;  %v4244_v52 = vsel %vm7328_vm14, %v514_v31, %v515_v40  ;;  %vm4251_vm15 = vmand %vm7330_vm11, %vm3809_vm10  ;;  %v791_v44 = vrot.slane %v3846_v63, 1  ;;  %v7335_v43 = vcombine.low %v3707_v23, %v3712_v36  ;;  %1532 = vrot.lane.b32.xlu0 %v778_v30, %s3106_s29  ;;  %v7341_v36 = vld [vmem:[#allocation40_spill] sm:$0xff] }
 0x18c   :  { %7329 = vst [vmem:[#allocation36_spill] sm:$0xff] %v4244_v52  ;;  %vm7333_vm9 = vmmov %vm7328_vm14  ;;  %v4285_v16 = vsel %vm7328_vm14, %v516_v27, %v517_v61  ;;  %v7342_v23 = vcombine.low %v3717_v48, %v7341_v36  ;;  %vm7347_vm11 = vcmp.le.s32.totalorder %v7346_v29, 6  ;;  %vm7350_vm14 = vcmp.lt.s32.totalorder %v3283_v17, 7  ;;  %v7354_v48 = vld [vmem:[#allocation12_spill] sm:$0xff] }
 0x18d   :  { %v4259_v54 = vsel %vm7333_vm9, %v515_v40, %v516_v27  ;;  %vm4271_vm10 = vcmp.ne.s16.totalorder %v7335_v43, 0  ;;  %vm7338_vm9 = vmpackc.low %vm4137_vm12, %vm4137_vm12  ;;  %7339 = vst [vmem:[#allocation66_spill] sm:$0xff] %v4285_v16  ;;  %v4319_v36 = vsel %vm7350_vm14, %v790_v3, %v791_v44  ;;  %v518_v49 = vrot.slane %v3846_v63, 7 }
 0x18e   :  { %7334 = vst [vmem:[#allocation65_spill] sm:$0xff] %v4259_v54  ;;  %v4281_v40 = vsel %vm7338_vm9, 65537, %v7225_v14  ;;  %v4289_v24 = vpack.c.bf16 %v4259_v54, %v4244_v52  ;;  %vm4295_vm5 = vcmp.ne.s16.totalorder %v7342_v23, 0  ;;  %vm7345_vm12 = vmpackc.low %vm4173_vm2, %vm4173_vm2  ;;  %v7352_v23 = vld [vmem:[#allocation21_spill] sm:$0xff]  ;;  %v792_v50 = vrot.slane %v3848_v15, 1 }
 0x18f   :  { %v4305_v27 = vsel %vm7345_vm12, 65537, %v7225_v14  ;;  %vm4311_vm9 = vmand %vm7347_vm11, %vm4071_vm7  ;;  %7351 = vst [vmem:[#allocation40_spill] sm:$0xff] %v4319_v36  ;;  %v780_v3 = vsel %vm4096_vm13, %v3920_v57, 0  ;;  %vm7355_vm12 = vcmp.le.s32.totalorder %v7354_v48, 6  ;;  %v519_v31 = vrot.slane %v3848_v15, 7  ;;  %1674 = vrot.lane.b32.xlu0 %v1394_v25, %s3109_s12 }
 0x190   :  { %7340 = vst [vmem:[#allocation67_spill] sm:$0xff] %v4289_v24  ;;  %vm4337_vm11 = vmand %vm7355_vm12, %vm4110_vm0  ;;  %v793_v63 = vrot.slane %v3875_v53, 1  ;;  %v794_v24 = vrot.slane %v3887_v56, 1  ;;  %1536 = vrot.lane.b32.xlu1 %v780_v3, %s3106_s29  ;;  %v7359_v12 = vcombine.low %v3730_v11, %v7358_v2  ;;  %v7362_v15 = vand.u32 7, %v3287_v21 }
 0x191   :  { %v7363_v38 = vmov 0  ;;  %vm7366_vm2 = vcmp.lt.s32.totalorder %v3283_v17, 1  ;;  %vm7368_vm3 = vmmov %vm7350_vm14  ;;  %v520_v11 = vrot.slane %v3875_v53, 7  ;;  %v7372_v21 = vmov 0 }
 0x192   :  { %vm4351_vm13 = vcmp.ne.s16.totalorder %v7359_v12, 0  ;;  %vm4360_vm12 = vcmp.ge.s32.totalorder %v7362_v15, 1  ;;  %v4366_v4 = vsel %vm7366_vm2, %v517_v61, %v518_v49  ;;  %v4370_v2 = vsel %vm7368_vm3, %v791_v44, %v792_v50 }
 0x193   :  { %v7364_v38 = vsel %vm4360_vm12, 4294967295, %v7363_v38  ;;  %7367 = vst [vmem:[#allocation68_spill] sm:$0xff] %v4366_v4  ;;  %7369 = vst [vmem:[#allocation69_spill] sm:$0xff] %v4370_v2  ;;  %v7371_v12 = vcombine.low %v3745_v20, %v7370_v10  ;;  %vm7374_vm2 = vcmp.ge.s32.totalorder %v7346_v29, 1  ;;  %v7377_v44 = vand.u32 7, %v3290_v22 }
 0x194   :  { %7365 = vst [vmem:[#allocation41_spill] sm:$0xff] %v7364_v38  ;;  %vm4385_vm8 = vmand %vm7374_vm2, %vm4071_vm7  ;;  %v7378_v53 = vmov 0  ;;  %v4397_v20 = vpack.c.bf16 %v4366_v4, %v4285_v16  ;;  %v4401_v3 = vpack.c.bf16 %v4370_v2, %v4319_v36  ;;  %vm7385_vm2 = vcmp.lt.s32.totalorder %v3283_v17, 7  ;;  %v7400_v4 = vld [vmem:[#allocation44_spill] sm:$0xff] }
 0x195   :  { %vm4377_vm14 = vcmp.ne.s16.totalorder %v7371_v12, 0  ;;  %vm4391_vm3 = vcmp.ge.s32.totalorder %v7377_v44, 1  ;;  %v4409_v15 = vsel %vm7385_vm2, %v793_v63, %v794_v24  ;;  %vm1453_vm7 = vmpackc.low %vm4337_vm11, %vm4337_vm11  ;;  %v1397_v44 = vsel %vm4189_vm6, %v3930_v6, 0 }
 0x196   :  { %v7373_v21 = vsel %vm4377_vm14, 4294967295, %v7372_v21  ;;  %v7379_v53 = vsel %vm4391_vm3, 4294967295, %v7378_v53  ;;  %7381 = vst [vmem:[#allocation70_spill] sm:$0xff] %v4397_v20  ;;  %7382 = vst [vmem:[#allocation71_spill] sm:$0xff] %v4401_v3  ;;  %vm7383_vm14 = vcmp.lt.s32.totalorder %v3283_v17, 1  ;;  %1680 = vrot.lane.b32.xlu1 %v1397_v44, %s3109_s12  ;;  %v7417_v45 = vand.u32 7, %v7352_v23 }
 0x197   :  { %7380 = vst [vmem:[#allocation43_spill] sm:$0xff] %v7379_v53  ;;  %v4405_v25 = vsel %vm7383_vm14, %v518_v49, %v519_v31  ;;  %7386 = vst [vmem:[#allocation73_spill] sm:$0xff] %v4409_v15  ;;  %v521_v49 = vrot.slane %v3887_v56, 7  ;;  %v7395_v56 = vand.u32 7, %v3301_v42  ;;  %v7422_v2 = vmov 0 }
 0x198   :  { %7384 = vst [vmem:[#allocation72_spill] sm:$0xff] %v4405_v25  ;;  %vm7387_vm3 = vmmov %vm7385_vm2  ;;  %v796_v30 = vrot.slane %v3867_v28, 1  ;;  %v7433_v36 = vmov 0  ;;  %v7439_v41 = vmov 0  ;;  %v7471_v23 = vand.u32 7, %v3297_v35 }
 0x199   :  { %v4418_v10 = vsel %vm7387_vm3, %v792_v50, %v793_v63  ;;  %vm7389_vm12 = vmmov %vm7383_vm14  ;;  %vm7392_vm3 = vcmp.ge.s32.totalorder %v7354_v48, 1  ;;  %vm4446_vm2 = vcmp.le.s32.totalorder %v7395_v56, 6  ;;  %v7399_v63 = vld [vmem:[#allocation42_spill] sm:$0xff]  ;;  %v7463_v50 = vld [vmem:[#allocation55_spill] sm:$0xff]  ;;  %v7472_v54 = vmov 0 }
 0x19a   :  { %7388 = vst [vmem:[#allocation74_spill] sm:$0xff] %v4418_v10  ;;  %v4422_v12 = vsel %vm7389_vm12, %v519_v31, %v520_v11  ;;  %vm7391_vm14 = vmpackc.low %vm4251_vm15, %vm4251_vm15  ;;  %v7397_v34 = vsel %vm4446_vm2, 4294967295, %v7396_v34  ;;  %v4452_v8 = vpack.c.bf16 %v4409_v15, %v4418_v10  ;;  %v1396_v31 = vsel %vm4203_vm4, %v3920_v57, 0 }
 0x19b   :  { %7390 = vst [vmem:[#allocation75_spill] sm:$0xff] %v4422_v12  ;;  %v4434_v22 = vsel %vm7391_vm14, 65537, %v7225_v14  ;;  %vm4440_vm12 = vmand %vm7392_vm3, %vm4110_vm0  ;;  %v7401_v3 = vcombine.low %v7399_v63, %v7400_v4  ;;  %v4472_v44 = vpack.c.bf16 %v4422_v12, %v4405_v25  ;;  %vm7405_vm4 = vcmp.lt.s32.totalorder %v3283_v17, 1  ;;  %1678 = vrot.lane.b32.xlu0 %v1396_v31, %s3109_s12  ;;  %v7408_v4 = vld [vmem:[#allocation46_spill] sm:$0xff]  ;;  %v7413_v31 = vld [vmem:[#allocation16_spill] sm:$0xff] }
 0x19c   :  { %7398 = vst [vmem:[#allocation76_spill] sm:$0xff] %v4452_v8  ;;  %v4476_v57 = vsel %vm7405_vm4, %v520_v11, %v521_v49  ;;  %vm7412_vm3 = vmpackc.low %vm4311_vm9, %vm4311_vm9  ;;  %v4500_v11 = vsel %vm1453_vm7, 65537, %v7225_v14  ;;  %vm7414_vm4 = vcmp.ge.s32.totalorder %v7413_v31, 1  ;;  %vm4518_vm7 = vcmp.le.s32.totalorder %v7417_v45, 6  ;;  %v7425_v12 = vld [vmem:[#allocation23_spill] sm:$0xff]  ;;  %v7426_v45 = vld [vmem:[#allocation17_spill] sm:$0xff] }
 0x19d   :  { %vm4461_vm6 = vcmp.ne.s16.totalorder %v7401_v3, 0  ;;  %7404 = vst [vmem:[#allocation42_spill] sm:$0xff] %v4472_v44  ;;  %7406 = vst [vmem:[#allocation44_spill] sm:$0xff] %v4476_v57  ;;  %v7409_v3 = vcombine.low %v7407_v37, %v7408_v4  ;;  %v4492_v56 = vsel %vm7412_vm3, 65537, %v7225_v14  ;;  %v7415_v37 = vmov 0 }
 0x19e   :  { %vm4506_vm15 = vmand %vm7414_vm4, %vm4238_vm1  ;;  %v795_v4 = vrot.slane %v3865_v5, 1  ;;  %v7421_v44 = vand.u32 7, %v7353_v1  ;;  %v781_v8 = vsel %vm4271_vm10, %v3930_v6, 0  ;;  %vm7427_vm3 = vcmp.ge.s32.totalorder %v7426_v45, 1 }
 0x19f   :  { %vm4482_vm14 = vcmp.ne.s16.totalorder %v7409_v3, 0  ;;  %v7416_v37 = vsel %vm4506_vm15, 4294967295, %v7415_v37  ;;  %v7418_v3 = vmov 0  ;;  %vm4537_vm4 = vmand %vm7427_vm3, %vm4446_vm2  ;;  %v7428_v25 = vmov 0  ;;  %1538 = vrot.lane.b32.xlu1 %v781_v8, %s3106_s29  ;;  %v7441_v8 = vld [vmem:[#allocation9_spill] sm:$0xff] }
 0x1a0   :  { %v7419_v3 = vsel %vm4518_vm7, 4294967295, %v7418_v3  ;;  %vm4524_vm11 = vcmp.le.s32.totalorder %v7421_v44, 6  ;;  %v7429_v25 = vsel %vm4537_vm4, 4294967295, %v7428_v25  ;;  %vm7430_vm9 = vcmp.lt.s32.totalorder %v3283_v17, 7 }
 0x1a1   :  { %7420 = vst [vmem:[#allocation45_spill] sm:$0xff] %v7419_v3  ;;  %v7423_v2 = vsel %vm4524_vm11, 4294967295, %v7422_v2  ;;  %v4543_v44 = vsel %vm7430_vm9, %v794_v24, %v795_v4  ;;  %v522_v1 = vrot.slane %v3865_v5, 7  ;;  %v523_v10 = vrot.slane %v3867_v28, 7  ;;  %vm7435_vm3 = vmmov %vm7430_vm9  ;;  %v7437_v24 = vld [vmem:[#allocation25_spill] sm:$0xff] }
 0x1a2   :  { %7424 = vst [vmem:[#allocation46_spill] sm:$0xff] %v7423_v2  ;;  %7431 = vst [vmem:[#allocation23_spill] sm:$0xff] %v4543_v44  ;;  %v1398_v6 = vsel %vm4295_vm5, %v3996_v33, 0  ;;  %vm4554_vm10 = vcmp.ne.s16.totalorder %v7432_v7, 0  ;;  %v4563_v5 = vsel %vm7435_vm3, %v795_v4, %v796_v30  ;;  %v404_v43 = vand.u32 7, %v7437_v24  ;;  %v7451_v24 = vld [vmem:[#allocation10_spill] sm:$0xff] }
 0x1a3   :  { %v7434_v36 = vsel %vm4554_vm10, 4294967295, %v7433_v36  ;;  %7436 = vst [vmem:[#allocation17_spill] sm:$0xff] %v4563_v5  ;;  %1682 = vrot.lane.b32.xlu0 %v1398_v6, %s3109_s12  ;;  %vm4572_vm5 = vcmp.ne.s16.totalorder %v7438_v62, 0  ;;  %v4579_v4 = vpack.c.bf16 %v4563_v5, %v4543_v44  ;;  %vm7443_vm3 = vcmp.lt.s32.totalorder %v3283_v17, 1  ;;  %v7510_v5 = vld [vmem:[#allocation30_spill] sm:$0xff]  ;;  %v7514_v2 = vld [vmem:[#allocation57_spill] sm:$0xff] }
 0x1a4   :  { %v7440_v41 = vsel %vm4572_vm5, 4294967295, %v7439_v41  ;;  %v4583_v28 = vsel %vm7443_vm3, %v522_v1, %v523_v10  ;;  %vm7445_vm9 = vmmov %vm7443_vm3  ;;  %vm7448_vm2 = vcmp.le.s32.totalorder %v7447_v46, 6  ;;  %v782_v44 = vsel %vm4351_vm13, %v3996_v33, 0 }
 0x1a5   :  { %7442 = vst [vmem:[#allocation25_spill] sm:$0xff] %v4579_v4  ;;  %7444 = vst [vmem:[#allocation9_spill] sm:$0xff] %v4583_v28  ;;  %v4587_v6 = vsel %vm7445_vm9, %v521_v49, %v522_v1  ;;  %v7453_v49 = vand.u32 7, %v7425_v12  ;;  %vm7458_vm5 = vnez %v7364_v38  ;;  %v797_v33 = vrot.slane %v3912_v18, 1  ;;  %1540 = vrot.lane.b32.xlu1 %v782_v44, %s3106_s29 }
 0x1a6   :  { %7446 = vst [vmem:[#allocation77_spill] sm:$0xff] %v4587_v6  ;;  %vm4593_vm0 = vmand %vm7448_vm2, %vm4518_vm7  ;;  %v4605_v1 = vpack.c.bf16 %v4587_v6, %v4476_v57  ;;  %v7466_v6 = vld [vmem:[#allocation54_spill] sm:$0xff]  ;;  %v7468_v57 = vmov 0  ;;  %vm7470_vm13 = vnez %v7379_v53  ;;  %v7475_v44 = vmov 0 }
 0x1a7   :  { %vm4609_vm9 = vcmp.le.s32.totalorder %v7453_v49, 6  ;;  %vm7456_vm2 = vmpackc.low %vm4385_vm8, %vm4385_vm8  ;;  %vm7460_vm8 = vcmp.le.s32.totalorder %v7459_v13, 6  ;;  %v7479_v35 = vcombine.low %v4059_v60, %v4067_v39  ;;  %vm7482_vm7 = vcmp.lt.s32.totalorder %v3283_v17, 7  ;;  %v7484_v60 = vld [vmem:[#allocation29_spill] sm:$0xff]  ;;  %v3028_v13 = vld [vmem:[%s6874_s2] sm:$0xff]  }
 0x1a8   :  { %7452 = vst [vmem:[#allocation10_spill] sm:$0xff] %v4605_v1  ;;  %v4622_v7 = vsel %vm7456_vm2, 65537, %v7225_v14  ;;  %vm7457_vm3 = vmpackc.low %vm4440_vm12, %vm4440_vm12  ;;  %vm7464_vm12 = vnez %v7373_v21  ;;  %v7465_v1 = vld [vmem:[#allocation53_spill] sm:$0xff]  ;;  %v7474_v21 = vand.u32 7, %v3301_v42  ;;  %v2881_v42 = vcombine.low %v4220_v0, %v4281_v40  ;;  %2962 = vmatprep.subr.bf16.mxu1 %v3028_v13 }
 0x1a9   :  { %v4630_v49 = vsel %vm7457_vm3, 65537, %v7225_v14  ;;  %vm4640_vm2 = vmand %vm7460_vm8, %vm4524_vm11  ;;  %v1400_v62 = vsel %vm7464_vm12, %v7463_v50, 0  ;;  %v7467_v4 = vcombine.low %v7465_v1, %v7466_v6  ;;  %vm4660_vm11 = vcmp.ge.s32.totalorder %v7471_v23, 1  ;;  %2963 = vmatpush3.bf16.msra.mxu1 %v3028_v13 }
 0x1aa   :  { %v7473_v54 = vsel %vm4660_vm11, 4294967295, %v7472_v54  ;;  %vm4666_vm12 = vcmp.ge.s32.totalorder %v7474_v21, 1  ;;  %1686 = vrot.lane.b32.xlu0 %v1400_v62, %s3109_s12  ;;  %vm4681_vm8 = vcmp.ne.s16.totalorder %v7479_v35, 0  ;;  %v7480_v23 = vmov 0  ;;  %v7501_v35 = vld [vmem:[#allocation56_spill] sm:$0xff]  ;;  %v7509_v62 = vld [vmem:[#allocation49_spill] sm:$0xff] }
 0x1ab   :  { %vm4651_vm3 = vcmp.ne.s16.totalorder %v7467_v4, 0  ;;  %v7476_v44 = vsel %vm4666_vm12, 4294967295, %v7475_v44  ;;  %v7481_v23 = vsel %vm4681_vm8, 4294967295, %v7480_v23  ;;  %v2841_v6 = vcombine.low %v4305_v27, %v4434_v22 }
 0x1ac   :  { %v7469_v57 = vsel %vm4651_vm3, 4294967295, %v7468_v57  ;;  %vm4673_vm3 = vcmp.le.s32.totalorder %v404_v43, 6  ;;  %v2882_v1 = vcombine.low %v4492_v56, %v4500_v11  ;;  %v4693_v21 = vsel %vm7482_vm7, %v796_v30, %v797_v33  ;;  %v7508_v30 = vld [vmem:[#allocation15_spill] sm:$0xff] }
 0x1ad   :  { %7483 = vst [vmem:[#allocation55_spill] sm:$0xff] %v4693_v21  ;;  %vm7485_vm4 = vcmp.ge.s32.totalorder %v7484_v60, 1  ;;  %vm7488_vm8 = vcmp.le.s32.totalorder %v7346_v29, 6  ;;  %v7489_v0 = vmov 0  ;;  %vm7491_vm7 = vcmp.le.s32.totalorder %v7354_v48, 6 }
 0x1ae   :  { %vm4699_vm15 = vmand %vm7485_vm4, %vm4609_vm9  ;;  %v7492_v40 = vmov 0  ;;  %v7494_v27 = vand.u32 7, %v7441_v8  ;;  %v7495_v22 = vmov 0  ;;  %v7497_v56 = vand.u32 7, %v7451_v24 }
 0x1af   :  { %vm4707_vm10 = vmand %vm7488_vm8, %vm7458_vm5  ;;  %v7498_v11 = vmov 0  ;;  %v7506_v20 = vmov 0  ;;  %v798_v29 = vrot.slane %v7509_v62, 1  ;;  %v7515_v51 = vpack.c.bf16 %v4045_v47, %v7514_v2 }
 0x1b0   :  { %v7490_v0 = vsel %vm4707_vm10, 4294967295, %v7489_v0  ;;  %vm4715_vm1 = vmand %vm7491_vm7, %vm7470_vm13  ;;  %vm4721_vm4 = vcmp.le.s32.totalorder %v7494_v27, 6  ;;  %vm4727_vm8 = vcmp.le.s32.totalorder %v7497_v56, 6  ;;  %v1399_v27 = vsel %vm4461_vm6, %v7501_v35, 0 }
 0x1b1   :  { %v7493_v40 = vsel %vm4715_vm1, 4294967295, %v7492_v40  ;;  %v7496_v22 = vsel %vm4721_vm4, 4294967295, %v7495_v22  ;;  %v7499_v11 = vsel %vm4727_vm8, 4294967295, %v7498_v11  ;;  %vm7502_vm10 = vcmp.le.s32.totalorder %v7413_v31, 6  ;;  %1684 = vrot.lane.b32.xlu1 %v1399_v27, %s3109_s12 }
 0x1b2   :  { %7500 = vst [vmem:[#allocation53_spill] sm:$0xff] %v7499_v11  ;;  %vm4749_vm13 = vmand %vm7502_vm10, %vm4660_vm11  ;;  %v7503_v56 = vmov 0  ;;  %vm7505_vm7 = vcmp.le.s32.totalorder %v7426_v45, 6  ;;  %vm7511_vm1 = vcmp.ge.s32.totalorder %v7510_v5, 1  ;;  %v1050_v48 = vsel %vm4482_vm14, %v7515_v51, 0 }
 0x1b3   :  { %v7504_v56 = vsel %vm4749_vm13, 4294967295, %v7503_v56  ;;  %vm4757_vm6 = vmand %vm7505_vm7, %vm4666_vm12  ;;  %v7516_v52 = vcombine.low %v4082_v32, %v4104_v26  ;;  %v7517_v46 = vmov 0  ;;  %v7519_v3 = vrot.slane %v3912_v18, 7  ;;  %1578 = vrot.lane.b32.xlu0 %v1050_v48, %s3110_s15 }
 0x1b4   :  { %v7507_v20 = vsel %vm4757_vm6, 4294967295, %v7506_v20  ;;  %vm4767_vm10 = vmand %vm7511_vm1, %vm4673_vm3  ;;  %vm7520_vm6 = vcmp.lt.s32.totalorder %v3283_v17, 1  ;;  %v7521_v47 = vand.u32 7, %v7425_v12  ;;  %v7522_v26 = vmov 0  ;;  %v7532_v12 = vld [vmem:[#allocation20_spill] sm:$0xff] }
 0x1b5   :  { %vm4783_vm7 = vcmp.ne.s16.totalorder %v7516_v52, 0  ;;  %v4794_v27 = vsel %vm7520_vm6, %v523_v10, %v7519_v3  ;;  %v7524_v32 = vmov 0  ;;  %vm4810_vm1 = vcmp.ne.s16.totalorder %v2881_v42, 0  ;;  %v7528_v52 = vld [vmem:[#allocation18_spill] sm:$0xff] }
 0x1b6   :  { %v7518_v46 = vsel %vm4783_vm7, 4294967295, %v7517_v46  ;;  %vm4801_vm13 = vcmp.ge.s32.totalorder %v7521_v47, 1  ;;  %vm4805_vm7 = vcmp.ge.s32.totalorder %v404_v43, 1  ;;  %v7526_v51 = vmov 0  ;;  %v7544_v47 = vld [vmem:[#allocation19_spill] sm:$0xff] }
 0x1b7   :  { %v7523_v26 = vsel %vm4801_vm13, 4294967295, %v7522_v26  ;;  %v7525_v32 = vsel %vm4805_vm7, 4294967295, %v7524_v32  ;;  %v7527_v51 = vsel %vm4810_vm1, 4294967295, %v7526_v51  ;;  %vm7529_vm6 = vcmp.ge.s32.totalorder %v7528_v52, 1 }
 0x1b8   :  { %vm4818_vm14 = vmand %vm7529_vm6, %vm4721_vm4  ;;  %v7530_v10 = vmov 0  ;;  %vm7533_vm12 = vcmp.ge.s32.totalorder %v7532_v12, 1  ;;  %v7534_v63 = vmov 0  ;;  %v4832_v48 = vpack.c.bf16 %v4794_v27, %v4583_v28  ;;  %v7545_v12 = vld [vmem:[#allocation50_spill] sm:$0xff] }
 0x1b9   :  { %v7531_v10 = vsel %vm4818_vm14, 4294967295, %v7530_v10  ;;  %vm4826_vm11 = vmand %vm7533_vm12, %vm4727_vm8  ;;  %vm7537_vm1 = vcmp.lt.s32.totalorder %v3283_v17, 7  ;;  %vm7540_vm8 = vnez %v7327_v55  ;;  %v799_v61 = vrot.slane %v7545_v12, 1  ;;  %v7663_v55 = vld [vmem:[#allocation24_spill] sm:$0xff] }
 0x1ba   :  { %v7535_v63 = vsel %vm4826_vm11, 4294967295, %v7534_v63  ;;  %7536 = vst [vmem:[#allocation54_spill] sm:$0xff] %v4832_v48  ;;  %v4836_v3 = vsel %vm7537_vm1, %v797_v33, %v798_v29  ;;  %vm7538_vm6 = vmpackc.low %vm4593_vm0, %vm4593_vm0  ;;  %vm7541_vm1 = vcmp.le.s32.totalorder %v7413_v31, 6  ;;  %v7542_v33 = vmov 0 }
 0x1bb   :  { %v1476_v43 = vsel %vm7538_vm6, 65537, %v7225_v14  ;;  %vm7539_vm12 = vmpackc.low %vm4640_vm2, %vm4640_vm2  ;;  %v4861_v28 = vpack.c.bf16 %v4836_v3, %v4693_v21  ;;  %vm7546_vm2 = vnez %v7434_v36  ;;  %vm7547_vm6 = vnez %v7416_v37  ;;  %v7555_v37 = vld [vmem:[#allocation58_spill] sm:$0xff]  ;;  %v7562_v21 = vld [vmem:[#allocation51_spill] sm:$0xff] }
 0x1bc   :  { %v1477_v42 = vsel %vm7539_vm12, 65537, %v7225_v14  ;;  %vm4854_vm4 = vmand %vm7541_vm1, %vm7540_vm8  ;;  %v783_v31 = vsel %vm7546_vm2, %v7501_v35, 0  ;;  %vm7549_vm1 = vnez %v7429_v25  ;;  %vm7551_vm0 = vnez %v7279_v19  ;;  %v7554_v25 = vld [vmem:[#allocation31_spill] sm:$0xff]  ;;  %v7636_v19 = vld [vmem:[#allocation64_spill] sm:$0xff] }
 0x1bd   :  { %v7543_v33 = vsel %vm4854_vm4, 4294967295, %v7542_v33  ;;  %v2886_v48 = vcombine.low %v1476_v43, %v1477_v42  ;;  %vm7548_vm12 = vmpackc.low %vm7547_vm6, %vm7547_vm6  ;;  %vm7552_vm11 = vnez %v7288_v9  ;;  %1542 = vrot.lane.b32.xlu1 %v783_v31, %s3106_s29  ;;  %v7556_v13 = vpack.c.bf16 %v7554_v25, %v7555_v37  ;;  %v7641_v42 = vld [vmem:[#allocation35_spill] sm:$0xff] }
 0x1be   :  { %v4876_v59 = vsel %vm7548_vm12, 65537, %v7225_v14  ;;  %vm7550_vm4 = vmpackc.low %vm7549_vm1, %vm7549_vm1  ;;  %vm7557_vm12 = vnez %v7440_v41  ;;  %vm4907_vm1 = vcmp.ne.s16.totalorder %v2841_v6, 0  ;;  %v7560_v39 = vmov 0 }
 0x1bf   :  { %v4884_v43 = vsel %vm7550_vm4, 65537, %v7225_v14  ;;  %vm7553_vm6 = vmpackc.low %vm4699_vm15, %vm4699_vm15  ;;  %v1170_v35 = vsel %vm7557_vm12, %v7556_v13, 0  ;;  %vm4911_vm14 = vcmp.ne.s16.totalorder %v2886_v48, 0  ;;  %v7563_v11 = vrot.slane %v7562_v21, 1  ;;  %v3029_v13 = vld [vmem:[%s6874_s2 + $0x8] sm:$0xff]  }
 0x1c0   :  { %v902_v36 = vsel %vm7553_vm6, 65537, %v7225_v14  ;;  %v7561_v39 = vsel %vm4911_vm14, 4294967295, %v7560_v39  ;;  %vm7564_vm15 = vcmp.lt.s32.totalorder %v3283_v17, 7  ;;  %1626 = vrot.lane.b32.xlu0 %v1170_v35, %s3111_s16  ;;  %vm4929_vm2 = vcmp.ne.s16.totalorder %v2882_v1, 0  ;;  %vm7569_vm12 = vmpackc.low %vm7458_vm5, %vm7458_vm5  ;;  %2964 = vmatprep.subr.bf16.mxu1 %v3029_v13 }
 0x1c1   :  { %v4919_v58 = vsel %vm7564_vm15, %v799_v61, %v7563_v11  ;;  %vm7565_vm6 = vmmov %vm7564_vm15  ;;  %v7566_v41 = vmov 0  ;;  %v525_v1 = vrot.slane %v7509_v62, 7  ;;  %v7572_v16 = vmov 0  ;;  %2965 = vmatpush3.bf16.msra.mxu1 %v3029_v13 }
 0x1c2   :  { %v4923_v31 = vsel %vm7565_vm6, %v798_v29, %v799_v61  ;;  %v7567_v41 = vsel %vm4929_vm2, 4294967295, %v7566_v41  ;;  %vm7568_vm15 = vmpackc.low %vm4767_vm10, %vm4767_vm10  ;;  %v4958_v61 = vsel %vm7569_vm12, 65537, %v7225_v14  ;;  %vm7570_vm10 = vnez %v7397_v34 }
 0x1c3   :  { %v4938_v11 = vpack.c.bf16 %v4919_v58, %v4923_v31  ;;  %v903_v29 = vsel %vm7568_vm15, 65537, %v7225_v14  ;;  %vm7571_vm15 = vcmp.le.s32.totalorder %v7426_v45, 6  ;;  %v526_v25 = vrot.slane %v7545_v12, 7 }
 0x1c4   :  { %vm4964_vm4 = vmand %vm7571_vm15, %vm7570_vm10  ;;  %v2847_v62 = vcombine.low %v902_v36, %v903_v29  ;;  %vm7574_vm6 = vcmp.le.s32.totalorder %v7484_v60, 6  ;;  %vm7577_vm12 = vnez %v7469_v57  ;;  %vm7578_vm15 = vnez %v7379_v53 }
 0x1c5   :  { %v7573_v16 = vsel %vm4964_vm4, 4294967295, %v7572_v16  ;;  %vm4973_vm14 = vmand %vm7574_vm6, %vm4801_vm13  ;;  %v784_v35 = vsel %vm7577_vm12, %v7463_v50, 0  ;;  %v7580_v36 = vand.u32 7, %v7441_v8  ;;  %v7581_v57 = vmov 0 }
 0x1c6   :  { %vm7579_vm5 = vmpackc.low %vm7578_vm15, %vm7578_vm15  ;;  %v7583_v50 = vand.u32 7, %v7451_v24  ;;  %v7584_v29 = vmov 0  ;;  %v7586_v6 = vrot.slane %v3912_v18, 7  ;;  %1544 = vrot.lane.b32.xlu1 %v784_v35, %s3106_s29  ;;  %v7589_v24 = vld [vmem:[#allocation62_spill] sm:$0xff]  ;;  %vm7590_vm15 = vnez %v7481_v23 }
 0x1c7   :  { %v4989_v12 = vsel %vm7579_vm5, 65537, %v7225_v14  ;;  %vm4999_vm2 = vcmp.ge.s32.totalorder %v7580_v36, 1  ;;  %vm7587_vm5 = vcmp.lt.s32.totalorder %v3283_v17, 1  ;;  %vm7588_vm4 = vmpackc.low %vm4801_vm13, %vm4801_vm13  ;;  %v1290_v18 = vsel %vm7590_vm15, %v7589_v24, 0 }
 0x1c8   :  { %v7582_v57 = vsel %vm4999_vm2, 4294967295, %v7581_v57  ;;  %vm5005_vm12 = vcmp.ge.s32.totalorder %v7583_v50, 1  ;;  %v531_v48 = vsel %vm7587_vm5, %v7586_v6, %v525_v1  ;;  %v1014_v8 = vsel %vm7588_vm4, 65537, %v7225_v14  ;;  %1650 = vrot.lane.b32.xlu0 %v1290_v18, %s3112_s21 }
 0x1c9   :  { %v7585_v29 = vsel %vm5005_vm12, 4294967295, %v7584_v29  ;;  %v7591_v6 = vcombine.low %v4622_v7, %v4630_v49  ;;  %v7592_v36 = vmov 0  ;;  %vm5033_vm12 = vcmp.ne.s16.totalorder %v2847_v62, 0  ;;  %v3030_v49 = vld [vmem:[%s6874_s2 + $0x10] sm:$0xff]  }
 0x1ca   :  { %v7594_v50 = vmov 0  ;;  %v7596_v53 = vrot.slane %v7562_v21, 7  ;;  %vm7597_vm4 = vcmp.lt.s32.totalorder %v3283_v17, 1  ;;  %vm7599_vm15 = vcmp.le.s32.totalorder %v7510_v5, 6  ;;  %2966 = vmatprep.subr.bf16.mxu1 %v3030_v49  ;;  %v7616_v17 = vld [vmem:[#allocation52_spill] sm:$0xff] }
 0x1cb   :  { %vm5029_vm5 = vcmp.ne.s16.totalorder %v7591_v6, 0  ;;  %v7595_v50 = vsel %vm5033_vm12, 4294967295, %v7594_v50  ;;  %vm7598_vm6 = vmmov %vm7597_vm4  ;;  %v7610_v13 = vmov 0  ;;  %v7612_v6 = vld [vmem:[#allocation61_spill] sm:$0xff]  ;;  %v2850_v4 = vcombine.low %v4958_v61, %v4989_v12  ;;  %2967 = vmatpush3.bf16.msra.mxu1 %v3030_v49 }
 0x1cc   :  { %v7593_v36 = vsel %vm5029_vm5, 4294967295, %v7592_v36  ;;  %v5041_v35 = vsel %vm7597_vm4, %v526_v25, %v7596_v53  ;;  %v5045_v23 = vsel %vm7598_vm6, %v525_v1, %v526_v25  ;;  %vm5051_vm13 = vmand %vm7599_vm15, %vm4805_vm7  ;;  %v952_v1 = vpack.c.bf16 %v531_v48, %v4794_v27 }
 0x1cd   :  { %vm7604_vm15 = vmpackc.low %vm4805_vm7, %vm4805_vm7  ;;  %vm7605_vm6 = vnez %v7473_v54  ;;  %v7609_v27 = vand.u32 7, %v7508_v30  ;;  %vm7618_vm4 = vnez %v7476_v44  ;;  %v938_v9 = vsel %vm4907_vm1, %v7636_v19, 0 }
 0x1ce   :  { %v1015_v62 = vsel %vm7604_vm15, 65537, %v7225_v14  ;;  %vm7606_vm12 = vmpackc.low %vm7605_vm6, %vm7605_vm6  ;;  %vm7617_vm15 = vnez %v7518_v46  ;;  %v7624_v46 = vld [vmem:[#allocation63_spill] sm:$0xff]  ;;  %v7650_v7 = vmov 0 }
 0x1cf   :  { %v5086_v25 = vsel %vm7606_vm12, 65537, %v7225_v14  ;;  %vm5096_vm2 = vcmp.le.s32.totalorder %v7609_v27, 6  ;;  %v2855_v18 = vcombine.low %v1014_v8, %v1015_v62  ;;  %vm7613_vm12 = vcmp.le.s32.totalorder %v7484_v60, 6  ;;  %vm7619_vm7 = vmpackc.low %vm7618_vm4, %vm7618_vm4 }
 0x1d0   :  { %v7611_v13 = vsel %vm5096_vm2, 4294967295, %v7610_v13  ;;  %vm5106_vm6 = vmand %vm7613_vm12, %vm4609_vm9  ;;  %v1401_v27 = vsel %vm7617_vm15, %v7616_v17, 0  ;;  %v1007_v8 = vsel %vm7619_vm7, 65537, %v7225_v14  ;;  %v1072_v62 = vpack.c.bf16 %v4923_v31, %v4836_v3  ;;  %v3031_v31 = vld [vmem:[%s6874_s2 + $0x18] sm:$0xff]  }
 0x1d1   :  { %vm7620_vm12 = vmpackc.low %vm4609_vm9, %vm4609_vm9  ;;  %vm7621_vm15 = vcmp.le.s32.totalorder %v7510_v5, 6  ;;  %1688 = vrot.lane.b32.xlu1 %v1401_v27, %s3109_s12  ;;  %vm7625_vm7 = vnez %v7527_v51  ;;  %vm1048_vm10 = vcmp.ne.s16.totalorder %v2855_v18, 0  ;;  %v5153_v51 = vpack.c.bf16 %v7514_v2, %v5041_v35  ;;  %2968 = vmatprep.subr.bf16.mxu1 %v3031_v31 }
 0x1d2   :  { %v1134_v21 = vsel %vm7620_vm12, 65537, %v7225_v14  ;;  %vm5131_vm5 = vmand %vm7621_vm15, %vm4673_vm3  ;;  %v1514_v3 = vsel %vm7625_vm7, %v7624_v46, 0  ;;  %v7630_v2 = vand.u32 7, %v7544_v47  ;;  %v7631_v18 = vmov 0  ;;  %2969 = vmatpush3.bf16.msra.mxu1 %v3031_v31 }
 0x1d3   :  { %vm7628_vm15 = vmpackc.low %vm4673_vm3, %vm4673_vm3  ;;  %1698 = vrot.lane.b32.xlu0 %v1514_v3, %s3113_s24  ;;  %v5173_v27 = vsel %vm1048_vm10, %v952_v1, 0  ;;  %v2851_v1 = vcombine.low %v5086_v25, %v1007_v8  ;;  %v7643_v8 = vcombine.low %v4876_v59, %v4884_v43  ;;  %vm7662_vm4 = vnez %v7611_v13 }
 0x1d4   :  { %v1135_v15 = vsel %vm7628_vm15, 65537, %v7225_v14  ;;  %vm1239_vm7 = vmpackc.low %vm5051_vm13, %vm5051_vm13  ;;  %vm5169_vm12 = vcmp.le.s32.totalorder %v7630_v2, 6  ;;  %v7665_v17 = vmov 0  ;;  %vm7679_vm9 = vnez %v7493_v40 }
 0x1d5   :  { %v7632_v18 = vsel %vm5169_vm12, 4294967295, %v7631_v18  ;;  %v2863_v24 = vcombine.low %v1134_v21, %v1135_v15  ;;  %vm7633_vm15 = vmpackc.low %vm7551_vm0, %vm7551_vm0  ;;  %v5191_v21 = vpack.c.bf16 %v5045_v23, %v531_v48  ;;  %v7639_v48 = vmov 0  ;;  %1554 = vrot.lane.b32.xlu1 %v938_v9, %s3114_s25  ;;  %v7648_v15 = vld [vmem:[#allocation20_spill] sm:$0xff] }
 0x1d6   :  { %v1124_v61 = vsel %vm7633_vm15, 65537, %v7225_v14  ;;  %vm7634_vm10 = vmpackc.low %vm7552_vm11, %vm7552_vm11  ;;  %vm7637_vm11 = vnez %v7496_v22  ;;  %vm7638_vm15 = vcmp.le.s32.totalorder %v7528_v52, 6  ;;  %v1255_v37 = vsel %vm1239_vm7, 65537, %v7225_v14 }
 0x1d7   :  { %v1125_v12 = vsel %vm7634_vm10, 65537, %v7225_v14  ;;  %vm7635_vm2 = vmpackc.low %vm4973_vm14, %vm4973_vm14  ;;  %vm1168_vm14 = vcmp.ne.s16.totalorder %v2863_v24, 0  ;;  %vm5227_vm1 = vcmp.ne.s16.totalorder %v7643_v8, 0  ;;  %v7646_v24 = vld [vmem:[#allocation53_spill] sm:$0xff]  ;;  %vm7649_vm0 = vcmp.le.s32.totalorder %v7648_v15, 6 }
 0x1d8   :  { %v1254_v49 = vsel %vm7635_vm2, 65537, %v7225_v14  ;;  %vm5210_vm10 = vmand %vm7638_vm15, %vm7637_vm11  ;;  %vm7642_vm2 = vnez %v7567_v41  ;;  %vm7647_vm15 = vnez %v7646_v24  ;;  %v5239_v2 = vsel %vm1168_vm14, %v1072_v62, 0 }
 0x1d9   :  { %v7640_v48 = vsel %vm5210_vm10, 4294967295, %v7639_v48  ;;  %v1515_v25 = vsel %vm7642_vm2, %v7641_v42, 0  ;;  %vm5235_vm13 = vmand %vm7649_vm0, %vm7647_vm15  ;;  %v2871_v9 = vcombine.low %v1254_v49, %v1255_v37  ;;  %vm5242_vm7 = vcmp.ne.s16.totalorder %v2850_v4, 0  ;;  %v7672_v49 = vld [vmem:[#allocation26_spill] sm:$0xff] }
 0x1da   :  { %v7651_v7 = vsel %vm5235_vm13, 4294967295, %v7650_v7  ;;  %1700 = vrot.lane.b32.xlu0 %v1515_v25, %s3113_s24  ;;  %v7652_v41 = vmov 0  ;;  %v2858_v59 = vcombine.low %v1124_v61, %v1125_v12  ;;  %vm7655_vm0 = vmpackc.low %vm5106_vm6, %vm5106_vm6  ;;  %vm7658_vm2 = vnez %v7397_v34 }
 0x1db   :  { %v7653_v41 = vsel %vm5242_vm7, 4294967295, %v7652_v41  ;;  %v1478_v43 = vsel %vm7655_vm0, 65537, %v7225_v14  ;;  %vm7656_vm14 = vmpackc.low %vm5131_vm5, %vm5131_vm5  ;;  %vm7660_vm0 = vnez %v7582_v57  ;;  %vm5287_vm7 = vcmp.ne.s16.totalorder %v2871_v9, 0 }
 0x1dc   :  { %v1479_v62 = vsel %vm7656_vm14, 65537, %v7225_v14  ;;  %vm7657_vm3 = vmpackc.low %vm7540_vm8, %vm7540_vm8  ;;  %vm7661_vm14 = vnez %v7585_v29  ;;  %vm7664_vm8 = vcmp.ge.s32.totalorder %v7663_v55, 1  ;;  %v7667_v34 = vmov 0 }
 0x1dd   :  { %v1126_v4 = vsel %vm7657_vm3, 65537, %v7225_v14  ;;  %vm7659_vm6 = vmpackc.low %vm7658_vm2, %vm7658_vm2  ;;  %v7668_v34 = vsel %vm5287_vm7, 4294967295, %v7667_v34  ;;  %v2887_v31 = vcombine.low %v1478_v43, %v1479_v62  ;;  %vm7669_vm2 = vnez %v7593_v36  ;;  %v7676_v36 = vld [vmem:[#allocation38_spill] sm:$0xff] }
 0x1de   :  { %v1127_v53 = vsel %vm7659_vm6, 65537, %v7225_v14  ;;  %vm5283_vm3 = vmand %vm7664_vm8, %vm7662_vm4  ;;  %v939_v61 = vsel %vm7669_vm2, %v7624_v46, 0  ;;  %vm5294_vm6 = vcmp.ne.s16.totalorder %v2851_v1, 0  ;;  %vm7673_vm5 = vcmp.ge.s32.totalorder %v7672_v49, 1  ;;  %v7707_v1 = vld [vmem:[#allocation39_spill] sm:$0xff] }
 0x1df   :  { %v7666_v17 = vsel %vm5283_vm3, 4294967295, %v7665_v17  ;;  %vm5308_vm4 = vmand %vm7673_vm5, %vm5169_vm12  ;;  %v7674_v37 = vmov 0  ;;  %1556 = vrot.lane.b32.xlu1 %v939_v61, %s3114_s25  ;;  %v940_v25 = vsel %vm5227_vm1, %v7641_v42, 0  ;;  %vm7677_vm2 = vnez %v7490_v0  ;;  %v7701_v61 = vld [vmem:[#allocation45_spill] sm:$0xff]  ;;  %v7709_v46 = vld [vmem:[#allocation59_spill] sm:$0xff] }
 0x1e0   :  { %v7675_v37 = vsel %vm5308_vm4, 4294967295, %v7674_v37  ;;  %vm7678_vm5 = vmpackc.low %vm7677_vm2, %vm7677_vm2  ;;  %vm7681_vm7 = vcmp.le.s32.totalorder %v7528_v52, 6  ;;  %v7682_v42 = vmov 0  ;;  %vm5340_vm1 = vcmp.ne.s16.totalorder %v2887_v31, 0  ;;  %1558 = vrot.lane.b32.xlu0 %v940_v25, %s3114_s25  ;;  %v7703_v25 = vld [vmem:[#allocation27_spill] sm:$0xff] }
 0x1e1   :  { %v1244_v8 = vsel %vm7678_vm5, 65537, %v7225_v14  ;;  %vm7680_vm8 = vmpackc.low %vm7679_vm9, %vm7679_vm9  ;;  %v7684_v3 = vmov 0  ;;  %v2859_v0 = vcombine.low %v1126_v4, %v1127_v53  ;;  %vm7686_vm2 = vnez %v7504_v56  ;;  %v7752_v4 = vld [vmem:[#allocation40_spill] sm:$0xff] }
 0x1e2   :  { %v1245_v9 = vsel %vm7680_vm8, 65537, %v7225_v14  ;;  %vm5336_vm12 = vmand %vm7681_vm7, %vm7660_vm0  ;;  %v7685_v3 = vsel %vm5340_vm1, 4294967295, %v7684_v3  ;;  %vm7688_vm7 = vnez %v7507_v20  ;;  %vm7690_vm5 = vcmp.le.s32.totalorder %v7648_v15, 6 }
 0x1e3   :  { %v7683_v42 = vsel %vm5336_vm12, 4294967295, %v7682_v42  ;;  %vm7687_vm9 = vmpackc.low %vm7686_vm2, %vm7686_vm2  ;;  %v7691_v62 = vmov 0  ;;  %vm5368_vm2 = vcmp.ne.s16.totalorder %v2858_v59, 0  ;;  %v7695_v20 = vand.u32 7, %v7508_v30 }
 0x1e4   :  { %v1246_v40 = vsel %vm7687_vm9, 65537, %v7225_v14  ;;  %vm7689_vm8 = vmpackc.low %vm7688_vm7, %vm7688_vm7  ;;  %v7698_v31 = vand.u32 7, %v7544_v47  ;;  %v7699_v59 = vmov 0  ;;  %vm7702_vm1 = vnez %v7701_v61 }
 0x1e5   :  { %v1247_v43 = vsel %vm7689_vm8, 65537, %v7225_v14  ;;  %vm5361_vm13 = vmand %vm7690_vm5, %vm7661_vm14  ;;  %vm5380_vm8 = vcmp.ge.s32.totalorder %v7695_v20, 1  ;;  %vm7704_vm9 = vcmp.ge.s32.totalorder %v7703_v25, 1  ;;  %v7705_v56 = vmov 0  ;;  %v7708_v20 = vld [vmem:[#allocation36_spill] sm:$0xff] }
 0x1e6   :  { %v7692_v62 = vsel %vm5361_vm13, 4294967295, %v7691_v62  ;;  %vm5386_vm5 = vcmp.ge.s32.totalorder %v7698_v31, 1  ;;  %vm5394_vm11 = vmand %vm7704_vm9, %vm7702_vm1  ;;  %v7710_v15 = vpack.c.bf16 %v7708_v20, %v7709_v46  ;;  %vm7711_vm7 = vnez %v7653_v41  ;;  %v7723_v46 = vld [vmem:[#allocation65_spill] sm:$0xff] }
 0x1e7   :  { %v7700_v59 = vsel %vm5386_vm5, 4294967295, %v7699_v59  ;;  %v7706_v56 = vsel %vm5394_vm11, 4294967295, %v7705_v56  ;;  %v2866_v31 = vcombine.low %v1244_v8, %v1245_v9  ;;  %vm7712_vm15 = vnez %v7531_v10  ;;  %v7718_v10 = vld [vmem:[#allocation28_spill] sm:$0xff] }
 0x1e8   :  { %v1051_v47 = vsel %vm7711_vm7, %v7710_v15, 0  ;;  %vm7713_vm10 = vmpackc.low %vm7712_vm15, %vm7712_vm15  ;;  %vm7714_vm9 = vnez %v7535_v63  ;;  %v7716_v15 = vld [vmem:[#allocation46_spill] sm:$0xff]  ;;  %vm7719_vm15 = vcmp.ge.s32.totalorder %v7718_v10, 1  ;;  %v2867_v20 = vcombine.low %v1246_v40, %v1247_v43 }
 0x1e9   :  { %v896_v52 = vsel %vm7713_vm10, 65537, %v7225_v14  ;;  %vm7715_vm1 = vmpackc.low %vm7714_vm9, %vm7714_vm9  ;;  %vm7717_vm14 = vnez %v7716_v15  ;;  %1580 = vrot.lane.b32.xlu1 %v1051_v47, %s3110_s15  ;;  %v7722_v63 = vld [vmem:[#allocation66_spill] sm:$0xff]  ;;  %vm7729_vm11 = vnez %v7523_v26  ;;  %vm5457_vm4 = vcmp.ne.s16.totalorder %v2859_v0, 0 }
 0x1ea   :  { %v897_v30 = vsel %vm7715_vm1, 65537, %v7225_v14  ;;  %vm5426_vm10 = vmand %vm7719_vm15, %vm7717_vm14  ;;  %v7724_v8 = vpack.c.bf16 %v7722_v63, %v7723_v46  ;;  %vm7725_vm1 = vnez %v7543_v33  ;;  %vm7727_vm15 = vnez %v7573_v16 }
 0x1eb   :  { %vm7726_vm9 = vmpackc.low %vm7725_vm1, %vm7725_vm1  ;;  %vm7730_vm14 = vcmp.ge.s32.totalorder %v7484_v60, 1  ;;  %v7735_v40 = vand.u32 7, %v7676_v36  ;;  %v7736_v16 = vmov 0  ;;  %v2844_v26 = vcombine.low %v896_v52, %v897_v30  ;;  %v7746_v52 = vld [vmem:[#allocation60_spill] sm:$0xff] }
 0x1ec   :  { %v1052_v9 = vsel %vm5294_vm6, %v7724_v8, 0  ;;  %v1470_v38 = vsel %vm7726_vm9, 65537, %v7225_v14  ;;  %vm7728_vm7 = vmpackc.low %vm7727_vm15, %vm7727_vm15  ;;  %vm7739_vm9 = vcmp.ge.s32.totalorder %v7510_v5, 1  ;;  %v7742_v0 = vand.u32 7, %v7707_v1  ;;  %v3032_v5 = vld [vmem:[%s6874_s2 + $0x20] ss:$0 sps:$4 sm:$0xff]  }
 0x1ed   :  { %v1471_v47 = vsel %vm7728_vm7, 65537, %v7225_v14  ;;  %vm5452_vm6 = vmand %vm7730_vm14, %vm7729_vm11  ;;  %1582 = vrot.lane.b32.xlu0 %v1052_v9, %s3110_s15  ;;  %vm5463_vm1 = vcmp.ge.s32.totalorder %v7735_v40, 1  ;;  %vm7738_vm7 = vnez %v7525_v32  ;;  %v7743_v43 = vmov 0  ;;  %v7745_v32 = vld [vmem:[#allocation32_spill] sm:$0xff]  ;;  %v7748_v8 = vld [vmem:[#allocation21_spill] sm:$0xff] }
 0x1ee   :  { %v7737_v16 = vsel %vm5463_vm1, 4294967295, %v7736_v16  ;;  %vm5471_vm11 = vmand %vm7739_vm9, %vm7738_vm7  ;;  %vm5483_vm3 = vcmp.ge.s32.totalorder %v7742_v0, 1  ;;  %v7747_v30 = vpack.c.bf16 %v7745_v32, %v7746_v52  ;;  %v2883_v46 = vcombine.low %v1470_v38, %v1471_v47  ;;  %v7753_v47 = vld [vmem:[#allocation33_spill] sm:$0xff] }
 0x1ef   :  { %v7744_v43 = vsel %vm5483_vm3, 4294967295, %v7743_v43  ;;  %vm613_vm7 = vmpackc.low %vm5452_vm6, %vm5452_vm6  ;;  %v7749_v9 = vand.u32 7, %v7748_v8  ;;  %v7750_v12 = vmov 0  ;;  %v7754_v40 = vpack.c.bf16 %v7752_v4, %v7753_v47  ;;  %v7766_v8 = vld [vmem:[#allocation48_spill] sm:$0xff] }
 0x1f0   :  { %v1171_v63 = vsel %vm5368_vm2, %v7747_v30, 0  ;;  %vm614_vm14 = vmpackc.low %vm5471_vm11, %vm5471_vm11  ;;  %v629_v38 = vsel %vm613_vm7, 65537, %v7225_v14  ;;  %vm5520_vm2 = vcmp.ne.s16.totalorder %v2866_v31, 0  ;;  %vm5524_vm15 = vcmp.ne.s16.totalorder %v2867_v20, 0  ;;  %v7759_v30 = vld [vmem:[#allocation47_spill] sm:$0xff] }
 0x1f1   :  { %vm5506_vm6 = vcmp.ge.s32.totalorder %v7749_v9, 1  ;;  %1628 = vrot.lane.b32.xlu1 %v1171_v63, %s3111_s16  ;;  %v1172_v0 = vsel %vm5457_vm4, %v7754_v40, 0  ;;  %v630_v60 = vsel %vm614_vm14, 65537, %v7225_v14  ;;  %vm7760_vm11 = vcmp.ge.s32.totalorder %v7759_v30, 1  ;;  %vm7763_vm4 = vmpackc.low %vm7660_vm0, %vm7660_vm0  ;;  %v7786_v63 = vld [vmem:[#allocation54_spill] sm:$0xff] }
 0x1f2   :  { %v7751_v12 = vsel %vm5506_vm6, 4294967295, %v7750_v12  ;;  %vm5533_vm7 = vmand %vm7760_vm11, %vm5463_vm1  ;;  %1630 = vrot.lane.b32.xlu0 %v1172_v0, %s3111_s16  ;;  %v1008_v31 = vsel %vm7763_vm4, 65537, %v7225_v14  ;;  %vm7764_vm14 = vnez %v7585_v29  ;;  %v2831_v33 = vcombine.low %v629_v38, %v630_v60 }
 0x1f3   :  { %vm7765_vm9 = vmpackc.low %vm7764_vm14, %vm7764_vm14  ;;  %vm7767_vm11 = vcmp.ge.s32.totalorder %v7766_v8, 1  ;;  %vm5558_vm12 = vcmp.ne.s16.totalorder %v2844_v26, 0  ;;  %vm7772_vm4 = vnez %v7640_v48  ;;  %vm7774_vm14 = vnez %v7651_v7  ;;  %v7779_v26 = vld [vmem:[#allocation67_spill] sm:$0xff] }
 0x1f4   :  { %v1009_v20 = vsel %vm7765_vm9, 65537, %v7225_v14  ;;  %vm5554_vm1 = vmand %vm7767_vm11, %vm5483_vm3  ;;  %vm7776_vm13 = vnez %v7706_v56  ;;  %v1291_v7 = vsel %vm5520_vm2, %v7779_v26, 0  ;;  %vm7792_vm3 = vnez %v7666_v17  ;;  %v7800_v17 = vld [vmem:[#allocation71_spill] sm:$0xff] }
 0x1f5   :  { %vm7773_vm9 = vmpackc.low %vm7772_vm4, %vm7772_vm4  ;;  %1652 = vrot.lane.b32.xlu1 %v1291_v7, %s3112_s21  ;;  %v2852_v32 = vcombine.low %v1008_v31, %v1009_v20  ;;  %v7798_v7 = vmov 0 }
 0x1f6   :  { %v1472_v38 = vsel %vm7773_vm9, 65537, %v7225_v14  ;;  %vm7775_vm11 = vmpackc.low %vm7774_vm14, %vm7774_vm14  ;;  %vm7777_vm9 = vcmask 1043456   ;;  %vm5588_vm14 = vcmp.ne.s16.totalorder %v2883_v46, 0 }
 0x1f7   :  { %v1473_v47 = vsel %vm7775_vm11, 65537, %v7225_v14  ;;  %vm615_vm4 = vmpackc.low %vm5533_vm7, %vm5533_vm7  ;;  %3010 = vmatprep.subr.msk.bf16.mxu1 %vm7777_vm9, %v3032_v5  ;;  %vm5592_vm11 = vcmp.ne.s16.totalorder %v2831_v33, 0 }
 0x1f8   :  { %vm7778_vm5 = vmmov %vm7777_vm9  ;;  %v631_v60 = vsel %vm615_vm4, 65537, %v7225_v14  ;;  %v671_v33 = vsel %vm5592_vm11, %v7786_v63, 0  ;;  %vm7789_vm4 = vnez %v7646_v24  ;;  %vm7814_vm11 = vnez %v7692_v62 }
 0x1f9   :  { %v1902_v48 = vsel %vm7778_vm5, %v3032_v5, 0  ;;  %vm616_vm7 = vmpackc.low %vm5554_vm1, %vm5554_vm1  ;;  %v7784_v5 = vld [vmem:[#allocation70_spill] sm:$0xff]  ;;  %vm7785_vm5 = vnez %v7611_v13  ;;  %vm7787_vm1 = vnez %v7496_v22 }
 0x1fa   :  { %2971 = vmatpush3.bf16.msra.mxu1 %v1902_v48  ;;  %v1292_v46 = vsel %vm5524_vm15, %v7784_v5, 0  ;;  %v632_v9 = vsel %vm616_vm7, 65537, %v7225_v14  ;;  %v2884_v48 = vcombine.low %v1472_v38, %v1473_v47  ;;  %vm7788_vm15 = vmpackc.low %vm7787_vm1, %vm7787_vm1  ;;  %vm7794_vm1 = vnez %v7675_v37  ;;  %v7796_v38 = vld [vmem:[#allocation22_spill] sm:$0xff] }
 0x1fb   :  { %1654 = vrot.lane.b32.xlu0 %v1292_v46, %s3112_s21  ;;  %v1128_v52 = vsel %vm7788_vm15, 65537, %v7225_v14  ;;  %vm7790_vm9 = vmpackc.low %vm7789_vm4, %vm7789_vm4  ;;  %v2832_v20 = vcombine.low %v631_v60, %v632_v9  ;;  %v7797_v47 = vand.u32 7, %v7796_v38  ;;  %v941_v60 = vsel %vm5558_vm12, %v7800_v17, 0 }
 0x1fc   :  { %v1129_v31 = vsel %vm7790_vm9, 65537, %v7225_v14  ;;  %vm7793_vm0 = vmpackc.low %vm7792_vm3, %vm7792_vm3  ;;  %1560 = vrot.lane.b32.xlu1 %v941_v60, %s3114_s25  ;;  %v1516_v9 = vsel %vm5588_vm14, %v7800_v17, 0  ;;  %vm7806_vm12 = vnez %v7700_v59  ;;  %vm7807_vm9 = vcmp.le.s32.totalorder %v7672_v49, 6  ;;  %v7821_v17 = vld [vmem:[#allocation76_spill] sm:$0xff] }
 0x1fd   :  { %v898_v22 = vsel %vm7793_vm0, 65537, %v7225_v14  ;;  %vm7795_vm15 = vmpackc.low %vm7794_vm1, %vm7794_vm1  ;;  %vm5641_vm4 = vcmp.ge.s32.totalorder %v7797_v47, 1  ;;  %vm7801_vm0 = vcmp.le.s32.totalorder %v7663_v55, 6  ;;  %vm5659_vm1 = vcmp.ne.s16.totalorder %v2832_v20, 0 }
 0x1fe   :  { %v899_v24 = vsel %vm7795_vm15, 65537, %v7225_v14  ;;  %v7799_v7 = vsel %vm5641_vm4, 4294967295, %v7798_v7  ;;  %vm5655_vm3 = vmand %vm7801_vm0, %vm5380_vm8  ;;  %vm1045_vm15 = vcmp.ne.s16.totalorder %v2852_v32, 0  ;;  %v2860_v4 = vcombine.low %v1128_v52, %v1129_v31  ;;  %v7819_v31 = vld [vmem:[#allocation68_spill] sm:$0xff] }
 0x1ff   :  { %vm5671_vm0 = vmand %vm7807_vm9, %vm7806_vm12  ;;  %v672_v20 = vsel %vm5659_vm1, %v5191_v21, 0  ;;  %1702 = vrot.lane.b32.xlu0 %v1516_v9, %s3113_s24  ;;  %vm5679_vm7 = vcmp.ne.s16.totalorder %v2884_v48, 0  ;;  %v2845_v40 = vcombine.low %v898_v22, %v899_v24  ;;  %vm7812_vm14 = vnez %v7683_v42  ;;  %v7818_v48 = vld [vmem:[#allocation72_spill] sm:$0xff] }
 0x200   :  { %vm7813_vm9 = vmpackc.low %vm7812_vm14, %vm7812_vm14  ;;  %v7820_v22 = vpack.c.bf16 %v7818_v48, %v7819_v31  ;;  %v1517_v60 = vsel %vm5679_vm7, %v7821_v17, 0  ;;  %v7851_v37 = vand.u32 7, %v7676_v36  ;;  %v7859_v36 = vand.u32 7, %v7707_v1 }
 0x201   :  { %v1248_v32 = vsel %vm7813_vm9, 65537, %v7225_v14  ;;  %vm7815_vm1 = vmpackc.low %vm7814_vm11, %vm7814_vm11  ;;  %vm7822_vm9 = vnez %v7701_v61  ;;  %vm5727_vm11 = vcmp.ne.s16.totalorder %v2845_v40, 0 }
 0x202   :  { %v1249_v52 = vsel %vm7815_vm1, 65537, %v7225_v14  ;;  %vm997_vm6 = vmpackc.low %vm5641_vm4, %vm5641_vm4  ;;  %v1053_v24 = vsel %vm1045_vm15, %v7820_v22, 0  ;;  %v942_v22 = vsel %vm5727_vm11, %v7821_v17, 0  ;;  %vm7842_vm11 = vcmp.le.s32.totalorder %v7703_v25, 6 }
 0x203   :  { %vm7816_vm2 = vmpackc.low %vm5380_vm8, %vm5380_vm8  ;;  %1584 = vrot.lane.b32.xlu1 %v1053_v24, %s3110_s15  ;;  %v2868_v9 = vcombine.low %v1248_v32, %v1249_v52  ;;  %1704 = vrot.lane.b32.xlu0 %v1517_v60, %s3113_s24  ;;  %v7834_v32 = vld [vmem:[#allocation74_spill] sm:$0xff]  ;;  %v7835_v52 = vld [vmem:[#allocation69_spill] sm:$0xff]  ;;  %v1013_v17 = vsel %vm997_vm6, 65537, %v7225_v14 }
 0x204   :  { %v1010_v42 = vsel %vm7816_vm2, 65537, %v7225_v14  ;;  %vm7817_vm14 = vmpackc.low %vm7806_vm12, %vm7806_vm12  ;;  %vm1165_vm2 = vcmp.ne.s16.totalorder %v2860_v4, 0 }
 0x205   :  { %v1011_v62 = vsel %vm7817_vm14, 65537, %v7225_v14  ;;  %vm7825_vm15 = vmpackc.low %vm7776_vm13, %vm7776_vm13  ;;  %vm7827_vm14 = vcmp.le.s32.totalorder %v7663_v55, 6 }
 0x206   :  { %v2853_v31 = vcombine.low %v1010_v42, %v1011_v62  ;;  %v900_v47 = vsel %vm7825_vm15, 65537, %v7225_v14  ;;  %vm7826_vm7 = vmpackc.low %vm5426_vm10, %vm5426_vm10  ;;  %vm7831_vm15 = vnez %v7632_v18  ;;  %v7836_v42 = vpack.c.bf16 %v7834_v32, %v7835_v52  ;;  %v7855_v32 = vld [vmem:[#allocation75_spill] sm:$0xff] }
 0x207   :  { %v901_v4 = vsel %vm7826_vm7, 65537, %v7225_v14  ;;  %vm5747_vm1 = vmand %vm7827_vm14, %vm7785_vm5  ;;  %vm7833_vm7 = vnez %v7716_v15  ;;  %1562 = vrot.lane.b32.xlu0 %v942_v22, %s3114_s25  ;;  %v7882_v15 = vld [vmem:[#allocation55_spill] sm:$0xff] }
 0x208   :  { %vm7830_vm13 = vmpackc.low %vm7785_vm5, %vm7785_vm5  ;;  %v1173_v62 = vsel %vm1165_vm2, %v7836_v42, 0  ;;  %vm7837_vm5 = vcmp.le.s32.totalorder %v7672_v49, 6  ;;  %v2846_v24 = vcombine.low %v900_v47, %v901_v4  ;;  %vm1046_vm14 = vcmp.ne.s16.totalorder %v2853_v31, 0  ;;  %v7850_v4 = vld [vmem:[#allocation42_spill] sm:$0xff] }
 0x209   :  { %v1130_v56 = vsel %vm7830_vm13, 65537, %v7225_v14  ;;  %vm7832_vm10 = vmpackc.low %vm7831_vm15, %vm7831_vm15  ;;  %1632 = vrot.lane.b32.xlu1 %v1173_v62, %s3111_s16  ;;  %v7876_v62 = vld [vmem:[#allocation9_spill] sm:$0xff] }
 0x20a   :  { %v1131_v41 = vsel %vm7832_vm10, 65537, %v7225_v14  ;;  %vm5773_vm13 = vmand %vm7837_vm5, %vm7831_vm15  ;;  %vm1285_vm10 = vcmp.ne.s16.totalorder %v2868_v9, 0  ;;  %vm7840_vm15 = vnez %v7751_v12 }
 0x20b   :  { %v2861_v18 = vcombine.low %v1130_v56, %v1131_v41  ;;  %vm7841_vm5 = vmpackc.low %vm7840_vm15, %vm7840_vm15  ;;  %v1293_v56 = vsel %vm1285_vm10, %v7850_v4, 0  ;;  %v7854_v41 = vld [vmem:[#allocation44_spill] sm:$0xff]  ;;  %vm5848_vm10 = vcmp.le.s32.totalorder %v7859_v36, 6 }
 0x20c   :  { %v1012_v60 = vsel %vm7841_vm5, 65537, %v7225_v14  ;;  %vm5801_vm2 = vmand %vm7842_vm11, %vm7840_vm15  ;;  %vm7847_vm11 = vcmp.le.s32.totalorder %v7718_v10, 6  ;;  %v7856_v52 = vpack.c.bf16 %v7854_v41, %v7855_v32 }
 0x20d   :  { %vm7845_vm5 = vmpackc.low %vm5655_vm3, %vm5655_vm3  ;;  %1656 = vrot.lane.b32.xlu1 %v1293_v56, %s3112_s21  ;;  %v2854_v22 = vcombine.low %v1012_v60, %v1013_v17  ;;  %v7868_v60 = vld [vmem:[#allocation25_spill] sm:$0xff] }
 0x20e   :  { %v1250_v48 = vsel %vm7845_vm5, 65537, %v7225_v14  ;;  %vm7846_vm6 = vmpackc.low %vm5671_vm0, %vm5671_vm0  ;;  %vm5831_vm5 = vcmp.le.s32.totalorder %v7851_v37, 6  ;;  %v1054_v42 = vsel %vm1046_vm14, %v7856_v52, 0  ;;  %vm5839_vm0 = vcmp.ne.s16.totalorder %v2846_v24, 0 }
 0x20f   :  { %v1251_v31 = vsel %vm7846_vm6, 65537, %v7225_v14  ;;  %vm5821_vm15 = vmand %vm7847_vm11, %vm5641_vm4  ;;  %1586 = vrot.lane.b32.xlu0 %v1054_v42, %s3110_s15  ;;  %vm1166_vm6 = vcmp.ne.s16.totalorder %v2861_v18, 0  ;;  %v943_v17 = vsel %vm5839_vm0, %v7868_v60, 0 }
 0x210   :  { %vm1459_vm3 = vmpackc.low %vm5773_vm13, %vm5773_vm13  ;;  %v2869_v56 = vcombine.low %v1250_v48, %v1251_v31  ;;  %v7872_v48 = vld [vmem:[#allocation23_spill] sm:$0xff]  ;;  %v7873_v31 = vld [vmem:[#allocation73_spill] sm:$0xff] }
 0x211   :  { %vm7862_vm14 = vmpackc.low %vm7822_vm9, %vm7822_vm9  ;;  %v1475_v18 = vsel %vm1459_vm3, 65537, %v7225_v14  ;;  %vm7865_vm9 = vcmp.ge.s32.totalorder %v7759_v30, 1  ;;  %1564 = vrot.lane.b32.xlu1 %v943_v17, %s3114_s25  ;;  %v7874_v47 = vpack.c.bf16 %v7872_v48, %v7873_v31  ;;  %v7883_v17 = vld [vmem:[#allocation17_spill] sm:$0xff] }
 0x212   :  { %v1132_v24 = vsel %vm7862_vm14, 65537, %v7225_v14  ;;  %vm7863_vm11 = vmpackc.low %vm7833_vm7, %vm7833_vm7  ;;  %vm7869_vm7 = vcmp.ge.s32.totalorder %v7766_v8, 1  ;;  %v7884_v40 = vpack.c.bf16 %v7882_v15, %v7883_v17  ;;  %v7902_v15 = vpack.c.bf16 %v7612_v6, %v4919_v58 }
 0x213   :  { %v1133_v1 = vsel %vm7863_vm11, 65537, %v7225_v14  ;;  %vm1237_vm13 = vmpackc.low %vm5821_vm15, %vm5821_vm15  ;;  %v1174_v37 = vsel %vm1166_vm6, %v7874_v47, 0  ;;  %vm1286_vm15 = vcmp.ne.s16.totalorder %v2869_v56, 0  ;;  %vm7880_vm11 = vnez %v7737_v16 }
 0x214   :  { %vm7864_vm4 = vmpackc.low %vm5747_vm1, %vm5747_vm1  ;;  %v2862_v41 = vcombine.low %v1132_v24, %v1133_v1  ;;  %1634 = vrot.lane.b32.xlu0 %v1174_v37, %s3111_s16  ;;  %v1253_v42 = vsel %vm1237_vm13, 65537, %v7225_v14  ;;  %v7879_v24 = vld [vmem:[#allocation10_spill] sm:$0xff] }
 0x215   :  { %v1474_v61 = vsel %vm7864_vm4, 65537, %v7225_v14  ;;  %vm5879_vm14 = vmand %vm7865_vm9, %vm5831_vm5  ;;  %vm1047_vm4 = vcmp.ne.s16.totalorder %v2854_v22, 0  ;;  %v7877_v22 = vld [vmem:[#allocation77_spill] sm:$0xff]  ;;  %v1294_v9 = vsel %vm1286_vm15, %v7879_v24, 0 }
 0x216   :  { %vm5890_vm1 = vmand %vm7869_vm7, %vm5848_vm10  ;;  %v2885_v32 = vcombine.low %v1474_v61, %v1475_v18  ;;  %v7878_v36 = vpack.c.bf16 %v7876_v62, %v7877_v22 }
 0x217   :  { %vm7875_vm3 = vmpackc.low %vm5801_vm2, %vm5801_vm2  ;;  %vm1167_vm2 = vcmp.ne.s16.totalorder %v2862_v41, 0 }
 0x218   :  { %v1252_v52 = vsel %vm7875_vm3, 65537, %v7225_v14  ;;  %vm888_vm0 = vmpackc.low %vm5879_vm14, %vm5879_vm14  ;;  %v1055_v56 = vsel %vm1047_vm4, %v7878_v36, 0  ;;  %1658 = vrot.lane.b32.xlu0 %v1294_v9, %s3112_s21  ;;  %vm1510_vm13 = vcmp.ne.s16.totalorder %v2885_v32, 0  ;;  %vm7881_vm14 = vnez %v7744_v43  ;;  %v7911_v36 = vld [vmem:[#allocation37_spill] sm:$0xff] }
 0x219   :  { %vm889_vm6 = vmpackc.low %vm5890_vm1, %vm5890_vm1  ;;  %1588 = vrot.lane.b32.xlu1 %v1055_v56, %s3110_s15  ;;  %v2870_v1 = vcombine.low %v1252_v52, %v1253_v42  ;;  %v904_v61 = vsel %vm888_vm0, 65537, %v7225_v14  ;;  %v1175_v48 = vsel %vm1167_vm2, %v7884_v40, 0  ;;  %v1518_v31 = vsel %vm1510_vm13, %v7868_v60, 0 }
 0x21a   :  { %v905_v18 = vsel %vm889_vm6, 65537, %v7225_v14  ;;  %vm1000_vm9 = vmpackc.low %vm7880_vm11, %vm7880_vm11  ;;  %vm7885_vm3 = vcmp.le.s32.totalorder %v7759_v30, 6  ;;  %vm7888_vm6 = vcmp.le.s32.totalorder %v7766_v8, 6  ;;  %v7901_v8 = vpack.c.bf16 %v5041_v35, %v5045_v23 }
 0x21b   :  { %vm1001_vm7 = vmpackc.low %vm7881_vm14, %vm7881_vm14  ;;  %vm1287_vm4 = vcmp.ne.s16.totalorder %v2870_v1, 0  ;;  %v2848_v47 = vcombine.low %v904_v61, %v905_v18  ;;  %v1016_v37 = vsel %vm1000_vm9, 65537, %v7225_v14  ;;  %vm7891_vm9 = vnez %v7561_v39  ;;  %v6015_v61 = vpop.permute.xlu1 %1604  ;;  %v6017_v18 = vpop.permute.xlu0 %1602  ;;  %v7907_v39 = vld [vmem:[#allocation34_spill] sm:$0xff] }
 0x21c   :  { %vm1120_vm1 = vmpackc.low %vm5831_vm5, %vm5831_vm5  ;;  %1706 = vrot.lane.b32.xlu0 %v1518_v31, %s3113_s24  ;;  %v1017_v41 = vsel %vm1001_vm7, 65537, %v7225_v14  ;;  %v1295_v52 = vsel %vm1287_vm4, %v7786_v63, 0  ;;  %v7892_v43 = vsel %vm7891_vm9, %v4861_v28, 0  ;;  %vm7905_vm9 = vnez %v7685_v3 }
 0x21d   :  { %1636 = vrot.lane.b32.xlu1 %v1175_v48, %s3111_s16  ;;  %vm1121_vm15 = vmpackc.low %vm5848_vm10, %vm5848_vm10  ;;  %vm937_vm13 = vcmp.ne.s16.totalorder %v2848_v47, 0  ;;  %v2856_v16 = vcombine.low %v1016_v37, %v1017_v41  ;;  %v1136_v42 = vsel %vm1120_vm1, 65537, %v7225_v14  ;;  %v7906_v31 = vsel %vm7905_vm9, %v4938_v11, 0 }
 0x21e   :  { %vm5944_vm0 = vmand %vm7885_vm3, %vm7880_vm11  ;;  %v1137_v62 = vsel %vm1121_vm15, 65537, %v7225_v14  ;;  %v945_v22 = vsel %vm937_vm13, %v4938_v11, 0 }
 0x21f   :  { %vm5952_vm2 = vmand %vm7888_vm6, %vm7881_vm14  ;;  %vm1049_vm15 = vcmp.ne.s16.totalorder %v2856_v16, 0  ;;  %v2864_v38 = vcombine.low %v1136_v42, %v1137_v62  ;;  %v6027_v17 = vpop.permute.xlu0 %1606 }
 0x220   :  { %vm1240_vm11 = vmpackc.low %vm5944_vm0, %vm5944_vm0  ;;  %1708 = vrot.lane.b32.xlu0 %v7892_v43, %s3113_s24  ;;  %v1057_v9 = vsel %vm1049_vm15, %v7901_v8, 0 }
 0x221   :  { %1660 = vrot.lane.b32.xlu1 %v1295_v52, %s3112_s21  ;;  %vm1241_vm14 = vmpackc.low %vm5952_vm2, %vm5952_vm2  ;;  %v1256_v56 = vsel %vm1240_vm11, 65537, %v7225_v14  ;;  %vm7903_vm11 = vnez %v7668_v34 }
 0x222   :  { %vm7893_vm7 = vmmov %vm7885_vm3  ;;  %v1257_v13 = vsel %vm1241_vm14, 65537, %v7225_v14  ;;  %v7904_v58 = vsel %vm7903_vm11, %v5191_v21, 0  ;;  %vm7908_vm14 = vnez %v7907_v39  ;;  %vm7921_vm11 = vcmp.ge.s32.totalorder %v7426_v45, 1 }
 0x223   :  { %vm5980_vm4 = vmand %vm7893_vm7, %vm5831_vm5  ;;  %vm7899_vm5 = vnez %v7595_v50  ;;  %v6038_v48 = vpop.permute.xlu0 %1610 }
 0x224   :  { %vm7896_vm1 = vmmov %vm7888_vm6  ;;  %v7900_v30 = vsel %vm7899_vm5, %v4861_v28, 0  ;;  %vm1169_vm6 = vcmp.ne.s16.totalorder %v2864_v38, 0  ;;  %v2872_v28 = vcombine.low %v1256_v56, %v1257_v13  ;;  %v7913_v38 = vld [vmem:[#allocation14_spill] sm:$0xff]  ;;  %v7916_v13 = vld [vmem:[#allocation16_spill] sm:$0xff] }
 0x225   :  { %vm5989_vm3 = vmand %vm7896_vm1, %vm5848_vm10  ;;  %1568 = vrot.lane.b32.xlu1 %v945_v22, %s3114_s25  ;;  %1566 = vrot.lane.b32.xlu0 %v7900_v30, %s3114_s25  ;;  %v1177_v35 = vsel %vm1169_vm6, %v7902_v15, 0  ;;  %v7909_v22 = vld [vmem:[#allocation13_spill] sm:$0xff]  ;;  %vm7912_vm1 = vnez %v7911_v36  ;;  %vm7917_vm6 = vcmp.ge.s32.totalorder %v7916_v13, 1  ;;  %v7926_v15 = vld [vmem:[#allocation11_spill] sm:$0xff] }
 0x226   :  { %vm1464_vm10 = vmpackc.low %vm5980_vm4, %vm5980_vm4  ;;  %vm1289_vm2 = vcmp.ne.s16.totalorder %v2872_v28, 0  ;;  %vm7910_vm7 = vcmp.ge.s32.totalorder %v7909_v22, 1 }
 0x227   :  { %vm1465_vm0 = vmpackc.low %vm5989_vm3, %vm5989_vm3  ;;  %v1480_v50 = vsel %vm1464_vm10, 65537, %v7225_v14  ;;  %v1297_v40 = vsel %vm1289_vm2, %v5153_v51, 0  ;;  %v6049_v34 = vpop.permute.xlu0 %1614  ;;  %vm7914_vm3 = vcmp.ge.s32.totalorder %v7913_v38, 1 }
 0x228   :  { %v1481_v1 = vsel %vm1465_vm0, 65537, %v7225_v14  ;;  %vm545_vm4 = vmand %vm7910_vm7, %vm7908_vm14  ;;  %vm7915_vm0 = vnez %v7473_v54  ;;  %v7924_v54 = vld [vmem:[#allocation41_spill] sm:$0xff]  ;;  %vm7927_vm7 = vcmp.ge.s32.totalorder %v7926_v15, 1  ;;  %v7937_v15 = vld [vmem:[#allocation62_spill] sm:$0xff] }
 0x229   :  { %1592 = vrot.lane.b32.xlu1 %v1057_v9, %s3110_s15  ;;  %1590 = vrot.lane.b32.xlu0 %v5173_v27, %s3110_s15  ;;  %v2888_v23 = vcombine.low %v1480_v50, %v1481_v1  ;;  %v6025_v27 = vpop.permute.xlu1 %1608  ;;  %vm546_vm15 = vmand %vm7914_vm3, %vm7912_vm1  ;;  %vm7925_vm14 = vnez %v7924_v54  ;;  %vm7929_vm3 = vcmask 64512  }
 0x22a   :  { %vm601_vm5 = vmpackc.low %vm545_vm4, %vm545_vm4 }
 0x22b   :  { %vm1513_vm13 = vcmp.ne.s16.totalorder %v2888_v23, 0  ;;  %v1531_v41 = vpop.permute.xlu0 %1530  ;;  %vm602_vm10 = vmpackc.low %vm546_vm15, %vm546_vm15  ;;  %v617_v50 = vsel %vm601_vm5, 65537, %v7225_v14  ;;  %v7932_v23 = vld [vmem:[#allocation12_spill] sm:$0xff] }
 0x22c   :  { %vm6085_vm2 = vmand %vm7917_vm6, %vm7915_vm0  ;;  %v618_v1 = vsel %vm602_vm10, 65537, %v7225_v14  ;;  %vm7933_vm0 = vcmp.ge.s32.totalorder %v7932_v23, 1 }
 0x22d   :  { %1640 = vrot.lane.b32.xlu1 %v1177_v35, %s3111_s16  ;;  %1638 = vrot.lane.b32.xlu0 %v5239_v2, %s3111_s16  ;;  %v6036_v6 = vpop.permute.xlu1 %1612  ;;  %v1521_v2 = vsel %vm1513_vm13, %v7636_v19, 0  ;;  %vm7920_vm13 = vnez %v7476_v44  ;;  %vm547_vm4 = vmand %vm7927_vm7, %vm7925_vm14  ;;  %v7930_v35 = vld [vmem:[#allocation43_spill] sm:$0xff] }
 0x22e   :  { %vm6093_vm9 = vmand %vm7921_vm11, %vm7920_vm13  ;;  %vm7931_vm15 = vnez %v7930_v35  ;;  %vm7120_vm11 = vcmask 588800  }
 0x22f   :  { %v6055_v60 = vpop.permute.xlu0 %1532  ;;  %vm548_vm5 = vmand %vm7933_vm0, %vm7931_vm15  ;;  %vm1805_vm15 = vcmask 392192  }
 0x230   :  { %vm605_vm10 = vmpackc.low %vm6085_vm2, %vm6085_vm2  ;;  %vm1738_vm2 = vcmask 130048  }
 0x231   :  { %1664 = vrot.lane.b32.xlu1 %v1297_v40, %s3112_s21  ;;  %1662 = vrot.lane.b32.xlu0 %v7904_v58, %s3112_s21  ;;  %v6047_v47 = vpop.permute.xlu1 %1616  ;;  %v2825_v40 = vcombine.low %v617_v50, %v618_v1  ;;  %vm603_vm6 = vmpackc.low %vm547_vm4, %vm547_vm4  ;;  %v621_v39 = vsel %vm605_vm10, 65537, %v7225_v14  ;;  %vm1755_vm4 = vcmask 195584   ;;  %vm1822_vm10 = vcmask 457728  }
 0x232   :  { %vm604_vm13 = vmpackc.low %vm548_vm5, %vm548_vm5  ;;  %vm7936_vm5 = vcmask 261120  }
 0x233   :  { %v1675_v52 = vpop.permute.xlu0 %1674  ;;  %vm7935_vm14 = vmmov %vm7929_vm3  ;;  %vm657_vm1 = vcmp.ne.s16.totalorder %v2825_v40, 0 }
 0x234   :  { %vm606_vm7 = vmpackc.low %vm6093_vm9, %vm6093_vm9  ;;  %vm1788_vm9 = vcmask 326656  }
 0x235   :  { %1712 = vrot.lane.b32.xlu1 %v1521_v2, %s3113_s24  ;;  %1710 = vrot.lane.b32.xlu0 %v7906_v31, %s3113_s24  ;;  %v6051_v37 = vpop.permute.xlu1 %1676  ;;  %v620_v2 = vsel %vm604_vm13, 65537, %v7225_v14  ;;  %v622_v46 = vsel %vm606_vm7, 65537, %v7225_v14  ;;  %vm1839_vm13 = vcmask 523264   ;;  %vm7939_vm7 = vmmov %vm7929_vm3 }
 0x236   :  { %v2827_v38 = vcombine.low %v621_v39, %v622_v46 }
 0x237   :  { %v6061_v3 = vpop.permute.xlu0 %1678 }
 0x239   :  { %v6053_v32 = vpop.permute.xlu1 %1534 }
 0x23b   :  { %v6065_v43 = vpop.permute.xlu0 %1682 }
 0x23d   :  { %v6057_v19 = vpop.permute.xlu1 %1536 }
 0x23f   :  { %v6069_v62 = vpop.permute.xlu0 %1686 }
 0x241   :  { %v6059_v16 = vpop.permute.xlu1 %1680 }
 0x243   :  { %v1579_v56 = vpop.permute.xlu0 %1578 }
 0x245   :  { %v6063_v11 = vpop.permute.xlu1 %1538 }
 0x247   :  { %v1627_v44 = vpop.permute.xlu0 %1626 }
 0x249   :  { %v6067_v42 = vpop.permute.xlu1 %1540 }
 0x24b   :  { %v1651_v63 = vpop.permute.xlu0 %1650 }
 0x24d   :  { %v6079_v30 = vpop.permute.xlu1 %1684 }
 0x24f   :  { %v1699_v21 = vpop.permute.xlu0 %1698 }
 0x251   :  { %v1543_v28 = vpop.permute.xlu1 %1542 }
 0x252   :  { %v6108_v45 = vsel %vm7929_vm3, %v671_v33, %v1543_v28  ;;  %v619_v33 = vsel %vm603_vm6, 65537, %v7225_v14  ;;  %vm659_vm6 = vcmp.ne.s16.totalorder %v2827_v38, 0 }
 0x253   :  { %v2826_v22 = vcombine.low %v619_v33, %v620_v2  ;;  %v1701_v9 = vpop.permute.xlu0 %1700 }
 0x255   :  { %v1545_v58 = vpop.permute.xlu1 %1544  ;;  %vm658_vm0 = vcmp.ne.s16.totalorder %v2826_v22, 0 }
 0x256   :  { %v6122_v0 = vsel %vm7935_vm14, %v672_v20, %v1545_v58  ;;  %v665_v20 = vsel %vm657_vm1, %v5153_v51, 0  ;;  %v666_v35 = vsel %vm658_vm0, %v7937_v15, 0  ;;  %vm7938_vm14 = vmmov %vm7929_vm3  ;;  %vm7940_vm1 = vnez %v7582_v57  ;;  %v7941_v58 = vld [vmem:[#allocation18_spill] sm:$0xff] }
 0x257   :  { %v1716_v36 = vsel %vm7929_vm3, %v665_v20, %v1531_v41  ;;  %v1559_v41 = vpop.permute.xlu0 %1558  ;;  %v1719_v40 = vsel %vm7938_vm14, %v666_v35, %v6055_v60  ;;  %vm7942_vm3 = vcmp.ge.s32.totalorder %v7941_v58, 1  ;;  %vm7945_vm0 = vnez %v7585_v29 }
 0x259   :  { %v6129_v31 = vpop.permute.xlu1 %1688 }
 0x25d   :  { %v1555_v13 = vpop.permute.xlu1 %1554 }
 0x25e   :  { %v1740_v8 = vsel %vm1738_vm2, %v1716_v36, %v1555_v13 }
 0x25f   :  { %v1757_v28 = vsel %vm1755_vm4, %v1740_v8, %v1579_v56  ;;  %v667_v56 = vsel %vm659_vm6, %v7779_v26, 0  ;;  %v7946_v26 = vld [vmem:[#allocation20_spill] sm:$0xff]  ;;  %v1583_v60 = vpop.permute.xlu0 %1582 }
 0x260   :  { %v1773_v50 = vsel %vm7936_vm5, %v1757_v28, %v6017_v18  ;;  %vm6153_vm5 = vmand %vm7942_vm3, %vm7940_vm1  ;;  %vm7947_vm6 = vcmp.ge.s32.totalorder %v7946_v26, 1 }
 0x261   :  { %v1790_v51 = vsel %vm1788_vm9, %v1773_v50, %v1627_v44  ;;  %v1557_v1 = vpop.permute.xlu1 %1556  ;;  %v1722_v44 = vsel %vm7939_vm7, %v667_v56, %v6053_v32  ;;  %vm552_vm14 = vmand %vm7947_vm6, %vm7945_vm0  ;;  %vm7948_vm7 = vcmask 261120   ;;  %vm7950_vm0 = vcmp.ge.s32.totalorder %v7663_v55, 1 }
 0x262   :  { %v1807_v54 = vsel %vm1805_vm15, %v1790_v51, %v1651_v63  ;;  %v1744_v32 = vsel %vm1738_vm2, %v1722_v44, %v1559_v41  ;;  %vm607_vm1 = vmpackc.low %vm6153_vm5, %vm6153_vm5 }
 0x263   :  { %v1824_v23 = vsel %vm1822_vm10, %v1807_v54, %v1675_v52  ;;  %v1742_v52 = vsel %vm1738_vm2, %v1719_v40, %v1557_v1  ;;  %v1761_v2 = vsel %vm1755_vm4, %v1744_v32, %v1583_v60  ;;  %vm7949_vm3 = vmmov %vm7948_vm7  ;;  %v623_v20 = vsel %vm607_vm1, 65537, %v7225_v14 }
 0x264   :  { %v1841_v18 = vsel %vm1839_vm13, %v1824_v23, %v1699_v21  ;;  %v1777_v29 = vsel %vm7949_vm3, %v1761_v2, %v6027_v17  ;;  %v1631_v21 = vpop.permute.xlu0 %1630  ;;  %vm6180_vm6 = vmand %vm7950_vm0, %vm5380_vm8  ;;  %vm7956_vm3 = vnez %v7751_v12  ;;  %vm7957_vm0 = vcmp.ge.s32.totalorder %v7703_v25, 1 }
 0x265   :  { %v1581_v33 = vpop.permute.xlu1 %1580  ;;  %2972 = vmatprep.mubr.msk.bf16.mxu1 %vm7120_vm11, %v1841_v18  ;;  %vm608_vm11 = vmpackc.low %vm552_vm14, %vm552_vm14  ;;  %v1794_v17 = vsel %vm1788_vm9, %v1777_v29, %v1631_v21  ;;  %vm7954_vm14 = vcmask 588800  }
 0x266   :  { %v1759_v57 = vsel %vm1755_vm4, %v1742_v52, %v1581_v33  ;;  %v624_v22 = vsel %vm608_vm11, 65537, %v7225_v14  ;;  %vm7953_vm11 = vcmp.ge.s32.totalorder %v7672_v49, 1  ;;  %vm609_vm8 = vmpackc.low %vm6180_vm6, %vm6180_vm6 }
 0x267   :  { %v1775_v39 = vsel %vm7948_vm7, %v1759_v57, %v6015_v61  ;;  %v2828_v28 = vcombine.low %v623_v20, %v624_v22  ;;  %vm554_vm5 = vmand %vm7953_vm11, %vm7806_vm12  ;;  %vm7958_vm11 = vnez %v7799_v7 }
 0x268   :  { %vm610_vm7 = vmpackc.low %vm554_vm5, %vm554_vm5  ;;  %vm7959_vm5 = vcmp.ge.s32.totalorder %v7718_v10, 1 }
 0x269   :  { %v1629_v46 = vpop.permute.xlu1 %1628  ;;  %vm660_vm12 = vcmp.ne.s16.totalorder %v2828_v28, 0  ;;  %vm7955_vm1 = vmmov %vm7954_vm14 }
 0x26a   :  { %v1792_v36 = vsel %vm1788_vm9, %v1775_v39, %v1629_v46  ;;  %vm555_vm6 = vmand %vm7957_vm0, %vm7956_vm3  ;;  %v668_v54 = vsel %vm660_vm12, %v7784_v5, 0  ;;  %vm7961_vm12 = vcmask 261120  }
 0x26d   :  { %v1653_v38 = vpop.permute.xlu1 %1652  ;;  %v1655_v8 = vpop.permute.xlu0 %1654 }
 0x26e   :  { %v1809_v13 = vsel %vm1805_vm15, %v1792_v36, %v1653_v38  ;;  %v1811_v55 = vsel %vm1805_vm15, %v1794_v17, %v1655_v8 }
 0x26f   :  { %v1826_v53 = vsel %vm1822_vm10, %v1809_v13, %v6051_v37  ;;  %v1828_v59 = vsel %vm1822_vm10, %v1811_v55, %v6061_v3  ;;  %v625_v37 = vsel %vm609_vm8, 65537, %v7225_v14  ;;  %vm611_vm8 = vmpackc.low %vm555_vm6, %vm555_vm6  ;;  %vm7963_vm6 = vcmask 588800  }
 0x270   :  { %v1843_v50 = vsel %vm1839_vm13, %v1826_v53, %v1701_v9  ;;  %v626_v9 = vsel %vm610_vm7, 65537, %v7225_v14  ;;  %v627_v5 = vsel %vm611_vm8, 65537, %v7225_v14  ;;  %vm7967_vm8 = vmmov %vm7963_vm6 }
 0x271   :  { %v1561_v51 = vpop.permute.xlu1 %1560  ;;  %2973 = vmatmul.mubr.msk.bf16.vlgmr.msra.gmra.mrb[12].mxu1 %vm7954_vm14, %v1843_v50  ;;  %v1703_v49 = vpop.permute.xlu0 %1702  ;;  %vm556_vm14 = vmand %vm7959_vm5, %vm7958_vm11  ;;  %v2829_v35 = vcombine.low %v625_v37, %v626_v9 }
 0x272   :  { %v1845_v1 = vsel %vm1839_vm13, %v1828_v59, %v1703_v49  ;;  %vm612_vm7 = vmpackc.low %vm556_vm14, %vm556_vm14 }
 0x273   :  { %2976 = vmatprep.mubr.msk.bf16.mxu1 %vm7955_vm1, %v1845_v1  ;;  %vm7960_vm1 = vcmask 64512   ;;  %vm661_vm3 = vcmp.ne.s16.totalorder %v2829_v35, 0  ;;  %v628_v7 = vsel %vm612_vm7, 65537, %v7225_v14  ;;  %vm7964_vm5 = vmmov %vm7961_vm12 }
 0x274   :  { %v1725_v15 = vsel %vm7960_vm1, %v668_v54, %v6057_v19  ;;  %v669_v58 = vsel %vm661_vm3, %v7850_v4, 0  ;;  %v2830_v63 = vcombine.low %v627_v5, %v628_v7  ;;  %vm7962_vm0 = vmmov %vm7960_vm1 }
 0x275   :  { %v1585_v41 = vpop.permute.xlu1 %1584  ;;  %v1705_v3 = vpop.permute.xlu0 %1704  ;;  %v1746_v23 = vsel %vm1738_vm2, %v1725_v15, %v1561_v51  ;;  %v1728_v33 = vsel %vm7962_vm0, %v669_v58, %v6063_v11  ;;  %vm7965_vm14 = vmmov %vm7962_vm0 }
 0x276   :  { %v1763_v25 = vsel %vm1755_vm4, %v1746_v23, %v1585_v41  ;;  %vm662_vm11 = vcmp.ne.s16.totalorder %v2830_v63, 0  ;;  %vm7966_vm1 = vmmov %vm7964_vm5 }
 0x277   :  { %v1779_v10 = vsel %vm7961_vm12, %v1763_v25, %v6025_v27  ;;  %vm7968_vm7 = vmmov %vm7963_vm6 }
 0x278   :  { %vm7969_vm3 = vmmov %vm7966_vm1 }
 0x279   :  { %v1563_v56 = vpop.permute.xlu0 %1562  ;;  %vm7970_vm12 = vmmov %vm7966_vm1 }
 0x27a   :  { %v1748_v26 = vsel %vm1738_vm2, %v1728_v33, %v1563_v56 }
 0x27b   :  { %v1633_v12 = vpop.permute.xlu1 %1632 }
 0x27c   :  { %v1796_v40 = vsel %vm1788_vm9, %v1779_v10, %v1633_v12 }
 0x27f   :  { %v1657_v19 = vpop.permute.xlu1 %1656 }
 0x280   :  { %v1813_v18 = vsel %vm1805_vm15, %v1796_v40, %v1657_v19 }
 0x281   :  { %v1587_v44 = vpop.permute.xlu0 %1586  ;;  %v1830_v52 = vsel %vm1822_vm10, %v1813_v18, %v6059_v16  ;;  %v670_v16 = vsel %vm662_vm11, %v7879_v24, 0  ;;  %vm7977_vm11 = vmmov %vm7962_vm0 }
 0x282   :  { %v1847_v14 = vsel %vm1839_vm13, %v1830_v52, %v1705_v3  ;;  %v1765_v32 = vsel %vm1755_vm4, %v1748_v26, %v1587_v44  ;;  %v1731_v39 = vsel %vm7965_vm14, %v670_v16, %v6067_v42  ;;  %vm7979_vm14 = vmmov %vm7962_vm0 }
 0x283   :  { %v1565_v27 = vpop.permute.xlu1 %1564  ;;  %2977 = vmatmul.mubr.msk.bf16.gmra.mrb[16].mxu1 %vm7963_vm6, %v1847_v14  ;;  %v1781_v4 = vsel %vm7964_vm5, %v1765_v32, %v6038_v48  ;;  %vm7978_vm5 = vmmov %vm7962_vm0 }
 0x284   :  { %v1750_v46 = vsel %vm1738_vm2, %v1731_v39, %v1565_v27 }
 0x286   :  { %v1635_v57 = vpop.permute.xlu0 %1634 }
 0x287   :  { %v1798_v2 = vsel %vm1788_vm9, %v1781_v4, %v1635_v57 }
 0x28a   :  { %v1659_v11 = vpop.permute.xlu0 %1658 }
 0x28b   :  { %v1589_v60 = vpop.permute.xlu1 %1588  ;;  %v1815_v29 = vsel %vm1805_vm15, %v1798_v2, %v1659_v11  ;;  %v2181_v2 = vld [vmem:[%s6875_s3] sm:$0xf] }
 0x28c   :  { %v1832_v21 = vsel %vm1822_vm10, %v1815_v29, %v6065_v43  ;;  %v1767_v20 = vsel %vm1755_vm4, %v1750_v46, %v1589_v60 }
 0x28d   :  { %v1783_v24 = vsel %vm7966_vm1, %v1767_v20, %v6036_v6  ;;  %vm7980_vm1 = vcmask 1043456  }
 0x28e   :  { %v1707_v48 = vpop.permute.xlu0 %1706  ;;  %3011 = vmatprep.subr.msk.bf16.mxu0 %vm7980_vm1, %v2181_v2 }
 0x28f   :  { %v1637_v22 = vpop.permute.xlu1 %1636  ;;  %v1849_v36 = vsel %vm1839_vm13, %v1832_v21, %v1707_v48 }
 0x290   :  { %2980 = vmatprep.mubr.msk.bf16.mxu1 %vm7967_vm8, %v1849_v36  ;;  %v1800_v42 = vsel %vm1788_vm9, %v1783_v24, %v1637_v22  ;;  %vm7981_vm8 = vmmov %vm7980_vm1 }
 0x291   :  { %v2207_v11 = vsel %vm7981_vm8, %v2181_v2, 0  ;;  %vm7994_vm1 = vmmov %vm7962_vm0 }
 0x292   :  { %v1709_v17 = vpop.permute.xlu0 %1708  ;;  %2989 = vmatpush3.bf16.msra.mxu0 %v2207_v11  ;;  %vm7995_vm8 = vmmov %vm7962_vm0 }
 0x293   :  { %v1661_v38 = vpop.permute.xlu1 %1660 }
 0x294   :  { %v1817_v61 = vsel %vm1805_vm15, %v1800_v42, %v1661_v38 }
 0x295   :  { %v1834_v43 = vsel %vm1822_vm10, %v1817_v61, %v6079_v30 }
 0x296   :  { %v1851_v13 = vsel %vm1839_vm13, %v1834_v43, %v1709_v17 }
 0x297   :  { %v1569_v8 = vpop.permute.xlu1 %1568  ;;  %2981 = vmatmul.mubr.msk.bf16.gmra.mrb[20].mxu1 %vm7968_vm7, %v1851_v13  ;;  %v1567_v6 = vpop.permute.xlu0 %1566  ;;  %vm7982_vm7 = vmmov %vm7962_vm0 }
 0x298   :  { %v1754_v28 = vsel %vm1738_vm2, %v6122_v0, %v1569_v8  ;;  %v1752_v51 = vsel %vm1738_vm2, %v6108_v45, %v1567_v6  ;;  %vm7971_vm2 = vmmov %vm7963_vm6 }
 0x299   :  { %vm7976_vm6 = vmmov %vm7962_vm0 }
 0x29b   :  { %v1593_v53 = vpop.permute.xlu1 %1592  ;;  %v1591_v50 = vpop.permute.xlu0 %1590 }
 0x29c   :  { %v1771_v55 = vsel %vm1755_vm4, %v1754_v28, %v1593_v53  ;;  %v1769_v49 = vsel %vm1755_vm4, %v1752_v51, %v1591_v50  ;;  %vm7972_vm4 = vmmov %vm7971_vm2 }
 0x29d   :  { %v1787_v59 = vsel %vm7969_vm3, %v1771_v55, %v6047_v47  ;;  %v1785_v0 = vsel %vm7970_vm12, %v1769_v49, %v6049_v34  ;;  %vm7983_vm3 = vmmov %vm7962_vm0 }
 0x29e   :  { %vm7984_vm12 = vmmov %vm7962_vm0 }
 0x29f   :  { %v1641_v30 = vpop.permute.xlu1 %1640  ;;  %v1639_v37 = vpop.permute.xlu0 %1638 }
 0x2a0   :  { %v1804_v1 = vsel %vm1788_vm9, %v1787_v59, %v1641_v30  ;;  %v1802_v41 = vsel %vm1788_vm9, %v1785_v0, %v1639_v37  ;;  %vm7973_vm9 = vmmov %vm7962_vm0 }
 0x2a3   :  { %v1665_v9 = vpop.permute.xlu1 %1664  ;;  %v1663_v3 = vpop.permute.xlu0 %1662 }
 0x2a4   :  { %v1821_v54 = vsel %vm1805_vm15, %v1804_v1, %v1665_v9  ;;  %v1819_v45 = vsel %vm1805_vm15, %v1802_v41, %v1663_v3  ;;  %vm7974_vm15 = vmmov %vm7962_vm0 }
 0x2a5   :  { %v1838_v47 = vsel %vm1822_vm10, %v1821_v54, %v6129_v31  ;;  %v1836_v23 = vsel %vm1822_vm10, %v1819_v45, %v6069_v62  ;;  %vm7975_vm10 = vmmov %vm7962_vm0 }
 0x2a7   :  { %v1713_v15 = vpop.permute.xlu1 %1712  ;;  %v1711_v25 = vpop.permute.xlu0 %1710 }
 0x2a8   :  { %v1855_v35 = vsel %vm1839_vm13, %v1838_v47, %v1713_v15  ;;  %v1853_v34 = vsel %vm1839_vm13, %v1836_v23, %v1711_v25 }
 0x2a9   :  { %2984 = vmatprep.mubr.msk.bf16.mxu1 %vm7971_vm2, %v1853_v34  ;;  %vm7985_vm2 = vmmov %vm7962_vm0 }
 0x2aa   :  { %2985 = vmatmul.mubr.msk.bf16.gmra.mrb[24].mxu1 %vm7972_vm4, %v1855_v35  ;;  %vm7986_vm4 = vmmov %vm7962_vm0 }
 0x344   :  { %v6275_v12 = vpop.f32.mrb[12].mxu1 }
 0x345   :  { %v6277_v56 = vpop.f32.mrb[13].mxu1  ;;  %v2004_v40 = vsel %vm7975_vm10, %v6275_v12, 0.0  ;;  %vm7989_vm10 = vmmov %vm7962_vm0 }
 0x346   :  { %v6279_v5 = vpop.f32.mrb[14].mxu1  ;;  %v2001_v7 = vsel %vm7973_vm9, %v6277_v56, 0.0  ;;  %vm7987_vm9 = vmmov %vm7962_vm0 }
 0x347   :  { %v6281_v31 = vpop.f32.mrb[15].mxu1  ;;  %v2006_v18 = vsel %vm7962_vm0, %v6279_v5, 0.0 }
 0x348   :  { %v2002_v62 = vsel %vm7974_vm15, %v6281_v31, 0.0  ;;  %vm7988_vm15 = vmmov %vm7962_vm0 }
 0x349   :  { %v2003_v10 = vadd.f32 %v2002_v62, %v2001_v7 }
 0x34b   :  { %v2005_v19 = vadd.f32 %v2004_v40, %v2003_v10 }
 0x34d   :  { %v2007_v44 = vadd.f32 %v2006_v18, %v2005_v19 }
 0x356   :  { %v6291_v58 = vpop.f32.mrb[16].mxu1 }
 0x357   :  { %v6293_v63 = vpop.f32.mrb[17].mxu1  ;;  %v2012_v57 = vsel %vm7978_vm5, %v6291_v58, 0.0  ;;  %vm7992_vm5 = vmmov %vm7962_vm0 }
 0x358   :  { %v2008_v52 = vsel %vm7976_vm6, %v6293_v63, 0.0  ;;  %v6297_v33 = vpop.f32.mrb[18].mxu1  ;;  %vm7990_vm6 = vmmov %vm7962_vm0 }
 0x359   :  { %v2009_v14 = vadd.f32 %v2008_v52, %v2007_v44  ;;  %v6299_v26 = vpop.f32.mrb[19].mxu1  ;;  %v2014_v60 = vsel %vm7979_vm14, %v6297_v33, 0.0  ;;  %vm7993_vm14 = vmmov %vm7962_vm0 }
 0x35a   :  { %v2010_v27 = vsel %vm7977_vm11, %v6299_v26, 0.0  ;;  %vm7991_vm11 = vmmov %vm7962_vm0 }
 0x35b   :  { %v2011_v32 = vadd.f32 %v2010_v27, %v2009_v14 }
 0x35d   :  { %v2013_v4 = vadd.f32 %v2012_v57, %v2011_v32 }
 0x35f   :  { %v2015_v16 = vadd.f32 %v2014_v60, %v2013_v4 }
 0x36a   :  { %v6312_v39 = vpop.f32.mrb[20].mxu1 }
 0x36b   :  { %v6314_v29 = vpop.f32.mrb[21].mxu1  ;;  %v2020_v24 = vsel %vm7984_vm12, %v6312_v39, 0.0  ;;  %vm7998_vm12 = vmmov %vm7962_vm0 }
 0x36c   :  { %v2016_v46 = vsel %vm7982_vm7, %v6314_v29, 0.0  ;;  %v6318_v21 = vpop.f32.mrb[22].mxu1  ;;  %vm7996_vm7 = vmmov %vm7962_vm0 }
 0x36d   :  { %v2017_v20 = vadd.f32 %v2016_v46, %v2015_v16  ;;  %v6320_v22 = vpop.f32.mrb[23].mxu1  ;;  %v2022_v38 = vsel %vm7985_vm2, %v6318_v21, 0.0  ;;  %vm7999_vm2 = vmmov %vm7962_vm0 }
 0x36e   :  { %v2018_v48 = vsel %vm7983_vm3, %v6320_v22, 0.0  ;;  %vm7997_vm3 = vmmov %vm7962_vm0 }
 0x36f   :  { %v2019_v36 = vadd.f32 %v2018_v48, %v2017_v20 }
 0x371   :  { %v2021_v42 = vadd.f32 %v2020_v24, %v2019_v36 }
 0x373   :  { %v2023_v61 = vadd.f32 %v2022_v38, %v2021_v42 }
 0x37d   :  { %v6328_v17 = vpop.f32.mrb[24].mxu1 }
 0x37e   :  { %v6330_v43 = vpop.f32.mrb[25].mxu1  ;;  %v2028_v50 = vsel %vm7988_vm15, %v6328_v17, 0.0  ;;  %vm8002_vm15 = vmmov %vm7962_vm0 }
 0x37f   :  { %v2024_v13 = vsel %vm7986_vm4, %v6330_v43, 0.0  ;;  %v6334_v8 = vpop.f32.mrb[26].mxu1  ;;  %vm8000_vm4 = vmmov %vm7962_vm0 }
 0x380   :  { %v2025_v28 = vadd.f32 %v2024_v13, %v2023_v61  ;;  %v6336_v6 = vpop.f32.mrb[27].mxu1  ;;  %v2030_v59 = vsel %vm7989_vm10, %v6334_v8, 0.0  ;;  %vm8003_vm10 = vmmov %vm7962_vm0 }
 0x381   :  { %v2026_v53 = vsel %vm7987_vm9, %v6336_v6, 0.0  ;;  %vm8001_vm9 = vmmov %vm7962_vm0 }
 0x382   :  { %v2027_v55 = vadd.f32 %v2026_v53, %v2025_v28 }
 0x384   :  { %v2029_v51 = vadd.f32 %v2028_v50, %v2027_v55 }
 0x386   :  { %v2031_v30 = vadd.f32 %v2030_v59, %v2029_v51 }
 0x388   :  { %v2032_v49 = vrot.slane %v2031_v30, 4 }
 0x38a   :  { %v2033_v1 = vadd.f32 %v2032_v49, %v2031_v30 }
 0x38c   :  { %v2034_v37 = vrot.slane %v2033_v1, 2 }
 0x38e   :  { %v2035_v0 = vadd.f32 %v2034_v37, %v2033_v1 }
 0x390   :  { %v2036_v9 = vrot.slane %v2035_v0, 1 }
 0x392   :  { %v2037_v41 = vadd.f32 %v2036_v9, %v2035_v0 }
 0x394   :  { %v6344_v54 = vmul.f32 0.0078125, %v2037_v41 }
 0x396   :  { %v2039_v3 = vsub.f32 %v6277_v56, %v6344_v54  ;;  %v2040_v45 = vsub.f32 %v6281_v31, %v6344_v54  ;;  %v2041_v47 = vsub.f32 %v6275_v12, %v6344_v54  ;;  %v2042_v15 = vsub.f32 %v6279_v5, %v6344_v54 }
 0x397   :  { %v2043_v35 = vsub.f32 %v6293_v63, %v6344_v54  ;;  %v2044_v23 = vsub.f32 %v6299_v26, %v6344_v54  ;;  %v2045_v25 = vsub.f32 %v6291_v58, %v6344_v54  ;;  %v2046_v34 = vsub.f32 %v6297_v33, %v6344_v54 }
 0x398   :  { %v2047_v7 = vsub.f32 %v6314_v29, %v6344_v54  ;;  %v2048_v62 = vsub.f32 %v6320_v22, %v6344_v54  ;;  %v2049_v10 = vsub.f32 %v6312_v39, %v6344_v54  ;;  %v2050_v40 = vsub.f32 %v6318_v21, %v6344_v54 }
 0x399   :  { %v2051_v19 = vsub.f32 %v6330_v43, %v6344_v54  ;;  %v2052_v18 = vsub.f32 %v6336_v6, %v6344_v54  ;;  %v2053_v44 = vsub.f32 %v6328_v17, %v6344_v54  ;;  %v2054_v52 = vsub.f32 %v6334_v8, %v6344_v54 }
 0x39a   :  { %v2055_v14 = vmul.f32 %v2039_v3, %v2039_v3  ;;  %v2056_v27 = vmul.f32 %v2040_v45, %v2040_v45  ;;  %v2057_v32 = vmul.f32 %v2041_v47, %v2041_v47  ;;  %v2058_v57 = vmul.f32 %v2042_v15, %v2042_v15 }
 0x39b   :  { %v2059_v2 = vmul.f32 %v2043_v35, %v2043_v35  ;;  %v2060_v20 = vmul.f32 %v2044_v23, %v2044_v23  ;;  %v2061_v24 = vmul.f32 %v2045_v25, %v2045_v25  ;;  %v2062_v61 = vmul.f32 %v2046_v34, %v2046_v34 }
 0x39c   :  { %v2071_v4 = vsel %vm7962_vm0, %v2055_v14, 0.0  ;;  %v2072_v60 = vsel %vm7990_vm6, %v2056_v27, 0.0  ;;  %v2074_v11 = vsel %vm7991_vm11, %v2057_v32, 0.0  ;;  %v2076_v48 = vsel %vm7992_vm5, %v2058_v57, 0.0  ;;  %vm8005_vm6 = vmmov %vm7962_vm0 }
 0x39d   :  { %v2073_v16 = vadd.f32 %v2072_v60, %v2071_v4  ;;  %v2078_v42 = vsel %vm7993_vm14, %v2059_v2, 0.0  ;;  %v2080_v13 = vsel %vm7994_vm1, %v2060_v20, 0.0  ;;  %v2063_v53 = vmul.f32 %v2047_v7, %v2047_v7  ;;  %vm8006_vm11 = vmmov %vm7962_vm0 }
 0x39e   :  { %v2082_v55 = vsel %vm7995_vm8, %v2061_v24, 0.0  ;;  %v2064_v51 = vmul.f32 %v2048_v62, %v2048_v62  ;;  %v2084_v59 = vsel %vm7996_vm7, %v2062_v61, 0.0  ;;  %v2065_v49 = vmul.f32 %v2049_v10, %v2049_v10  ;;  %vm8007_vm5 = vmmov %vm7962_vm0 }
 0x39f   :  { %v2075_v46 = vadd.f32 %v2074_v11, %v2073_v16  ;;  %v2086_v1 = vsel %vm7997_vm3, %v2063_v53, 0.0  ;;  %v2066_v0 = vmul.f32 %v2050_v40, %v2050_v40  ;;  %v2067_v3 = vmul.f32 %v2051_v19, %v2051_v19  ;;  %vm8008_vm14 = vmmov %vm7962_vm0 }
 0x3a0   :  { %v2088_v9 = vsel %vm7998_vm12, %v2064_v51, 0.0  ;;  %v2090_v45 = vsel %vm7999_vm2, %v2065_v49, 0.0  ;;  %v2068_v15 = vmul.f32 %v2052_v18, %v2052_v18  ;;  %v2069_v25 = vmul.f32 %v2053_v44, %v2053_v44  ;;  %vm8009_vm1 = vmmov %vm7962_vm0 }
 0x3a1   :  { %v2077_v36 = vadd.f32 %v2076_v48, %v2075_v46  ;;  %v2092_v35 = vsel %vm8000_vm4, %v2066_v0, 0.0  ;;  %v2094_v34 = vsel %vm8001_vm9, %v2067_v3, 0.0  ;;  %v2070_v62 = vmul.f32 %v2054_v52, %v2054_v52  ;;  %v8004_v46 = vld [vmem:[#allocation8_spill] sm:$0xff]  ;;  %vm8010_vm8 = vmmov %vm7962_vm0 }
 0x3a2   :  { %v2096_v10 = vsel %vm8002_vm15, %v2068_v15, 0.0  ;;  %v2098_v40 = vsel %vm8003_vm10, %v2069_v25, 0.0  ;;  %v2119_v52 = vsub.s32 2, %v8004_v46  ;;  %v6398_v48 = vld [vmem:[%s6876_s4] sm:$0x3f]  ;;  %vm8011_vm7 = vmmov %vm7962_vm0  ;;  %vm8013_vm12 = vcmask 261120  }
 0x3a3   :  { %v2079_v38 = vadd.f32 %v2078_v42, %v2077_v36  ;;  %v2100_v19 = vsel %vm7962_vm0, %v2070_v62, 0.0  ;;  %vm8012_vm3 = vmmov %vm7962_vm0  ;;  %s3115_s4 = smov 96  }
 0x3a4   :  { %vm8014_vm2 = vmmov %vm8013_vm12 }
 0x3a5   :  { %v2081_v28 = vadd.f32 %v2080_v13, %v2079_v38  ;;  %v2139_v38 = vsub.s32 3, %v8004_v46  ;;  %vm8015_vm4 = vmmov %vm8014_vm2 }
 0x3a6   :  { %vm8016_vm9 = vmmov %vm8014_vm2 }
 0x3a7   :  { %v2083_v50 = vadd.f32 %v2082_v55, %v2081_v28  ;;  %vm8017_vm15 = vmmov %vm8014_vm2 }
 0x3a8   :  { %vm8018_vm10 = vmmov %vm8014_vm2 }
 0x3a9   :  { %v2085_v30 = vadd.f32 %v2084_v59, %v2083_v50  ;;  %vm8019_vm0 = vmmov %vm8014_vm2 }
 0x3ab   :  { %v2087_v37 = vadd.f32 %v2086_v1, %v2085_v30 }
 0x3ad   :  { %v2089_v41 = vadd.f32 %v2088_v9, %v2087_v37 }
 0x3af   :  { %v2091_v47 = vadd.f32 %v2090_v45, %v2089_v41 }
 0x3b1   :  { %v2093_v23 = vadd.f32 %v2092_v35, %v2091_v47 }
 0x3b3   :  { %v2095_v7 = vadd.f32 %v2094_v34, %v2093_v23 }
 0x3b5   :  { %v2097_v14 = vadd.f32 %v2096_v10, %v2095_v7 }
 0x3b7   :  { %v2099_v27 = vadd.f32 %v2098_v40, %v2097_v14 }
 0x3b9   :  { %v2101_v32 = vadd.f32 %v2100_v19, %v2099_v27 }
 0x3bb   :  { %v2102_v57 = vrot.slane %v2101_v32, 4 }
 0x3bd   :  { %v2103_v4 = vadd.f32 %v2102_v57, %v2101_v32 }
 0x3bf   :  { %v2104_v18 = vrot.slane %v2103_v4, 2 }
 0x3c1   :  { %v2105_v60 = vadd.f32 %v2104_v18, %v2103_v4 }
 0x3c3   :  { %v2106_v16 = vrot.slane %v2105_v60, 1 }
 0x3c5   :  { %v2107_v2 = vadd.f32 %v2106_v16, %v2105_v60 }
 0x3c7   :  { %v2108_v44 = vmul.f32 0.0078125, %v2107_v2 }
 0x3c9   :  { %v2109_v11 = vadd.f32 1e-05, %v2108_v44 }
 0x3cb   :  { %3035 = vrsqrt.f32 %v2109_v11 }
 0x3d5   :  { %v3036_v20 = vpop.eup %3035 }
 0x3d6   :  { %v2111_v36 = vmul.f32 %v6398_v48, %v3036_v20 }
 0x3d8   :  { %v2112_v24 = vmul.f32 %v2111_v36, %v6344_v54  ;;  %v2120_v42 = vrot.slane %v2111_v36, %v2119_v52 }
 0x3da   :  { %v2114_v61 = vrot.slane %v2112_v24, 7  ;;  %v2133_v13 = vmul.f32 %v2120_v42, %v6330_v43  ;;  %v2134_v28 = vmul.f32 %v2120_v42, %v6336_v6  ;;  %v2121_v53 = vmul.f32 %v2120_v42, %v6277_v56 }
 0x3db   :  { %v2122_v55 = vmul.f32 %v2120_v42, %v6281_v31  ;;  %v2123_v50 = vmul.f32 %v6275_v12, %v2120_v42  ;;  %v2124_v51 = vmul.f32 %v6279_v5, %v2120_v42  ;;  %v2125_v59 = vmul.f32 %v2120_v42, %v6293_v63 }
 0x3dc   :  { %v2116_v54 = vsub.f32 %v6398_v48, %v2114_v61  ;;  %v2126_v30 = vmul.f32 %v2120_v42, %v6299_v26  ;;  %v2127_v49 = vmul.f32 %v6291_v58, %v2120_v42  ;;  %v2128_v43 = vmul.f32 %v6297_v33, %v2120_v42 }
 0x3dd   :  { %v2129_v6 = vmul.f32 %v2120_v42, %v6314_v29  ;;  %v2130_v56 = vmul.f32 %v2120_v42, %v6320_v22  ;;  %v2131_v31 = vmul.f32 %v6312_v39, %v2120_v42  ;;  %v2132_v12 = vmul.f32 %v6318_v21, %v2120_v42 }
 0x3de   :  { %v2140_v1 = vrot.slane %v2116_v54, %v2139_v38  ;;  %v2135_v5 = vmul.f32 %v6328_v17, %v2120_v42  ;;  %v2136_v63 = vmul.f32 %v6334_v8, %v2120_v42 }
 0x3e0   :  { %v2153_v37 = vadd.f32 %v2140_v1, %v2133_v13  ;;  %v2154_v0 = vadd.f32 %v2140_v1, %v2134_v28  ;;  %v2141_v26 = vadd.f32 %v2140_v1, %v2121_v53  ;;  %v2142_v9 = vadd.f32 %v2140_v1, %v2122_v55 }
 0x3e1   :  { %v2143_v58 = vadd.f32 %v2140_v1, %v2123_v50  ;;  %v2144_v41 = vadd.f32 %v2140_v1, %v2124_v51  ;;  %v2145_v33 = vadd.f32 %v2140_v1, %v2125_v59  ;;  %v2146_v3 = vadd.f32 %v2140_v1, %v2126_v30 }
 0x3e2   :  { %v2169_v29 = vmax.f32 %v2153_v37, 0.0  ;;  %v2170_v45 = vmax.f32 %v2154_v0, 0.0  ;;  %v2157_v22 = vmax.f32 %v2141_v26, 0.0  ;;  %v2158_v47 = vmax.f32 %v2142_v9, 0.0 }
 0x3e3   :  { %v2159_v39 = vmax.f32 %v2143_v58, 0.0  ;;  %v2160_v15 = vmax.f32 %v2144_v41, 0.0  ;;  %v2161_v21 = vmax.f32 %v2145_v33, 0.0  ;;  %v2162_v35 = vmax.f32 %v2146_v3, 0.0 }
 0x3e4   :  { %v2179_v23 = vpack.c.bf16 %v2170_v45, %v2169_v29  ;;  %v2173_v17 = vpack.c.bf16 %v2158_v47, %v2157_v22  ;;  %v2147_v25 = vadd.f32 %v2140_v1, %v2127_v49  ;;  %v2148_v8 = vadd.f32 %v2140_v1, %v2128_v43 }
 0x3e5   :  { %v2174_v34 = vpack.c.bf16 %v2160_v15, %v2159_v39  ;;  %v2175_v7 = vpack.c.bf16 %v2162_v35, %v2161_v21  ;;  %v2149_v62 = vadd.f32 %v2140_v1, %v2129_v6  ;;  %v2150_v10 = vadd.f32 %v2140_v1, %v2130_v56 }
 0x3e6   :  { %2990 = vmatprep.mubr.msk.bf16.mxu0 %vm8005_vm6, %v2173_v17  ;;  %v2163_v14 = vmax.f32 %v2147_v25, 0.0  ;;  %v2164_v40 = vmax.f32 %v2148_v8, 0.0  ;;  %v2151_v27 = vadd.f32 %v2140_v1, %v2131_v31  ;;  %v2152_v19 = vadd.f32 %v2140_v1, %v2132_v12  ;;  %vm8020_vm6 = vmmov %vm8019_vm0 }
 0x3e7   :  { %2991 = vmatmul.mubr.msk.bf16.vlgmr.msra.gmra.mrb[4].mxu0 %vm8006_vm11, %v2174_v34  ;;  %v2165_v32 = vmax.f32 %v2149_v62, 0.0  ;;  %v2166_v57 = vmax.f32 %v2150_v10, 0.0  ;;  %v2155_v4 = vadd.f32 %v2140_v1, %v2135_v5  ;;  %v2156_v18 = vadd.f32 %v2140_v1, %v2136_v63  ;;  %vm8021_vm11 = vmmov %vm8019_vm0 }
 0x3e8   :  { %2994 = vmatprep.mubr.msk.bf16.mxu0 %vm8007_vm5, %v2175_v7  ;;  %v2176_v60 = vpack.c.bf16 %v2164_v40, %v2163_v14  ;;  %v2167_v16 = vmax.f32 %v2151_v27, 0.0  ;;  %v2168_v2 = vmax.f32 %v2152_v19, 0.0  ;;  %vm8022_vm5 = vmmov %vm8019_vm0 }
 0x3e9   :  { %v2177_v44 = vpack.c.bf16 %v2166_v57, %v2165_v32  ;;  %v2171_v11 = vmax.f32 %v2155_v4, 0.0  ;;  %v2172_v52 = vmax.f32 %v2156_v18, 0.0 }
 0x3ea   :  { %v2178_v20 = vpack.c.bf16 %v2168_v2, %v2167_v16 }
 0x3eb   :  { %v2180_v36 = vpack.c.bf16 %v2172_v52, %v2171_v11 }
 0x3ef   :  { %2995 = vmatmul.mubr.msk.bf16.gmra.mrb[8].mxu0 %vm8008_vm14, %v2176_v60  ;;  %vm8023_vm14 = vmmov %vm8019_vm0 }
 0x3f0   :  { %2998 = vmatprep.mubr.msk.bf16.mxu0 %vm8009_vm1, %v2177_v44  ;;  %vm8024_vm1 = vmmov %vm8019_vm0 }
 0x3f7   :  { %2999 = vmatmul.mubr.msk.bf16.gmra.mrb[12].mxu0 %vm8010_vm8, %v2178_v20  ;;  %vm8025_vm8 = vmmov %vm8019_vm0 }
 0x3f8   :  { %3002 = vmatprep.mubr.msk.bf16.mxu0 %vm8011_vm7, %v2179_v23  ;;  %vm8026_vm7 = vmmov %vm8019_vm0 }
 0x3ff   :  { %3003 = vmatmul.mubr.msk.bf16.gmra.mrb[16].mxu0 %vm8012_vm3, %v2180_v36  ;;  %vm8027_vm3 = vmmov %vm8019_vm0 }
 0x4ba   :  { %v6428_v24 = vpop.f32.mrb[4].mxu0 }
 0x4bb   :  { %v6430_v42 = vpop.f32.mrb[5].mxu0  ;;  %v2309_v55 = vsel %vm8015_vm4, %v6428_v24, 0.0  ;;  %vm8030_vm4 = vmmov %vm8019_vm0 }
 0x4bc   :  { %v6432_v38 = vpop.f32.mrb[6].mxu0  ;;  %v2306_v13 = vsel %vm8013_vm12, %v6430_v42, 0.0  ;;  %vm8028_vm12 = vmmov %vm8019_vm0 }
 0x4bd   :  { %v6434_v61 = vpop.f32.mrb[7].mxu0  ;;  %v2311_v51 = vsel %vm8016_vm9, %v6432_v38, 0.0  ;;  %vm8031_vm9 = vmmov %vm8019_vm0 }
 0x4be   :  { %v2307_v28 = vsel %vm8014_vm2, %v6434_v61, 0.0  ;;  %vm8029_vm2 = vmmov %vm8019_vm0 }
 0x4bf   :  { %v2308_v53 = vadd.f32 %v2307_v28, %v2306_v13 }
 0x4c1   :  { %v2310_v50 = vadd.f32 %v2309_v55, %v2308_v53 }
 0x4c2   :  { %v6444_v59 = vpop.f32.mrb[8].mxu0 }
 0x4c3   :  { %v6446_v54 = vpop.f32.mrb[9].mxu0  ;;  %v2312_v30 = vadd.f32 %v2311_v51, %v2310_v50  ;;  %v2317_v1 = vsel %vm8019_vm0, %v6444_v59, 0.0 }
 0x4c4   :  { %v2313_v49 = vsel %vm8017_vm15, %v6446_v54, 0.0  ;;  %v6450_v43 = vpop.f32.mrb[10].mxu0  ;;  %vm8032_vm15 = vmmov %vm8019_vm0 }
 0x4c5   :  { %v2314_v6 = vadd.f32 %v2313_v49, %v2312_v30  ;;  %v6452_v56 = vpop.f32.mrb[11].mxu0  ;;  %v2319_v63 = vsel %vm8020_vm6, %v6450_v43, 0.0  ;;  %vm8034_vm6 = vmmov %vm8019_vm0 }
 0x4c6   :  { %v2315_v31 = vsel %vm8018_vm10, %v6452_v56, 0.0  ;;  %vm8033_vm10 = vmmov %vm8019_vm0 }
 0x4c7   :  { %v2316_v12 = vadd.f32 %v2315_v31, %v2314_v6 }
 0x4c9   :  { %v2318_v5 = vadd.f32 %v2317_v1, %v2316_v12 }
 0x4ca   :  { %v6460_v37 = vpop.f32.mrb[12].mxu0 }
 0x4cb   :  { %v6462_v0 = vpop.f32.mrb[13].mxu0  ;;  %v2320_v26 = vadd.f32 %v2319_v63, %v2318_v5  ;;  %v2325_v45 = vsel %vm8023_vm14, %v6460_v37, 0.0  ;;  %vm8037_vm14 = vmmov %vm8019_vm0 }
 0x4cc   :  { %v2321_v9 = vsel %vm8021_vm11, %v6462_v0, 0.0  ;;  %v6466_v58 = vpop.f32.mrb[14].mxu0  ;;  %vm8035_vm11 = vmmov %vm8019_vm0 }
 0x4cd   :  { %v2322_v41 = vadd.f32 %v2321_v9, %v2320_v26  ;;  %v6468_v33 = vpop.f32.mrb[15].mxu0  ;;  %v2327_v47 = vsel %vm8024_vm1, %v6466_v58, 0.0  ;;  %vm8038_vm1 = vmmov %vm8019_vm0 }
 0x4ce   :  { %v2323_v3 = vsel %vm8022_vm5, %v6468_v33, 0.0  ;;  %vm8036_vm5 = vmmov %vm8019_vm0 }
 0x4cf   :  { %v2324_v29 = vadd.f32 %v2323_v3, %v2322_v41 }
 0x4d1   :  { %v2326_v22 = vadd.f32 %v2325_v45, %v2324_v29 }
 0x4d2   :  { %v6476_v39 = vpop.f32.mrb[16].mxu0 }
 0x4d3   :  { %v6478_v15 = vpop.f32.mrb[17].mxu0  ;;  %v2328_v21 = vadd.f32 %v2327_v47, %v2326_v22  ;;  %v2333_v7 = vsel %vm8027_vm3, %v6476_v39, 0.0  ;;  %vm8041_vm3 = vmmov %vm8019_vm0 }
 0x4d4   :  { %v2329_v35 = vsel %vm8025_vm8, %v6478_v15, 0.0  ;;  %v6482_v23 = vpop.f32.mrb[18].mxu0  ;;  %vm8039_vm8 = vmmov %vm8019_vm0 }
 0x4d5   :  { %v2330_v17 = vadd.f32 %v2329_v35, %v2328_v21  ;;  %v6484_v25 = vpop.f32.mrb[19].mxu0  ;;  %v2335_v10 = vsel %vm8028_vm12, %v6482_v23, 0.0  ;;  %vm8042_vm12 = vmmov %vm8019_vm0 }
 0x4d6   :  { %v2331_v8 = vsel %vm8026_vm7, %v6484_v25, 0.0  ;;  %vm8040_vm7 = vmmov %vm8019_vm0 }
 0x4d7   :  { %v2332_v34 = vadd.f32 %v2331_v8, %v2330_v17 }
 0x4d9   :  { %v2334_v62 = vadd.f32 %v2333_v7, %v2332_v34 }
 0x4db   :  { %v2336_v14 = vadd.f32 %v2335_v10, %v2334_v62 }
 0x4dd   :  { %v2337_v40 = vrot.slane %v2336_v14, 4 }
 0x4df   :  { %v2338_v27 = vadd.f32 %v2337_v40, %v2336_v14 }
 0x4e1   :  { %v2339_v19 = vrot.slane %v2338_v27, 2 }
 0x4e3   :  { %v2340_v32 = vadd.f32 %v2339_v19, %v2338_v27 }
 0x4e5   :  { %v2341_v57 = vrot.slane %v2340_v32, 1 }
 0x4e7   :  { %v2342_v4 = vadd.f32 %v2341_v57, %v2340_v32 }
 0x4e9   :  { %v6492_v18 = vmul.f32 0.0078125, %v2342_v4 }
 0x4eb   :  { %v2344_v60 = vsub.f32 %v6430_v42, %v6492_v18  ;;  %v2345_v16 = vsub.f32 %v6434_v61, %v6492_v18  ;;  %v2346_v2 = vsub.f32 %v6428_v24, %v6492_v18  ;;  %v2347_v44 = vsub.f32 %v6432_v38, %v6492_v18 }
 0x4ec   :  { %v2348_v11 = vsub.f32 %v6446_v54, %v6492_v18  ;;  %v2349_v52 = vsub.f32 %v6452_v56, %v6492_v18  ;;  %v2350_v20 = vsub.f32 %v6444_v59, %v6492_v18  ;;  %v2351_v36 = vsub.f32 %v6450_v43, %v6492_v18 }
 0x4ed   :  { %v2352_v13 = vsub.f32 %v6462_v0, %v6492_v18  ;;  %v2353_v28 = vsub.f32 %v6468_v33, %v6492_v18  ;;  %v2354_v53 = vsub.f32 %v6460_v37, %v6492_v18  ;;  %v2355_v55 = vsub.f32 %v6466_v58, %v6492_v18 }
 0x4ee   :  { %v2356_v50 = vsub.f32 %v6478_v15, %v6492_v18  ;;  %v2357_v51 = vsub.f32 %v6484_v25, %v6492_v18  ;;  %v2358_v30 = vsub.f32 %v6476_v39, %v6492_v18  ;;  %v2359_v49 = vsub.f32 %v6482_v23, %v6492_v18 }
 0x4ef   :  { %v2360_v6 = vmul.f32 %v2344_v60, %v2344_v60  ;;  %v2361_v31 = vmul.f32 %v2345_v16, %v2345_v16  ;;  %v2362_v12 = vmul.f32 %v2346_v2, %v2346_v2  ;;  %v2363_v1 = vmul.f32 %v2347_v44, %v2347_v44 }
 0x4f0   :  { %v2364_v9 = vmul.f32 %v2348_v11, %v2348_v11  ;;  %v2365_v29 = vmul.f32 %v2349_v52, %v2349_v52  ;;  %v2366_v47 = vmul.f32 %v2350_v20, %v2350_v20  ;;  %v2367_v17 = vmul.f32 %v2351_v36, %v2351_v36 }
 0x4f1   :  { %v2376_v5 = vsel %vm8029_vm2, %v2360_v6, 0.0  ;;  %v2377_v63 = vsel %vm8030_vm4, %v2361_v31, 0.0  ;;  %v2379_v41 = vsel %vm8031_vm9, %v2362_v12, 0.0  ;;  %v2381_v45 = vsel %vm8032_vm15, %v2363_v1, 0.0  ;;  %vm8043_vm2 = vmmov %vm8019_vm0 }
 0x4f2   :  { %v2378_v26 = vadd.f32 %v2377_v63, %v2376_v5  ;;  %v2383_v21 = vsel %vm8033_vm10, %v2364_v9, 0.0  ;;  %v2385_v8 = vsel %vm8019_vm0, %v2365_v29, 0.0  ;;  %v2368_v7 = vmul.f32 %v2352_v13, %v2352_v13 }
 0x4f3   :  { %v2387_v62 = vsel %vm8034_vm6, %v2366_v47, 0.0  ;;  %v2369_v14 = vmul.f32 %v2353_v28, %v2353_v28  ;;  %v2389_v40 = vsel %vm8035_vm11, %v2367_v17, 0.0  ;;  %v2370_v19 = vmul.f32 %v2354_v53, %v2354_v53 }
 0x4f4   :  { %v2380_v3 = vadd.f32 %v2379_v41, %v2378_v26  ;;  %v2391_v32 = vsel %vm8036_vm5, %v2368_v7, 0.0  ;;  %v2371_v4 = vmul.f32 %v2355_v55, %v2355_v55  ;;  %v2372_v2 = vmul.f32 %v2356_v50, %v2356_v50 }
 0x4f5   :  { %v2393_v60 = vsel %vm8037_vm14, %v2369_v14, 0.0  ;;  %v2395_v44 = vsel %vm8038_vm1, %v2370_v19, 0.0  ;;  %v2373_v52 = vmul.f32 %v2357_v51, %v2357_v51  ;;  %v2374_v13 = vmul.f32 %v2358_v30, %v2358_v30  ;;  %vm8044_vm14 = vmmov %vm8038_vm1 }
 0x4f6   :  { %v2382_v22 = vadd.f32 %v2381_v45, %v2380_v3  ;;  %v2397_v20 = vsel %vm8039_vm8, %v2371_v4, 0.0  ;;  %v2399_v28 = vsel %vm8040_vm7, %v2372_v2, 0.0  ;;  %v2375_v53 = vmul.f32 %v2359_v49, %v2359_v49  ;;  %v3041_v4 = vld [vmem:[#allocation2 + $0x40] sm:$0xff]  ;;  %vm8045_vm8 = vmmov %vm8038_vm1 }
 0x4f7   :  { %v2401_v31 = vsel %vm8041_vm3, %v2373_v52, 0.0  ;;  %v2403_v55 = vsel %vm8042_vm12, %v2374_v13, 0.0  ;;  %v2424_v49 = vsub.s32 4, %v8004_v46  ;;  %vm2511_vm4 = vcmask 1041409   ;;  %v3045_v52 = vld [vmem:[#allocation2 + $0x60] sm:$0xff]  ;;  %vm8046_vm7 = vmmov %vm8038_vm1 }
 0x4f8   :  { %v2384_v35 = vadd.f32 %v2383_v21, %v2382_v22  ;;  %v2405_v50 = vsel %vm8043_vm2, %v2375_v53, 0.0  ;;  %vm2514_vm9 = vcmask 1042434   ;;  %vm2517_vm15 = vcmask 1043459  }
 0x4f9   :  { %vm2520_vm10 = vcmask 1044484   ;;  %vm2523_vm0 = vcmask 1045509   ;;  %vm2526_vm6 = vcmask 1046534   ;;  %vm2529_vm11 = vcmask 1047559  }
 0x4fa   :  { %v2386_v34 = vadd.f32 %v2385_v8, %v2384_v35  ;;  %v2444_v35 = vsub.s32 5, %v8004_v46  ;;  %vm2785_vm5 = vcmask 785408  }
 0x4fc   :  { %v2388_v10 = vadd.f32 %v2387_v62, %v2386_v34 }
 0x4fe   :  { %v2390_v27 = vadd.f32 %v2389_v40, %v2388_v10 }
 0x500   :  { %v2392_v57 = vadd.f32 %v2391_v32, %v2390_v27 }
 0x502   :  { %v2394_v16 = vadd.f32 %v2393_v60, %v2392_v57 }
 0x504   :  { %v2396_v11 = vadd.f32 %v2395_v44, %v2394_v16  ;;  %v3044_v44 = vld [vmem:[#allocation2 + $0x58] sm:$0xff] }
 0x506   :  { %v2398_v36 = vadd.f32 %v2397_v20, %v2396_v11 }
 0x508   :  { %v2400_v6 = vadd.f32 %v2399_v28, %v2398_v36  ;;  %v3046_v36 = vld [vmem:[#allocation2 + $0x70] sm:$0xff]  ;;  %v3047_v28 = vld [vmem:[#allocation2 + $0x78] sm:$0xff] }
 0x50a   :  { %v2402_v12 = vadd.f32 %v2401_v31, %v2400_v6 }
 0x50c   :  { %v2404_v1 = vadd.f32 %v2403_v55, %v2402_v12 }
 0x50e   :  { %v2406_v5 = vadd.f32 %v2405_v50, %v2404_v1 }
 0x510   :  { %v2407_v63 = vrot.slane %v2406_v5, 4 }
 0x512   :  { %v2408_v26 = vadd.f32 %v2407_v63, %v2406_v5 }
 0x514   :  { %v2409_v51 = vrot.slane %v2408_v26, 2 }
 0x516   :  { %v2410_v9 = vadd.f32 %v2409_v51, %v2408_v26 }
 0x518   :  { %v2411_v41 = vrot.slane %v2410_v9, 1 }
 0x51a   :  { %v2412_v3 = vadd.f32 %v2411_v41, %v2410_v9 }
 0x51c   :  { %v2413_v30 = vmul.f32 0.0078125, %v2412_v3 }
 0x51e   :  { %v2414_v29 = vadd.f32 1e-05, %v2413_v30 }
 0x520   :  { %3037 = vrsqrt.f32 %v2414_v29 }
 0x52a   :  { %v3038_v45 = vpop.eup %3037 }
 0x52b   :  { %v2416_v22 = vmul.f32 %v6398_v48, %v3038_v45 }
 0x52d   :  { %v2417_v47 = vmul.f32 %v2416_v22, %v6492_v18  ;;  %v2425_v21 = vrot.slane %v2416_v22, %v2424_v49 }
 0x52f   :  { %v2419_v17 = vrot.slane %v2417_v47, 7  ;;  %v2439_v8 = vmul.f32 %v2425_v21, %v6484_v25  ;;  %v2434_v34 = vmul.f32 %v2425_v21, %v6462_v0  ;;  %v2435_v7 = vmul.f32 %v2425_v21, %v6468_v33 }
 0x530   :  { %v2436_v62 = vmul.f32 %v6460_v37, %v2425_v21  ;;  %v2437_v10 = vmul.f32 %v6466_v58, %v2425_v21  ;;  %v2438_v14 = vmul.f32 %v2425_v21, %v6478_v15  ;;  %v2440_v40 = vmul.f32 %v6476_v39, %v2425_v21 }
 0x531   :  { %v2421_v18 = vsub.f32 %v6398_v48, %v2419_v17  ;;  %v2441_v27 = vmul.f32 %v6482_v23, %v2425_v21  ;;  %v2426_v46 = vmul.f32 %v2425_v21, %v6430_v42  ;;  %v2427_v25 = vmul.f32 %v2425_v21, %v6434_v61 }
 0x532   :  { %v2428_v0 = vmul.f32 %v6428_v24, %v2425_v21  ;;  %v2429_v33 = vmul.f32 %v6432_v38, %v2425_v21  ;;  %v2430_v37 = vmul.f32 %v2425_v21, %v6446_v54  ;;  %v2431_v58 = vmul.f32 %v2425_v21, %v6452_v56  ;;  %v3040_v54 = vld [vmem:[#allocation2 + $0x68] sm:$0xff] }
 0x533   :  { %v2445_v19 = vrot.slane %v2421_v18, %v2444_v35  ;;  %v2432_v15 = vmul.f32 %v6444_v59, %v2425_v21  ;;  %v2433_v39 = vmul.f32 %v6450_v43, %v2425_v21  ;;  %v3042_v59 = vld [vmem:[#allocation2 + $0x48] sm:$0xff]  ;;  %v3043_v43 = vld [vmem:[#allocation2 + $0x50] sm:$0xff] }
 0x535   :  { %v2459_v48 = vadd.f32 %v2445_v19, %v2439_v8  ;;  %v2454_v42 = vadd.f32 %v2445_v19, %v2434_v34  ;;  %v2455_v23 = vadd.f32 %v2445_v19, %v2435_v7  ;;  %v2456_v61 = vadd.f32 %v2445_v19, %v2436_v62 }
 0x536   :  { %v2457_v24 = vadd.f32 %v2445_v19, %v2437_v10  ;;  %v2458_v32 = vadd.f32 %v2445_v19, %v2438_v14  ;;  %v2460_v38 = vadd.f32 %v2445_v19, %v2440_v40  ;;  %v2461_v57 = vadd.f32 %v2445_v19, %v2441_v27  ;;  %v3048_v10 = vld [vmem:[#allocation2] sm:$0xff]  ;;  %v3049_v40 = vld [vmem:[#allocation2 + $0x8] sm:$0xff] }
 0x537   :  { %v2475_v56 = vadd.f32 %v3040_v54, %v2459_v48  ;;  %v2470_v60 = vadd.f32 %v3041_v4, %v2454_v42  ;;  %v2471_v16 = vadd.f32 %v3042_v59, %v2455_v23  ;;  %v2472_v2 = vadd.f32 %v3043_v43, %v2456_v61  ;;  %v3051_v42 = vld [vmem:[#allocation2 + $0x18] sm:$0xff] }
 0x538   :  { %v2473_v11 = vadd.f32 %v3044_v44, %v2457_v24  ;;  %v2474_v20 = vadd.f32 %v3045_v52, %v2458_v32  ;;  %v2476_v13 = vadd.f32 %v3046_v36, %v2460_v38  ;;  %v2477_v6 = vadd.f32 %v3047_v28, %v2461_v57  ;;  %v3055_v24 = vld [vmem:[#allocation2 + $0x38] sm:$0xff] }
 0x539   :  { %v6563_v53 = vmax.f32 %v2475_v56, 0.0  ;;  %v6565_v31 = vmax.f32 %v2470_v60, 0.0  ;;  %v6567_v12 = vmax.f32 %v2471_v16, 0.0  ;;  %v6569_v55 = vmax.f32 %v2472_v2, 0.0 }
 0x53a   :  { %v6571_v1 = vmax.f32 %v2473_v11, 0.0  ;;  %v6573_v50 = vmax.f32 %v2474_v20, 0.0  ;;  %v6575_v5 = vmax.f32 %v2476_v13, 0.0  ;;  %v6577_v63 = vmax.f32 %v2477_v6, 0.0 }
 0x53b   :  { %v2561_v26 = vrot.slane %v6565_v31, 1  ;;  %v2563_v51 = vrot.slane %v6569_v55, 7  ;;  %v2569_v9 = vrot.slane %v6563_v53, 4  ;;  %v2446_v41 = vadd.f32 %v2445_v19, %v2426_v46  ;;  %v3050_v46 = vld [vmem:[#allocation2 + $0x10] sm:$0xff] }
 0x53c   :  { %v2565_v3 = vrot.slane %v6571_v1, 6  ;;  %v2567_v30 = vrot.slane %v6573_v50, 5  ;;  %v2571_v29 = vrot.slane %v6575_v5, 3  ;;  %v2573_v49 = vrot.slane %v6577_v63, 2 }
 0x53d   :  { %v2562_v45 = vsel %vm2511_vm4, %v6567_v12, %v2561_v26  ;;  %v2447_v22 = vadd.f32 %v2445_v19, %v2427_v25  ;;  %v2448_v47 = vadd.f32 %v2445_v19, %v2428_v0  ;;  %v2449_v21 = vadd.f32 %v2445_v19, %v2429_v33  ;;  %v3052_v0 = vld [vmem:[#allocation2 + $0x20] sm:$0xff] }
 0x53e   :  { %v2564_v35 = vsel %vm2514_vm9, %v2563_v51, %v2562_v45  ;;  %v2450_v17 = vadd.f32 %v2445_v19, %v2430_v37  ;;  %v2451_v8 = vadd.f32 %v2445_v19, %v2431_v58  ;;  %v2452_v34 = vadd.f32 %v2445_v19, %v2432_v15  ;;  %v3053_v37 = vld [vmem:[#allocation2 + $0x28] sm:$0xff]  ;;  %v3054_v15 = vld [vmem:[#allocation2 + $0x30] sm:$0xff] }
 0x53f   :  { %v2566_v7 = vsel %vm2517_vm15, %v2565_v3, %v2564_v35  ;;  %v2453_v62 = vadd.f32 %v2445_v19, %v2433_v39  ;;  %v2462_v14 = vadd.f32 %v3048_v10, %v2446_v41  ;;  %v2463_v18 = vadd.f32 %v3049_v40, %v2447_v22 }
 0x540   :  { %v2568_v27 = vsel %vm2520_vm10, %v2567_v30, %v2566_v7  ;;  %v2464_v48 = vadd.f32 %v3050_v46, %v2448_v47  ;;  %v2465_v25 = vadd.f32 %v3051_v42, %v2449_v21  ;;  %v2466_v33 = vadd.f32 %v3052_v0, %v2450_v17 }
 0x541   :  { %v2570_v23 = vsel %vm2523_vm0, %v2569_v9, %v2568_v27  ;;  %v2467_v58 = vadd.f32 %v3053_v37, %v2451_v8  ;;  %v2468_v61 = vadd.f32 %v3054_v15, %v2452_v34  ;;  %v2469_v19 = vadd.f32 %v3055_v24, %v2453_v62 }
 0x542   :  { %v2572_v39 = vsel %vm2526_vm6, %v2571_v29, %v2570_v23  ;;  %v6593_v32 = vmax.f32 %v2462_v14, 0.0  ;;  %v6595_v38 = vmax.f32 %v2463_v18, 0.0  ;;  %v6597_v57 = vmax.f32 %v2464_v48, 0.0 }
 0x543   :  { %v2574_v54 = vsel %vm2529_vm11, %v2573_v49, %v2572_v39  ;;  %v6600_v56 = vmax.f32 %v2465_v25, 0.0  ;;  %v6602_v4 = vmax.f32 %v2466_v33, 0.0  ;;  %v6604_v60 = vmax.f32 %v2467_v58, 0.0 }
 0x544   :  { %2577 = vrot.lane.b32.xlu1 %v2574_v54, %s3108_s11  ;;  %v6607_v59 = vmax.f32 %v2468_v61, 0.0  ;;  %v6609_v16 = vmax.f32 %v2469_v19, 0.0  ;;  %v2547_v43 = vrot.slane %v6593_v32, 1  ;;  %v2549_v2 = vrot.slane %v6597_v57, 7 }
 0x545   :  { %v2551_v44 = vrot.slane %v6600_v56, 6  ;;  %v2553_v11 = vrot.slane %v6602_v4, 5  ;;  %v2693_v52 = vrot.slane %v6565_v31, 5  ;;  %v2555_v36 = vrot.slane %v6604_v60, 4 }
 0x546   :  { %v2548_v20 = vsel %vm2511_vm4, %v6595_v38, %v2547_v43  ;;  %v2557_v13 = vrot.slane %v6607_v59, 3  ;;  %v2694_v28 = vrot.slane %v6567_v12, 4  ;;  %v2559_v26 = vrot.slane %v6609_v16, 2 }
 0x547   :  { %v2550_v6 = vsel %vm2514_vm9, %v2549_v2, %v2548_v20  ;;  %v2696_v51 = vrot.slane %v6569_v55, 3  ;;  %v2698_v9 = vrot.slane %v6571_v1, 2  ;;  %v2700_v30 = vrot.slane %v6573_v50, 1 }
 0x548   :  { %v2552_v41 = vsel %vm2517_vm15, %v2551_v44, %v2550_v6  ;;  %v2695_v3 = vsel %vm2511_vm4, %v2694_v28, %v2693_v52  ;;  %v2703_v29 = vrot.slane %v6575_v5, 7  ;;  %v2679_v22 = vrot.slane %v6593_v32, 5 }
 0x549   :  { %v2554_v49 = vsel %vm2520_vm10, %v2553_v11, %v2552_v41  ;;  %v2697_v45 = vsel %vm2514_vm9, %v2696_v51, %v2695_v3  ;;  %v2680_v47 = vrot.slane %v6595_v38, 4  ;;  %v2705_v17 = vrot.slane %v6577_v63, 6 }
 0x54a   :  { %v2556_v21 = vsel %vm2523_vm0, %v2555_v36, %v2554_v49  ;;  %v2699_v35 = vsel %vm2517_vm15, %v2698_v9, %v2697_v45  ;;  %v2682_v8 = vrot.slane %v6597_v57, 3  ;;  %v2684_v10 = vrot.slane %v6600_v56, 2 }
 0x54b   :  { %v2558_v34 = vsel %vm2526_vm6, %v2557_v13, %v2556_v21  ;;  %v2701_v7 = vsel %vm2520_vm10, %v2700_v30, %v2699_v35  ;;  %v2681_v62 = vsel %vm2511_vm4, %v2680_v47, %v2679_v22  ;;  %v2686_v27 = vrot.slane %v6602_v4, 1 }
 0x54c   :  { %v2560_v14 = vsel %vm2529_vm11, %v2559_v26, %v2558_v34  ;;  %v2702_v40 = vsel %vm2523_vm0, %v6563_v53, %v2701_v7  ;;  %v2683_v18 = vsel %vm2514_vm9, %v2682_v8, %v2681_v62  ;;  %v2689_v42 = vrot.slane %v6607_v59, 7 }
 0x54d   :  { %2575 = vrot.lane.b32.xlu0 %v2560_v14, %s3108_s11  ;;  %v2704_v46 = vsel %vm2526_vm6, %v2703_v29, %v2702_v40  ;;  %v2685_v48 = vsel %vm2517_vm15, %v2684_v10, %v2683_v18  ;;  %v2595_v25 = vrot.slane %v6565_v31, 2  ;;  %v2691_v23 = vrot.slane %v6609_v16, 6 }
 0x54e   :  { %v2706_v0 = vsel %vm2529_vm11, %v2705_v17, %v2704_v46  ;;  %v2687_v33 = vsel %vm2520_vm10, %v2686_v27, %v2685_v48  ;;  %v2596_v37 = vrot.slane %v6567_v12, 1  ;;  %v2599_v15 = vrot.slane %v6571_v1, 7 }
 0x54f   :  { %2709 = vrot.lane.b32.xlu1 %v2706_v0, %s3108_s11  ;;  %v2688_v58 = vsel %vm2523_vm0, %v6604_v60, %v2687_v33  ;;  %v2601_v61 = vrot.slane %v6573_v50, 6  ;;  %v2603_v24 = vrot.slane %v6563_v53, 5  ;;  %v2605_v54 = vrot.slane %v6575_v5, 4 }
 0x550   :  { %v2690_v19 = vsel %vm2526_vm6, %v2689_v42, %v2688_v58  ;;  %v2597_v39 = vsel %vm2511_vm4, %v2596_v37, %v2595_v25  ;;  %v2581_v43 = vrot.slane %v6593_v32, 2  ;;  %v2607_v11 = vrot.slane %v6577_v63, 3 }
 0x551   :  { %v2692_v2 = vsel %vm2529_vm11, %v2691_v23, %v2690_v19  ;;  %v2598_v44 = vsel %vm2514_vm9, %v6569_v55, %v2597_v39  ;;  %v2582_v52 = vrot.slane %v6595_v38, 1  ;;  %v2585_v36 = vrot.slane %v6600_v56, 7 }
 0x552   :  { %2707 = vrot.lane.b32.xlu0 %v2692_v2, %s3108_s11  ;;  %v2600_v20 = vsel %vm2517_vm15, %v2599_v15, %v2598_v44  ;;  %v2587_v13 = vrot.slane %v6602_v4, 6  ;;  %v2589_v28 = vrot.slane %v6604_v60, 5  ;;  %v2591_v51 = vrot.slane %v6607_v59, 4 }
 0x553   :  { %v2602_v6 = vsel %vm2520_vm10, %v2601_v61, %v2600_v20  ;;  %v2583_v26 = vsel %vm2511_vm4, %v2582_v52, %v2581_v43  ;;  %v2727_v9 = vrot.slane %v6565_v31, 6  ;;  %v2728_v30 = vrot.slane %v6567_v12, 5 }
 0x554   :  { %v2604_v41 = vsel %vm2523_vm0, %v2603_v24, %v2602_v6  ;;  %v2584_v3 = vsel %vm2514_vm9, %v6597_v57, %v2583_v26  ;;  %v2730_v29 = vrot.slane %v6569_v55, 4  ;;  %v2593_v22 = vrot.slane %v6609_v16, 3 }
 0x555   :  { %v2606_v49 = vsel %vm2526_vm6, %v2605_v54, %v2604_v41  ;;  %v2586_v45 = vsel %vm2517_vm15, %v2585_v36, %v2584_v3  ;;  %v2732_v47 = vrot.slane %v6571_v1, 3  ;;  %v2729_v17 = vsel %vm2511_vm4, %v2728_v30, %v2727_v9 }
 0x556   :  { %v2608_v21 = vsel %vm2529_vm11, %v2607_v11, %v2606_v49  ;;  %v2588_v35 = vsel %vm2520_vm10, %v2587_v13, %v2586_v45  ;;  %v2734_v8 = vrot.slane %v6573_v50, 2  ;;  %v2731_v7 = vsel %vm2514_vm9, %v2730_v29, %v2729_v17 }
 0x557   :  { %2611 = vrot.lane.b32.xlu1 %v2608_v21, %s3113_s24  ;;  %v2590_v34 = vsel %vm2523_vm0, %v2589_v28, %v2588_v35  ;;  %v2736_v62 = vrot.slane %v6563_v53, 1  ;;  %v2713_v10 = vrot.slane %v6593_v32, 6  ;;  %v2733_v40 = vsel %vm2517_vm15, %v2732_v47, %v2731_v7 }
 0x558   :  { %v2592_v14 = vsel %vm2526_vm6, %v2591_v51, %v2590_v34  ;;  %v2714_v18 = vrot.slane %v6595_v38, 5  ;;  %v2716_v27 = vrot.slane %v6597_v57, 4  ;;  %v2735_v48 = vsel %vm2520_vm10, %v2734_v8, %v2733_v40 }
 0x559   :  { %v2594_v46 = vsel %vm2529_vm11, %v2593_v22, %v2592_v14  ;;  %v2739_v42 = vrot.slane %v6577_v63, 7  ;;  %v2718_v25 = vrot.slane %v6600_v56, 3  ;;  %v2737_v0 = vsel %vm2523_vm0, %v2736_v62, %v2735_v48 }
 0x55a   :  { %2609 = vrot.lane.b32.xlu0 %v2594_v46, %s3113_s24  ;;  %v2715_v33 = vsel %vm2511_vm4, %v2714_v18, %v2713_v10  ;;  %v2720_v23 = vrot.slane %v6602_v4, 2  ;;  %v2722_v37 = vrot.slane %v6604_v60, 1  ;;  %v2738_v58 = vsel %vm2526_vm6, %v6575_v5, %v2737_v0 }
 0x55b   :  { %v2717_v15 = vsel %vm2514_vm9, %v2716_v27, %v2715_v33  ;;  %v2629_v61 = vrot.slane %v6565_v31, 3  ;;  %v2630_v24 = vrot.slane %v6567_v12, 2  ;;  %v2740_v19 = vsel %vm2529_vm11, %v2739_v42, %v2738_v58 }
 0x55c   :  { %v2719_v39 = vsel %vm2517_vm15, %v2718_v25, %v2717_v15  ;;  %v2725_v54 = vrot.slane %v6609_v16, 7  ;;  %v2632_v43 = vrot.slane %v6569_v55, 1  ;;  %2743 = vrot.lane.b32.xlu1 %v2740_v19, %s3113_s24  ;;  %v2635_v11 = vrot.slane %v6573_v50, 7 }
 0x55d   :  { %v2721_v2 = vsel %vm2520_vm10, %v2720_v23, %v2719_v39  ;;  %v2631_v44 = vsel %vm2511_vm4, %v2630_v24, %v2629_v61  ;;  %v2637_v52 = vrot.slane %v6563_v53, 6  ;;  %v2639_v13 = vrot.slane %v6575_v5, 5 }
 0x55e   :  { %v2723_v20 = vsel %vm2523_vm0, %v2722_v37, %v2721_v2  ;;  %v2633_v36 = vsel %vm2514_vm9, %v2632_v43, %v2631_v44  ;;  %v2615_v28 = vrot.slane %v6593_v32, 3  ;;  %v2616_v51 = vrot.slane %v6595_v38, 2 }
 0x55f   :  { %v2724_v6 = vsel %vm2526_vm6, %v6607_v59, %v2723_v20  ;;  %v2634_v26 = vsel %vm2517_vm15, %v6571_v1, %v2633_v36  ;;  %v2618_v9 = vrot.slane %v6597_v57, 1  ;;  %v2641_v30 = vrot.slane %v6577_v63, 4 }
 0x560   :  { %v2726_v41 = vsel %vm2529_vm11, %v2725_v54, %v2724_v6  ;;  %v2636_v3 = vsel %vm2520_vm10, %v2635_v11, %v2634_v26  ;;  %v2621_v29 = vrot.slane %v6602_v4, 7  ;;  %v2617_v45 = vsel %vm2511_vm4, %v2616_v51, %v2615_v28 }
 0x561   :  { %2741 = vrot.lane.b32.xlu0 %v2726_v41, %s3113_s24  ;;  %v2638_v49 = vsel %vm2523_vm0, %v2637_v52, %v2636_v3  ;;  %v2623_v22 = vrot.slane %v6604_v60, 6  ;;  %v2625_v47 = vrot.slane %v6607_v59, 5  ;;  %v2619_v35 = vsel %vm2514_vm9, %v2618_v9, %v2617_v45 }
 0x562   :  { %v2640_v21 = vsel %vm2526_vm6, %v2639_v13, %v2638_v49  ;;  %v2761_v17 = vrot.slane %v6565_v31, 7  ;;  %v2762_v8 = vrot.slane %v6567_v12, 6  ;;  %v2620_v7 = vsel %vm2517_vm15, %v6600_v56, %v2619_v35 }
 0x563   :  { %v2642_v34 = vsel %vm2529_vm11, %v2641_v30, %v2640_v21  ;;  %v2627_v62 = vrot.slane %v6609_v16, 4  ;;  %v2764_v10 = vrot.slane %v6569_v55, 5  ;;  %v2622_v14 = vsel %vm2520_vm10, %v2621_v29, %v2620_v7 }
 0x564   :  { %2645 = vrot.lane.b32.xlu1 %v2642_v34, %s3115_s4  ;;  %v2763_v40 = vsel %vm2511_vm4, %v2762_v8, %v2761_v17  ;;  %v2766_v18 = vrot.slane %v6571_v1, 4  ;;  %v2768_v27 = vrot.slane %v6573_v50, 3  ;;  %v2624_v46 = vsel %vm2523_vm0, %v2623_v22, %v2622_v14 }
 0x565   :  { %v2765_v48 = vsel %vm2514_vm9, %v2764_v10, %v2763_v40  ;;  %v2770_v42 = vrot.slane %v6563_v53, 2  ;;  %v2747_v25 = vrot.slane %v6593_v32, 7  ;;  %v2626_v0 = vsel %vm2526_vm6, %v2625_v47, %v2624_v46 }
 0x566   :  { %v2767_v33 = vsel %vm2517_vm15, %v2766_v18, %v2765_v48  ;;  %v2748_v23 = vrot.slane %v6595_v38, 6  ;;  %v2750_v37 = vrot.slane %v6597_v57, 5  ;;  %v2628_v58 = vsel %vm2529_vm11, %v2627_v62, %v2626_v0 }
 0x567   :  { %v2769_v15 = vsel %vm2520_vm10, %v2768_v27, %v2767_v33  ;;  %v2772_v61 = vrot.slane %v6575_v5, 1  ;;  %2643 = vrot.lane.b32.xlu0 %v2628_v58, %s3115_s4  ;;  %v2752_v39 = vrot.slane %v6600_v56, 4  ;;  %v2754_v54 = vrot.slane %v6602_v4, 3 }
 0x568   :  { %v2771_v24 = vsel %vm2523_vm0, %v2770_v42, %v2769_v15  ;;  %v2749_v19 = vsel %vm2511_vm4, %v2748_v23, %v2747_v25  ;;  %v2531_v44 = vrot.slane %v6567_v12, 7  ;;  %v2533_v11 = vrot.slane %v6569_v55, 6 }
 0x569   :  { %v2773_v43 = vsel %vm2526_vm6, %v2772_v61, %v2771_v24  ;;  %v2751_v2 = vsel %vm2514_vm9, %v2750_v37, %v2749_v19  ;;  %v2756_v36 = vrot.slane %v6604_v60, 2  ;;  %v2758_v13 = vrot.slane %v6607_v59, 1 }
 0x56a   :  { %v2774_v52 = vsel %vm2529_vm11, %v6577_v63, %v2773_v43  ;;  %v2753_v20 = vsel %vm2517_vm15, %v2752_v39, %v2751_v2  ;;  %v2535_v6 = vrot.slane %v6571_v1, 5  ;;  %v2537_v26 = vrot.slane %v6573_v50, 4 }
 0x56b   :  { %2777 = vrot.lane.b32.xlu1 %v2774_v52, %s3115_s4  ;;  %v2755_v28 = vsel %vm2520_vm10, %v2754_v54, %v2753_v20  ;;  %v2539_v51 = vrot.slane %v6563_v53, 3  ;;  %v2532_v41 = vsel %vm2511_vm4, %v2531_v44, %v6565_v31  ;;  %v2510_v3 = vrot.slane %v6595_v38, 7 }
 0x56c   :  { %v2757_v9 = vsel %vm2523_vm0, %v2756_v36, %v2755_v28  ;;  %v2513_v30 = vrot.slane %v6597_v57, 6  ;;  %v2541_v49 = vrot.slane %v6575_v5, 2  ;;  %v2543_v45 = vrot.slane %v6577_v63, 1 }
 0x56d   :  { %v2759_v29 = vsel %vm2526_vm6, %v2758_v13, %v2757_v9  ;;  %v2534_v22 = vsel %vm2514_vm9, %v2533_v11, %v2532_v41  ;;  %v2516_v35 = vrot.slane %v6600_v56, 5  ;;  %v2519_v17 = vrot.slane %v6602_v4, 4 }
 0x56e   :  { %v2760_v47 = vsel %vm2529_vm11, %v6609_v16, %v2759_v29  ;;  %v2536_v21 = vsel %vm2517_vm15, %v2535_v6, %v2534_v22  ;;  %v2522_v34 = vrot.slane %v6604_v60, 3  ;;  %v2512_v7 = vsel %vm2511_vm4, %v2510_v3, %v6593_v32 }
 0x56f   :  { %2775 = vrot.lane.b32.xlu0 %v2760_v47, %s3115_s4  ;;  %v2538_v8 = vsel %vm2520_vm10, %v2537_v26, %v2536_v21  ;;  %v2663_v62 = vrot.slane %v6565_v31, 4  ;;  %v2515_v14 = vsel %vm2514_vm9, %v2513_v30, %v2512_v7  ;;  %v2664_v40 = vrot.slane %v6567_v12, 3 }
 0x570   :  { %v2540_v10 = vsel %vm2523_vm0, %v2539_v51, %v2538_v8  ;;  %v2666_v18 = vrot.slane %v6569_v55, 2  ;;  %v2525_v46 = vrot.slane %v6607_v59, 2  ;;  %v2528_v48 = vrot.slane %v6609_v16, 1 }
 0x571   :  { %v2542_v27 = vsel %vm2526_vm6, %v2541_v49, %v2540_v10  ;;  %v2518_v42 = vsel %vm2517_vm15, %v2516_v35, %v2515_v14  ;;  %v2665_v0 = vsel %vm2511_vm4, %v2664_v40, %v2663_v62  ;;  %v2668_v33 = vrot.slane %v6571_v1, 1 }
 0x572   :  { %v2544_v25 = vsel %vm2529_vm11, %v2543_v45, %v2542_v27  ;;  %v2521_v31 = vsel %vm2520_vm10, %v2519_v17, %v2518_v42  ;;  %v2667_v55 = vsel %vm2514_vm9, %v2666_v18, %v2665_v0  ;;  %v2671_v23 = vrot.slane %v6563_v53, 7 }
 0x573   :  { %v2524_v12 = vsel %vm2523_vm0, %v2522_v34, %v2521_v31  ;;  %v2649_v37 = vrot.slane %v6593_v32, 4  ;;  %v2669_v15 = vsel %vm2517_vm15, %v2668_v33, %v2667_v55  ;;  %v2650_v61 = vrot.slane %v6595_v38, 3 }
 0x574   :  { %v2527_v58 = vsel %vm2526_vm6, %v2525_v46, %v2524_v12  ;;  %v2652_v24 = vrot.slane %v6597_v57, 2  ;;  %v2670_v1 = vsel %vm2520_vm10, %v6573_v50, %v2669_v15  ;;  %v2673_v39 = vrot.slane %v6575_v5, 6 }
 0x575   :  { %v2530_v19 = vsel %vm2529_vm11, %v2528_v48, %v2527_v58  ;;  %v2672_v54 = vsel %vm2523_vm0, %v2671_v23, %v2670_v1  ;;  %v2675_v53 = vrot.slane %v6577_v63, 5  ;;  %v2651_v32 = vsel %vm2511_vm4, %v2650_v61, %v2649_v37 }
 0x576   :  { %v2654_v43 = vrot.slane %v6600_v56, 1  ;;  %v2674_v2 = vsel %vm2526_vm6, %v2673_v39, %v2672_v54  ;;  %v2653_v38 = vsel %vm2514_vm9, %v2652_v24, %v2651_v32  ;;  %v2657_v50 = vrot.slane %v6604_v60, 7 }
 0x577   :  { %v2676_v57 = vsel %vm2529_vm11, %v2675_v53, %v2674_v2  ;;  %v2659_v11 = vrot.slane %v6607_v59, 6  ;;  %v2661_v52 = vrot.slane %v6609_v16, 5 }
 0x578   :  { %v2655_v44 = vsel %vm2517_vm15, %v2654_v43, %v2653_v38 }
 0x579   :  { %v2656_v5 = vsel %vm2520_vm10, %v6602_v4, %v2655_v44 }
 0x57a   :  { %v2658_v63 = vsel %vm2523_vm0, %v2657_v50, %v2656_v5 }
 0x57b   :  { %v2660_v56 = vsel %vm2526_vm6, %v2659_v11, %v2658_v63 }
 0x57c   :  { %v2662_v20 = vsel %vm2529_vm11, %v2661_v52, %v2660_v56 }
 0x5b6   :  { %v2578_v36 = vpop.permute.xlu1 %2577 }
 0x5b7   :  { %v2782_v4 = vsel %vm8044_vm14, %v2544_v25, %v2578_v36 }
 0x5bf   :  { %v2576_v13 = vpop.permute.xlu0 %2575 }
 0x5c0   :  { %v2781_v3 = vsel %vm8038_vm1, %v2530_v19, %v2576_v13 }
 0x5c1   :  { %v2710_v28 = vpop.permute.xlu1 %2709 }
 0x5c2   :  { %v2789_v45 = vsel %vm8045_vm8, %v2676_v57, %v2710_v28 }
 0x5c4   :  { %v2708_v6 = vpop.permute.xlu0 %2707 }
 0x5c5   :  { %v2788_v35 = vsel %vm8046_vm7, %v2662_v20, %v2708_v6 }
 0x5c9   :  { %v2612_v26 = vpop.permute.xlu1 %2611 }
 0x5ca   :  { %v2784_v59 = vsel %vm1839_vm13, %v2782_v4, %v2612_v26 }
 0x5cc   :  { %v2610_v51 = vpop.permute.xlu0 %2609 }
 0x5cd   :  { %v2783_v30 = vsel %vm1839_vm13, %v2781_v3, %v2610_v51 }
 0x5ce   :  { %v2744_v60 = vpop.permute.xlu1 %2743 }
 0x5cf   :  { %v2791_v22 = vsel %vm1839_vm13, %v2789_v45, %v2744_v60 }
 0x5d3   :  { %v2742_v9 = vpop.permute.xlu0 %2741 }
 0x5d4   :  { %v2790_v17 = vsel %vm1839_vm13, %v2788_v35, %v2742_v9 }
 0x5d6   :  { %v2646_v41 = vpop.permute.xlu1 %2645 }
 0x5d7   :  { %v2787_v16 = vsel %vm2785_vm5, %v2784_v59, %v2646_v41 }
 0x5d8   :  { %2796 = vst [vmem:[#allocation5 + $0x10] sm:$0xff] %v2787_v16 }
 0x5d9   :  { %v2644_v29 = vpop.permute.xlu0 %2643 }
 0x5da   :  { %v2786_v49 = vsel %vm2785_vm5, %v2783_v30, %v2644_v29 }
 0x5db   :  { %2794 = vst [vmem:[#allocation5] sm:$0xff] %v2786_v49 }
 0x5dd   :  { %v2778_v47 = vpop.permute.xlu1 %2777 }
 0x5de   :  { %v2793_v21 = vsel %vm2785_vm5, %v2791_v22, %v2778_v47 }
 0x5df   :  { %2797 = vst [vmem:[#allocation5 + $0x18] sm:$0xff] %v2793_v21 }
 0x5e1   :  { %v2776_v8 = vpop.permute.xlu0 %2775 }
 0x5e2   :  { %v2792_v34 = vsel %vm2785_vm5, %v2790_v17, %v2776_v8 }
 0x5e3   :  { %2795 = vst [vmem:[#allocation5 + $0x8] sm:$0xff] %v2792_v34 }
 0x5e4   :  { %3089 = shalt.err (!%p3086_p12)
}
 0x5e5   :  { %s3090_s10 = scalar_lea.hbm %s6877_s5, 512 }
 0x5e6   :  { %p3091_p13 = scmp.ne.s32.totalorder %s6877_s5, %s3090_s10  ;;  %p3094_p0 = scmp.lt.u32.totalorder %s3090_s10, %s6877_s5 }
 0x5e8   :  { %p3096_p1 = pnand %p3094_p0, %p3091_p13 }
 0x5ea   :  { %3099 = shalt.err (!%p3096_p1)
}
 0x5eb   :  { %s3117_s13 = smov 256  }
 0x5ec   :  { %2809 = dma.vmem_to_hbm [thread:$0]  %s2804_s6, 512, %s6877_s5, [#allocation4], %s3117_s13, %s3117_s13, %s3114_s25  }
 0x5ed   :  { %3102 = dma.done.wait [#allocation4], 512  }
 0x5ee   :  { %3103 = vsyncadd [#allocation4], 4294966784 }
 0x5ef   :  { %2813 = vsyncpa [#allocation3], 1 }
 0x5f0   :  { %2814 = vsyncpa [#allocation4], 1 }

</bundles_post_ra>
